<compile_context>
chip_gen: v7x
topology: tpu7x:2x2x1
jax: 0.10.0
libtpu: 0.0.40
codegen_flags: <defaults>
</compile_context>

<pallas_src>
import jax
import jax.numpy as jnp
from jax.experimental import pallas as pl
from jax.experimental.pallas import tpu as pltpu


# ----------------------------------------------------------------------------
# Kernel
# ----------------------------------------------------------------------------
def _make_vdsr_kernel(H, W, C, nmid, PADL, HB, WB):
    HW = H * W

    def conv_taps(slabs, w_of_tap, b_row, relu):
        """3x3 conv over pre-shifted slabs.

        slabs: list of 3 bf16 arrays (HB, W, Cin), width-shifted by dx-1.
        w_of_tap(t): (Cin, Cout) bf16 weight for tap t = dy*3 + dx.
        b_row: (1, Cout) f32 bias.  Returns (H*W, Cout) f32.
        """
        cout = b_row.shape[-1]
        acc = jnp.zeros((HW, cout), jnp.float32)
        for dy in range(3):
            for dx in range(3):
                cin = slabs[dx].shape[-1]
                patch = slabs[dx][dy:dy + H].reshape(HW, cin)
                acc = acc + jnp.dot(patch, w_of_tap(dy * 3 + dx),
                                    preferred_element_type=jnp.float32)
        acc = acc + b_row
        if relu:
            acc = jnp.maximum(acc, 0.0)
        return acc

    def load_slabs(src_ref):
        # 3 width-shifted views of the padded activation, cast to bf16 for MXU.
        return [src_ref[:, PADL - 1 + dx: PADL - 1 + dx + W, :]
                .astype(jnp.bfloat16) for dx in range(3)]

    def store_interior(dst_ref, acc, cout):
        # interior rows [1, 1+H), cols [PADL, PADL+W)  (aligned sublane offset)
        dst_ref[1:1 + H, PADL:PADL + W, :] = acc.reshape(H, W, cout)

    def kernel(x_ref, wf_ref, bf_ref, wm_ref, bm_ref, wl_ref, bl_ref,
               o_ref, buf0, buf1):
        # Zero ping-pong buffers so the conv halo is a true zero pad.
        buf0[...] = jnp.zeros_like(buf0)
        buf1[...] = jnp.zeros_like(buf1)

        # ---- layer 1: C -> 64, ReLU (reads the padded input block) ----------
        x_slabs = [x_ref[0, :, PADL - 1 + dx: PADL - 1 + dx + W, :]
                   .astype(jnp.bfloat16) for dx in range(3)]
        act = conv_taps(x_slabs, lambda t: wf_ref[t], bf_ref[...], relu=True)
        store_interior(buf0, act, 64)

        # ---- middle layers: 64 -> 64, ReLU (pairs, ping-pong in VMEM) -------
        npairs = nmid // 2

        def pair_body(p, carry):
            li = 2 * p
            a = conv_taps(load_slabs(buf0),
                          lambda t: wm_ref[li * 9 + t], bm_ref[li], relu=True)
            store_interior(buf1, a, 64)
            lj = li + 1
            a = conv_taps(load_slabs(buf1),
                          lambda t: wm_ref[lj * 9 + t], bm_ref[lj], relu=True)
            store_interior(buf0, a, 64)
            return carry

        if npairs > 0:
            jax.lax.fori_loop(0, npairs, pair_body, 0)

        src = buf0
        if nmid % 2 == 1:  # odd number of middle layers -> one extra static one
            li = nmid - 1
            a = conv_taps(load_slabs(buf0),
                          lambda t: wm_ref[li * 9 + t], bm_ref[li], relu=True)
            store_interior(buf1, a, 64)
            src = buf1

        # ---- last layer: 64 -> C, no activation, fused residual add ---------
        acc = conv_taps(load_slabs(src), lambda t: wl_ref[t],
                        bl_ref[...], relu=False)
        x_int = x_ref[0, 1:1 + H, PADL:PADL + W, :].reshape(HW, C)
        o_ref[...] = (acc + x_int).reshape(1, H, W, C)

    return kernel


# ----------------------------------------------------------------------------
# Wrapper
# ----------------------------------------------------------------------------
@jax.jit
def vdsr_forward(x_nchw, params):
    N, C, H, W = x_nchw.shape
    w_first, b_first = params["w_first"], params["b_first"]
    w_mid, b_mid = params["w_mid"], params["b_mid"]
    w_last, b_last = params["w_last"], params["b_last"]
    nmid = w_mid.shape[0]

    PADL = 8                       # aligned left pad for interior stores
    HB = H + 2
    WB = PADL + W + PADL

    # NCHW -> NHWC (channels on lanes) + single zero pad of the input.
    x_nhwc = jnp.transpose(x_nchw, (0, 2, 3, 1))
    xp = jnp.pad(x_nhwc, ((0, 0), (1, 1), (PADL, WB - W - PADL), (0, 0)))

    # Weights: stacked lane-dense (tap, Cin, Cout) bf16; biases stay f32.
    wf = w_first.reshape(9, C, 64).astype(jnp.bfloat16)
    bf = b_first.reshape(1, 64).astype(jnp.float32)
    wm = w_mid.reshape(nmid * 9, 64, 64).astype(jnp.bfloat16)
    bm = b_mid.reshape(nmid, 1, 64).astype(jnp.float32)
    wl = w_last.reshape(9, 64, C).astype(jnp.bfloat16)
    bl = b_last.reshape(1, C).astype(jnp.float32)

    kernel = _make_vdsr_kernel(H, W, C, nmid, PADL, HB, WB)

    out_nhwc = pl.pallas_call(
        kernel,
        out_shape=jax.ShapeDtypeStruct((N, H, W, C), x_nchw.dtype),
        grid=(N,),
        in_specs=[
            pl.BlockSpec((1, HB, WB, C), lambda n: (n, 0, 0, 0)),
            pl.BlockSpec((9, C, 64), lambda n: (0, 0, 0)),
            pl.BlockSpec((1, 64), lambda n: (0, 0)),
            pl.BlockSpec((nmid * 9, 64, 64), lambda n: (0, 0, 0)),
            pl.BlockSpec((nmid, 1, 64), lambda n: (0, 0, 0)),
            pl.BlockSpec((9, 64, C), lambda n: (0, 0, 0)),
            pl.BlockSpec((1, C), lambda n: (0, 0)),
        ],
        out_specs=pl.BlockSpec((1, H, W, C), lambda n: (n, 0, 0, 0)),
        scratch_shapes=[pltpu.VMEM((HB, WB, 64), jnp.float32),
                        pltpu.VMEM((HB, WB, 64), jnp.float32)],
        compiler_params=pltpu.CompilerParams(
            dimension_semantics=("parallel",)),
    )(xp, wf, bf, wm, bm, wl, bl)

    return jnp.transpose(out_nhwc, (0, 3, 1, 2))


# ----------------------------------------------------------------------------
# Reference (plain JAX, mirrors the kernel's bf16-operand / f32-accum math)
# ----------------------------------------------------------------------------
@jax.jit
def vdsr_reference(x_nchw, params):
    x = jnp.transpose(x_nchw, (0, 2, 3, 1)).astype(jnp.float32)

    def conv(a, w, b, relu):
        y = jax.lax.conv_general_dilated(
            a.astype(jnp.bfloat16), w.astype(jnp.bfloat16),
            window_strides=(1, 1), padding="SAME",
            dimension_numbers=("NHWC", "HWIO", "NHWC"),
            preferred_element_type=jnp.float32)
        y = y + b.reshape(1, 1, 1, -1).astype(jnp.float32)
        if relu:
            y = jnp.maximum(y, 0.0)
        return y

    a = conv(x, params["w_first"], params["b_first"], True)
    nmid = params["w_mid"].shape[0]
    for i in range(nmid):
        a = conv(a, params["w_mid"][i], params["b_mid"][i], True)
    y = conv(a, params["w_last"], params["b_last"], False)
    return jnp.transpose(y + x, (0, 3, 1, 2))


# ----------------------------------------------------------------------------
# Deterministic synthetic params
# ----------------------------------------------------------------------------
def init_vdsr_params(key, channel, layers=20):
    def conv_init(k, cin, cout):
        kw_, kb_ = jax.random.split(k)
        bound = jnp.sqrt(6.0 / (9.0 * cin))   # keeps activations O(1) thru 20 layers
        w = jax.random.uniform(kw_, (3, 3, cin, cout), jnp.float32, -bound, bound)
        b = jax.random.uniform(kb_, (cout,), jnp.float32, -0.05, 0.05)
        return w, b

    nmid = layers - 2
    keys = jax.random.split(key, layers)
    w_first, b_first = conv_init(keys[0], channel, 64)
    wms, bms = [], []
    for i in range(nmid):
        w, b = conv_init(keys[1 + i], 64, 64)
        wms.append(w)
        bms.append(b)
    w_last, b_last = conv_init(keys[-1], 64, channel)
    return {
        "w_first": w_first, "b_first": b_first,
        "w_mid": jnp.stack(wms), "b_mid": jnp.stack(bms),
        "w_last": w_last, "b_last": b_last,
    }


if __name__ == "__main__":
    channel, layers = 3, 20
    N, H, W = 2, 16, 16

    key = jax.random.PRNGKey(0)
    x_key, p_key = jax.random.split(key)
    x = jax.random.normal(x_key, (N, channel, H, W), jnp.float32)
    params = init_vdsr_params(p_key, channel, layers)

    out = vdsr_forward(x, params)
    out = jax.block_until_ready(out)

    assert out.shape == x.shape, (out.shape, x.shape)
    assert out.dtype == jnp.float32
    assert bool(jnp.all(jnp.isfinite(out)))

    ref = jax.block_until_ready(vdsr_reference(x, params))
    err = float(jnp.max(jnp.abs(out - ref)))
    scale = 1.0 + float(jnp.max(jnp.abs(ref)))
    assert err <= 2e-2 * scale, ("numerical mismatch vs reference", err, scale)

    print("KERNEL_OK")
</pallas_src>

<mosaic_0001>
module attributes {stable_mosaic.version = 11 : i64} {
  func.func @kernel(%arg0: i32, %arg1: memref<1x18x32x3xf32, #tpu.memory_space<vmem>>, %arg2: memref<9x3x64xbf16, #tpu.memory_space<vmem>>, %arg3: memref<1x64xf32, #tpu.memory_space<vmem>>, %arg4: memref<162x64x64xbf16, #tpu.memory_space<vmem>>, %arg5: memref<18x1x64xf32, #tpu.memory_space<vmem>>, %arg6: memref<9x64x3xbf16, #tpu.memory_space<vmem>>, %arg7: memref<1x3xf32, #tpu.memory_space<vmem>>, %arg8: memref<1x16x16x3xf32, #tpu.memory_space<vmem>>, %arg9: memref<18x32x64xf32, #tpu.memory_space<vmem>>, %arg10: memref<18x32x64xf32, #tpu.memory_space<vmem>>) attributes {dimension_semantics = [#tpu.dimension_semantics<parallel>], iteration_bounds = array<i64: 2>, scalar_prefetch = 0 : i64, scratch_operands = 2 : i64, tpu.core_type = #tpu.core_type<tc>, window_params = [{transform_indices = @transform_0, window_bounds = array<i64: 1, 18, 32, 3>}, {pipeline_mode = #tpu.pipeline_mode<synchronous>, transform_indices = @transform_1, window_bounds = array<i64: 9, 3, 64>}, {pipeline_mode = #tpu.pipeline_mode<synchronous>, transform_indices = @transform_2, window_bounds = array<i64: 1, 64>}, {pipeline_mode = #tpu.pipeline_mode<synchronous>, transform_indices = @transform_3, window_bounds = array<i64: 162, 64, 64>}, {pipeline_mode = #tpu.pipeline_mode<synchronous>, transform_indices = @transform_4, window_bounds = array<i64: 18, 1, 64>}, {pipeline_mode = #tpu.pipeline_mode<synchronous>, transform_indices = @transform_5, window_bounds = array<i64: 9, 64, 3>}, {pipeline_mode = #tpu.pipeline_mode<synchronous>, transform_indices = @transform_6, window_bounds = array<i64: 1, 3>}, {transform_indices = @transform_7, window_bounds = array<i64: 1, 16, 16, 3>}]} {
    %cst = arith.constant 0.000000e+00 : f32
    %0 = vector.broadcast %cst : f32 to vector<18x32x64xf32>
    %c0 = arith.constant 0 : index
    %c0_0 = arith.constant 0 : index
    %c0_1 = arith.constant 0 : index
    %1 = vector.load %arg9[%c0, %c0_0, %c0_1] : memref<18x32x64xf32, #tpu.memory_space<vmem>>, vector<18x32x64xf32>
    tpu.vector_store %arg9[%c0, %c0_0, %c0_1], %0 {strides = array<i32>} : memref<18x32x64xf32, #tpu.memory_space<vmem>>, vector<18x32x64xf32>,
    %cst_2 = arith.constant 0.000000e+00 : f32
    %2 = vector.broadcast %cst_2 : f32 to vector<18x32x64xf32>
    %c0_3 = arith.constant 0 : index
    %c0_4 = arith.constant 0 : index
    %c0_5 = arith.constant 0 : index
    %3 = vector.load %arg10[%c0_3, %c0_4, %c0_5] : memref<18x32x64xf32, #tpu.memory_space<vmem>>, vector<18x32x64xf32>
    tpu.vector_store %arg10[%c0_3, %c0_4, %c0_5], %2 {strides = array<i32>} : memref<18x32x64xf32, #tpu.memory_space<vmem>>, vector<18x32x64xf32>,
    %c0_6 = arith.constant 0 : index
    %c0_7 = arith.constant 0 : index
    %c7 = arith.constant 7 : index
    %c0_8 = arith.constant 0 : index
    %4 = vector.load %arg1[%c0_6, %c0_7, %c7, %c0_8] : memref<1x18x32x3xf32, #tpu.memory_space<vmem>>, vector<1x18x16x3xf32>
    %5 = vector.shape_cast %4 : vector<1x18x16x3xf32> to vector<18x16x3xf32>
    %6 = arith.truncf %5 : vector<18x16x3xf32> to vector<18x16x3xbf16>
    %c0_9 = arith.constant 0 : index
    %c0_10 = arith.constant 0 : index
    %c8 = arith.constant 8 : index
    %c0_11 = arith.constant 0 : index
    %7 = vector.load %arg1[%c0_9, %c0_10, %c8, %c0_11] : memref<1x18x32x3xf32, #tpu.memory_space<vmem>>, vector<1x18x16x3xf32>
    %8 = vector.shape_cast %7 : vector<1x18x16x3xf32> to vector<18x16x3xf32>
    %9 = arith.truncf %8 : vector<18x16x3xf32> to vector<18x16x3xbf16>
    %c0_12 = arith.constant 0 : index
    %c0_13 = arith.constant 0 : index
    %c9 = arith.constant 9 : index
    %c0_14 = arith.constant 0 : index
    %10 = vector.load %arg1[%c0_12, %c0_13, %c9, %c0_14] : memref<1x18x32x3xf32, #tpu.memory_space<vmem>>, vector<1x18x16x3xf32>
    %11 = vector.shape_cast %10 : vector<1x18x16x3xf32> to vector<18x16x3xf32>
    %12 = arith.truncf %11 : vector<18x16x3xf32> to vector<18x16x3xbf16>
    %c0_15 = arith.constant 0 : index
    %c0_16 = arith.constant 0 : index
    %13 = vector.load %arg3[%c0_15, %c0_16] : memref<1x64xf32, #tpu.memory_space<vmem>>, vector<1x64xf32>
    %cst_17 = arith.constant 0.000000e+00 : f32
    %14 = vector.broadcast %cst_17 : f32 to vector<256x64xf32>
    %15 = vector.extract_strided_slice %6 {offsets = [0, 0, 0], sizes = [16, 16, 3], strides = [1, 1, 1]} : vector<18x16x3xbf16> to vector<16x16x3xbf16>
    %16 = vector.shape_cast %15 : vector<16x16x3xbf16> to vector<256x3xbf16>
    %c0_18 = arith.constant 0 : index
    %c0_19 = arith.constant 0 : index
    %c0_20 = arith.constant 0 : index
    %17 = vector.load %arg2[%c0_18, %c0_19, %c0_20] : memref<9x3x64xbf16, #tpu.memory_space<vmem>>, vector<1x3x64xbf16>
    %18 = vector.shape_cast %17 : vector<1x3x64xbf16> to vector<3x64xbf16>
    %cst_21 = arith.constant dense<0.000000e+00> : vector<256x64xf32>
    %19 = tpu.matmul %16, %18, %cst_21 {dimension_numbers = #tpu.dot_dimension_numbers<[1], [0], [0], [1], [0, 0, 1, 1], [], []>} : vector<256x3xbf16>, vector<3x64xbf16>, vector<256x64xf32> -> vector<256x64xf32>
    %20 = arith.addf %14, %19 : vector<256x64xf32>
    %21 = vector.extract_strided_slice %9 {offsets = [0, 0, 0], sizes = [16, 16, 3], strides = [1, 1, 1]} : vector<18x16x3xbf16> to vector<16x16x3xbf16>
    %22 = vector.shape_cast %21 : vector<16x16x3xbf16> to vector<256x3xbf16>
    %c1 = arith.constant 1 : index
    %c0_22 = arith.constant 0 : index
    %c0_23 = arith.constant 0 : index
    %23 = vector.load %arg2[%c1, %c0_22, %c0_23] : memref<9x3x64xbf16, #tpu.memory_space<vmem>>, vector<1x3x64xbf16>
    %24 = vector.shape_cast %23 : vector<1x3x64xbf16> to vector<3x64xbf16>
    %cst_24 = arith.constant dense<0.000000e+00> : vector<256x64xf32>
    %25 = tpu.matmul %22, %24, %cst_24 {dimension_numbers = #tpu.dot_dimension_numbers<[1], [0], [0], [1], [0, 0, 1, 1], [], []>} : vector<256x3xbf16>, vector<3x64xbf16>, vector<256x64xf32> -> vector<256x64xf32>
    %26 = arith.addf %20, %25 : vector<256x64xf32>
    %27 = vector.extract_strided_slice %12 {offsets = [0, 0, 0], sizes = [16, 16, 3], strides = [1, 1, 1]} : vector<18x16x3xbf16> to vector<16x16x3xbf16>
    %28 = vector.shape_cast %27 : vector<16x16x3xbf16> to vector<256x3xbf16>
    %c2 = arith.constant 2 : index
    %c0_25 = arith.constant 0 : index
    %c0_26 = arith.constant 0 : index
    %29 = vector.load %arg2[%c2, %c0_25, %c0_26] : memref<9x3x64xbf16, #tpu.memory_space<vmem>>, vector<1x3x64xbf16>
    %30 = vector.shape_cast %29 : vector<1x3x64xbf16> to vector<3x64xbf16>
    %cst_27 = arith.constant dense<0.000000e+00> : vector<256x64xf32>
    %31 = tpu.matmul %28, %30, %cst_27 {dimension_numbers = #tpu.dot_dimension_numbers<[1], [0], [0], [1], [0, 0, 1, 1], [], []>} : vector<256x3xbf16>, vector<3x64xbf16>, vector<256x64xf32> -> vector<256x64xf32>
    %32 = arith.addf %26, %31 : vector<256x64xf32>
    %33 = vector.extract_strided_slice %6 {offsets = [1, 0, 0], sizes = [16, 16, 3], strides = [1, 1, 1]} : vector<18x16x3xbf16> to vector<16x16x3xbf16>
    %34 = vector.shape_cast %33 : vector<16x16x3xbf16> to vector<256x3xbf16>
    %c3 = arith.constant 3 : index
    %c0_28 = arith.constant 0 : index
    %c0_29 = arith.constant 0 : index
    %35 = vector.load %arg2[%c3, %c0_28, %c0_29] : memref<9x3x64xbf16, #tpu.memory_space<vmem>>, vector<1x3x64xbf16>
    %36 = vector.shape_cast %35 : vector<1x3x64xbf16> to vector<3x64xbf16>
    %cst_30 = arith.constant dense<0.000000e+00> : vector<256x64xf32>
    %37 = tpu.matmul %34, %36, %cst_30 {dimension_numbers = #tpu.dot_dimension_numbers<[1], [0], [0], [1], [0, 0, 1, 1], [], []>} : vector<256x3xbf16>, vector<3x64xbf16>, vector<256x64xf32> -> vector<256x64xf32>
    %38 = arith.addf %32, %37 : vector<256x64xf32>
    %39 = vector.extract_strided_slice %9 {offsets = [1, 0, 0], sizes = [16, 16, 3], strides = [1, 1, 1]} : vector<18x16x3xbf16> to vector<16x16x3xbf16>
    %40 = vector.shape_cast %39 : vector<16x16x3xbf16> to vector<256x3xbf16>
    %c4 = arith.constant 4 : index
    %c0_31 = arith.constant 0 : index
    %c0_32 = arith.constant 0 : index
    %41 = vector.load %arg2[%c4, %c0_31, %c0_32] : memref<9x3x64xbf16, #tpu.memory_space<vmem>>, vector<1x3x64xbf16>
    %42 = vector.shape_cast %41 : vector<1x3x64xbf16> to vector<3x64xbf16>
    %cst_33 = arith.constant dense<0.000000e+00> : vector<256x64xf32>
    %43 = tpu.matmul %40, %42, %cst_33 {dimension_numbers = #tpu.dot_dimension_numbers<[1], [0], [0], [1], [0, 0, 1, 1], [], []>} : vector<256x3xbf16>, vector<3x64xbf16>, vector<256x64xf32> -> vector<256x64xf32>
    %44 = arith.addf %38, %43 : vector<256x64xf32>
    %45 = vector.extract_strided_slice %12 {offsets = [1, 0, 0], sizes = [16, 16, 3], strides = [1, 1, 1]} : vector<18x16x3xbf16> to vector<16x16x3xbf16>
    %46 = vector.shape_cast %45 : vector<16x16x3xbf16> to vector<256x3xbf16>
    %c5 = arith.constant 5 : index
    %c0_34 = arith.constant 0 : index
    %c0_35 = arith.constant 0 : index
    %47 = vector.load %arg2[%c5, %c0_34, %c0_35] : memref<9x3x64xbf16, #tpu.memory_space<vmem>>, vector<1x3x64xbf16>
    %48 = vector.shape_cast %47 : vector<1x3x64xbf16> to vector<3x64xbf16>
    %cst_36 = arith.constant dense<0.000000e+00> : vector<256x64xf32>
    %49 = tpu.matmul %46, %48, %cst_36 {dimension_numbers = #tpu.dot_dimension_numbers<[1], [0], [0], [1], [0, 0, 1, 1], [], []>} : vector<256x3xbf16>, vector<3x64xbf16>, vector<256x64xf32> -> vector<256x64xf32>
    %50 = arith.addf %44, %49 : vector<256x64xf32>
    %51 = vector.extract_strided_slice %6 {offsets = [2, 0, 0], sizes = [16, 16, 3], strides = [1, 1, 1]} : vector<18x16x3xbf16> to vector<16x16x3xbf16>
    %52 = vector.shape_cast %51 : vector<16x16x3xbf16> to vector<256x3xbf16>
    %c6 = arith.constant 6 : index
    %c0_37 = arith.constant 0 : index
    %c0_38 = arith.constant 0 : index
    %53 = vector.load %arg2[%c6, %c0_37, %c0_38] : memref<9x3x64xbf16, #tpu.memory_space<vmem>>, vector<1x3x64xbf16>
    %54 = vector.shape_cast %53 : vector<1x3x64xbf16> to vector<3x64xbf16>
    %cst_39 = arith.constant dense<0.000000e+00> : vector<256x64xf32>
    %55 = tpu.matmul %52, %54, %cst_39 {dimension_numbers = #tpu.dot_dimension_numbers<[1], [0], [0], [1], [0, 0, 1, 1], [], []>} : vector<256x3xbf16>, vector<3x64xbf16>, vector<256x64xf32> -> vector<256x64xf32>
    %56 = arith.addf %50, %55 : vector<256x64xf32>
    %57 = vector.extract_strided_slice %9 {offsets = [2, 0, 0], sizes = [16, 16, 3], strides = [1, 1, 1]} : vector<18x16x3xbf16> to vector<16x16x3xbf16>
    %58 = vector.shape_cast %57 : vector<16x16x3xbf16> to vector<256x3xbf16>
    %c7_40 = arith.constant 7 : index
    %c0_41 = arith.constant 0 : index
    %c0_42 = arith.constant 0 : index
    %59 = vector.load %arg2[%c7_40, %c0_41, %c0_42] : memref<9x3x64xbf16, #tpu.memory_space<vmem>>, vector<1x3x64xbf16>
    %60 = vector.shape_cast %59 : vector<1x3x64xbf16> to vector<3x64xbf16>
    %cst_43 = arith.constant dense<0.000000e+00> : vector<256x64xf32>
    %61 = tpu.matmul %58, %60, %cst_43 {dimension_numbers = #tpu.dot_dimension_numbers<[1], [0], [0], [1], [0, 0, 1, 1], [], []>} : vector<256x3xbf16>, vector<3x64xbf16>, vector<256x64xf32> -> vector<256x64xf32>
    %62 = arith.addf %56, %61 : vector<256x64xf32>
    %63 = vector.extract_strided_slice %12 {offsets = [2, 0, 0], sizes = [16, 16, 3], strides = [1, 1, 1]} : vector<18x16x3xbf16> to vector<16x16x3xbf16>
    %64 = vector.shape_cast %63 : vector<16x16x3xbf16> to vector<256x3xbf16>
    %c8_44 = arith.constant 8 : index
    %c0_45 = arith.constant 0 : index
    %c0_46 = arith.constant 0 : index
    %65 = vector.load %arg2[%c8_44, %c0_45, %c0_46] : memref<9x3x64xbf16, #tpu.memory_space<vmem>>, vector<1x3x64xbf16>
    %66 = vector.shape_cast %65 : vector<1x3x64xbf16> to vector<3x64xbf16>
    %cst_47 = arith.constant dense<0.000000e+00> : vector<256x64xf32>
    %67 = tpu.matmul %64, %66, %cst_47 {dimension_numbers = #tpu.dot_dimension_numbers<[1], [0], [0], [1], [0, 0, 1, 1], [], []>} : vector<256x3xbf16>, vector<3x64xbf16>, vector<256x64xf32> -> vector<256x64xf32>
    %68 = arith.addf %62, %67 : vector<256x64xf32>
    %69 = vector.broadcast %13 : vector<1x64xf32> to vector<256x64xf32>
    %70 = arith.addf %68, %69 : vector<256x64xf32>
    %cst_48 = arith.constant 0.000000e+00 : f32
    %71 = vector.broadcast %cst_48 : f32 to vector<256x64xf32>
    %72 = arith.maximumf %70, %71 : vector<256x64xf32>
    %73 = vector.shape_cast %72 : vector<256x64xf32> to vector<16x16x64xf32>
    %c1_49 = arith.constant 1 : index
    %c8_50 = arith.constant 8 : index
    %c0_51 = arith.constant 0 : index
    %74 = vector.load %arg9[%c1_49, %c8_50, %c0_51] : memref<18x32x64xf32, #tpu.memory_space<vmem>>, vector<16x16x64xf32>
    tpu.vector_store %arg9[%c1_49, %c8_50, %c0_51], %73 {strides = array<i32>} : memref<18x32x64xf32, #tpu.memory_space<vmem>>, vector<16x16x64xf32>,
    %c0_i32 = arith.constant 0 : i32
    %c9_i32 = arith.constant 9 : i32
    %75 = arith.addi %c0_i32, %c9_i32 : i32
    %c1_i32 = arith.constant 1 : i32
    scf.for %arg11 = %c0_i32 to %75 step %c1_i32  : i32 {
      %c2_i32 = arith.constant 2 : i32
      %146 = arith.muli %c2_i32, %arg11 : i32
      %c0_109 = arith.constant 0 : index
      %c7_110 = arith.constant 7 : index
      %c0_111 = arith.constant 0 : index
      %147 = vector.load %arg9[%c0_109, %c7_110, %c0_111] : memref<18x32x64xf32, #tpu.memory_space<vmem>>, vector<18x16x64xf32>
      %148 = arith.truncf %147 : vector<18x16x64xf32> to vector<18x16x64xbf16>
      %c0_112 = arith.constant 0 : index
      %c8_113 = arith.constant 8 : index
      %c0_114 = arith.constant 0 : index
      %149 = vector.load %arg9[%c0_112, %c8_113, %c0_114] : memref<18x32x64xf32, #tpu.memory_space<vmem>>, vector<18x16x64xf32>
      %150 = arith.truncf %149 : vector<18x16x64xf32> to vector<18x16x64xbf16>
      %c0_115 = arith.constant 0 : index
      %c9_116 = arith.constant 9 : index
      %c0_117 = arith.constant 0 : index
      %151 = vector.load %arg9[%c0_115, %c9_116, %c0_117] : memref<18x32x64xf32, #tpu.memory_space<vmem>>, vector<18x16x64xf32>
      %152 = arith.truncf %151 : vector<18x16x64xf32> to vector<18x16x64xbf16>
      %153 = arith.index_cast %146 : i32 to index
      %c0_118 = arith.constant 0 : index
      %c0_119 = arith.constant 0 : index
      %154 = vector.load %arg5[%153, %c0_118, %c0_119] : memref<18x1x64xf32, #tpu.memory_space<vmem>>, vector<1x1x64xf32>
      %155 = vector.shape_cast %154 : vector<1x1x64xf32> to vector<1x64xf32>
      %cst_120 = arith.constant 0.000000e+00 : f32
      %156 = vector.broadcast %cst_120 : f32 to vector<256x64xf32>
      %157 = vector.extract_strided_slice %148 {offsets = [0, 0, 0], sizes = [16, 16, 64], strides = [1, 1, 1]} : vector<18x16x64xbf16> to vector<16x16x64xbf16>
      %158 = vector.shape_cast %157 : vector<16x16x64xbf16> to vector<256x64xbf16>
      %c9_i32_121 = arith.constant 9 : i32
      %159 = arith.muli %146, %c9_i32_121 : i32
      %c0_i32_122 = arith.constant 0 : i32
      %160 = arith.addi %159, %c0_i32_122 : i32
      %161 = arith.index_cast %160 : i32 to index
      %c0_123 = arith.constant 0 : index
      %c0_124 = arith.constant 0 : index
      %162 = vector.load %arg4[%161, %c0_123, %c0_124] : memref<162x64x64xbf16, #tpu.memory_space<vmem>>, vector<1x64x64xbf16>
      %163 = vector.shape_cast %162 : vector<1x64x64xbf16> to vector<64x64xbf16>
      %cst_125 = arith.constant dense<0.000000e+00> : vector<256x64xf32>
      %164 = tpu.matmul %158, %163, %cst_125 {dimension_numbers = #tpu.dot_dimension_numbers<[1], [0], [0], [1], [0, 0, 1, 1], [], []>} : vector<256x64xbf16>, vector<64x64xbf16>, vector<256x64xf32> -> vector<256x64xf32>
      %165 = arith.addf %156, %164 : vector<256x64xf32>
      %166 = vector.extract_strided_slice %150 {offsets = [0, 0, 0], sizes = [16, 16, 64], strides = [1, 1, 1]} : vector<18x16x64xbf16> to vector<16x16x64xbf16>
      %167 = vector.shape_cast %166 : vector<16x16x64xbf16> to vector<256x64xbf16>
      %c9_i32_126 = arith.constant 9 : i32
      %168 = arith.muli %146, %c9_i32_126 : i32
      %c1_i32_127 = arith.constant 1 : i32
      %169 = arith.addi %168, %c1_i32_127 : i32
      %170 = arith.index_cast %169 : i32 to index
      %c0_128 = arith.constant 0 : index
      %c0_129 = arith.constant 0 : index
      %171 = vector.load %arg4[%170, %c0_128, %c0_129] : memref<162x64x64xbf16, #tpu.memory_space<vmem>>, vector<1x64x64xbf16>
      %172 = vector.shape_cast %171 : vector<1x64x64xbf16> to vector<64x64xbf16>
      %cst_130 = arith.constant dense<0.000000e+00> : vector<256x64xf32>
      %173 = tpu.matmul %167, %172, %cst_130 {dimension_numbers = #tpu.dot_dimension_numbers<[1], [0], [0], [1], [0, 0, 1, 1], [], []>} : vector<256x64xbf16>, vector<64x64xbf16>, vector<256x64xf32> -> vector<256x64xf32>
      %174 = arith.addf %165, %173 : vector<256x64xf32>
      %175 = vector.extract_strided_slice %152 {offsets = [0, 0, 0], sizes = [16, 16, 64], strides = [1, 1, 1]} : vector<18x16x64xbf16> to vector<16x16x64xbf16>
      %176 = vector.shape_cast %175 : vector<16x16x64xbf16> to vector<256x64xbf16>
      %c9_i32_131 = arith.constant 9 : i32
      %177 = arith.muli %146, %c9_i32_131 : i32
      %c2_i32_132 = arith.constant 2 : i32
      %178 = arith.addi %177, %c2_i32_132 : i32
      %179 = arith.index_cast %178 : i32 to index
      %c0_133 = arith.constant 0 : index
      %c0_134 = arith.constant 0 : index
      %180 = vector.load %arg4[%179, %c0_133, %c0_134] : memref<162x64x64xbf16, #tpu.memory_space<vmem>>, vector<1x64x64xbf16>
      %181 = vector.shape_cast %180 : vector<1x64x64xbf16> to vector<64x64xbf16>
      %cst_135 = arith.constant dense<0.000000e+00> : vector<256x64xf32>
      %182 = tpu.matmul %176, %181, %cst_135 {dimension_numbers = #tpu.dot_dimension_numbers<[1], [0], [0], [1], [0, 0, 1, 1], [], []>} : vector<256x64xbf16>, vector<64x64xbf16>, vector<256x64xf32> -> vector<256x64xf32>
      %183 = arith.addf %174, %182 : vector<256x64xf32>
      %184 = vector.extract_strided_slice %148 {offsets = [1, 0, 0], sizes = [16, 16, 64], strides = [1, 1, 1]} : vector<18x16x64xbf16> to vector<16x16x64xbf16>
      %185 = vector.shape_cast %184 : vector<16x16x64xbf16> to vector<256x64xbf16>
      %c9_i32_136 = arith.constant 9 : i32
      %186 = arith.muli %146, %c9_i32_136 : i32
      %c3_i32 = arith.constant 3 : i32
      %187 = arith.addi %186, %c3_i32 : i32
      %188 = arith.index_cast %187 : i32 to index
      %c0_137 = arith.constant 0 : index
      %c0_138 = arith.constant 0 : index
      %189 = vector.load %arg4[%188, %c0_137, %c0_138] : memref<162x64x64xbf16, #tpu.memory_space<vmem>>, vector<1x64x64xbf16>
      %190 = vector.shape_cast %189 : vector<1x64x64xbf16> to vector<64x64xbf16>
      %cst_139 = arith.constant dense<0.000000e+00> : vector<256x64xf32>
      %191 = tpu.matmul %185, %190, %cst_139 {dimension_numbers = #tpu.dot_dimension_numbers<[1], [0], [0], [1], [0, 0, 1, 1], [], []>} : vector<256x64xbf16>, vector<64x64xbf16>, vector<256x64xf32> -> vector<256x64xf32>
      %192 = arith.addf %183, %191 : vector<256x64xf32>
      %193 = vector.extract_strided_slice %150 {offsets = [1, 0, 0], sizes = [16, 16, 64], strides = [1, 1, 1]} : vector<18x16x64xbf16> to vector<16x16x64xbf16>
      %194 = vector.shape_cast %193 : vector<16x16x64xbf16> to vector<256x64xbf16>
      %c9_i32_140 = arith.constant 9 : i32
      %195 = arith.muli %146, %c9_i32_140 : i32
      %c4_i32 = arith.constant 4 : i32
      %196 = arith.addi %195, %c4_i32 : i32
      %197 = arith.index_cast %196 : i32 to index
      %c0_141 = arith.constant 0 : index
      %c0_142 = arith.constant 0 : index
      %198 = vector.load %arg4[%197, %c0_141, %c0_142] : memref<162x64x64xbf16, #tpu.memory_space<vmem>>, vector<1x64x64xbf16>
      %199 = vector.shape_cast %198 : vector<1x64x64xbf16> to vector<64x64xbf16>
      %cst_143 = arith.constant dense<0.000000e+00> : vector<256x64xf32>
      %200 = tpu.matmul %194, %199, %cst_143 {dimension_numbers = #tpu.dot_dimension_numbers<[1], [0], [0], [1], [0, 0, 1, 1], [], []>} : vector<256x64xbf16>, vector<64x64xbf16>, vector<256x64xf32> -> vector<256x64xf32>
      %201 = arith.addf %192, %200 : vector<256x64xf32>
      %202 = vector.extract_strided_slice %152 {offsets = [1, 0, 0], sizes = [16, 16, 64], strides = [1, 1, 1]} : vector<18x16x64xbf16> to vector<16x16x64xbf16>
      %203 = vector.shape_cast %202 : vector<16x16x64xbf16> to vector<256x64xbf16>
      %c9_i32_144 = arith.constant 9 : i32
      %204 = arith.muli %146, %c9_i32_144 : i32
      %c5_i32 = arith.constant 5 : i32
      %205 = arith.addi %204, %c5_i32 : i32
      %206 = arith.index_cast %205 : i32 to index
      %c0_145 = arith.constant 0 : index
      %c0_146 = arith.constant 0 : index
      %207 = vector.load %arg4[%206, %c0_145, %c0_146] : memref<162x64x64xbf16, #tpu.memory_space<vmem>>, vector<1x64x64xbf16>
      %208 = vector.shape_cast %207 : vector<1x64x64xbf16> to vector<64x64xbf16>
      %cst_147 = arith.constant dense<0.000000e+00> : vector<256x64xf32>
      %209 = tpu.matmul %203, %208, %cst_147 {dimension_numbers = #tpu.dot_dimension_numbers<[1], [0], [0], [1], [0, 0, 1, 1], [], []>} : vector<256x64xbf16>, vector<64x64xbf16>, vector<256x64xf32> -> vector<256x64xf32>
      %210 = arith.addf %201, %209 : vector<256x64xf32>
      %211 = vector.extract_strided_slice %148 {offsets = [2, 0, 0], sizes = [16, 16, 64], strides = [1, 1, 1]} : vector<18x16x64xbf16> to vector<16x16x64xbf16>
      %212 = vector.shape_cast %211 : vector<16x16x64xbf16> to vector<256x64xbf16>
      %c9_i32_148 = arith.constant 9 : i32
      %213 = arith.muli %146, %c9_i32_148 : i32
      %c6_i32 = arith.constant 6 : i32
      %214 = arith.addi %213, %c6_i32 : i32
      %215 = arith.index_cast %214 : i32 to index
      %c0_149 = arith.constant 0 : index
      %c0_150 = arith.constant 0 : index
      %216 = vector.load %arg4[%215, %c0_149, %c0_150] : memref<162x64x64xbf16, #tpu.memory_space<vmem>>, vector<1x64x64xbf16>
      %217 = vector.shape_cast %216 : vector<1x64x64xbf16> to vector<64x64xbf16>
      %cst_151 = arith.constant dense<0.000000e+00> : vector<256x64xf32>
      %218 = tpu.matmul %212, %217, %cst_151 {dimension_numbers = #tpu.dot_dimension_numbers<[1], [0], [0], [1], [0, 0, 1, 1], [], []>} : vector<256x64xbf16>, vector<64x64xbf16>, vector<256x64xf32> -> vector<256x64xf32>
      %219 = arith.addf %210, %218 : vector<256x64xf32>
      %220 = vector.extract_strided_slice %150 {offsets = [2, 0, 0], sizes = [16, 16, 64], strides = [1, 1, 1]} : vector<18x16x64xbf16> to vector<16x16x64xbf16>
      %221 = vector.shape_cast %220 : vector<16x16x64xbf16> to vector<256x64xbf16>
      %c9_i32_152 = arith.constant 9 : i32
      %222 = arith.muli %146, %c9_i32_152 : i32
      %c7_i32 = arith.constant 7 : i32
      %223 = arith.addi %222, %c7_i32 : i32
      %224 = arith.index_cast %223 : i32 to index
      %c0_153 = arith.constant 0 : index
      %c0_154 = arith.constant 0 : index
      %225 = vector.load %arg4[%224, %c0_153, %c0_154] : memref<162x64x64xbf16, #tpu.memory_space<vmem>>, vector<1x64x64xbf16>
      %226 = vector.shape_cast %225 : vector<1x64x64xbf16> to vector<64x64xbf16>
      %cst_155 = arith.constant dense<0.000000e+00> : vector<256x64xf32>
      %227 = tpu.matmul %221, %226, %cst_155 {dimension_numbers = #tpu.dot_dimension_numbers<[1], [0], [0], [1], [0, 0, 1, 1], [], []>} : vector<256x64xbf16>, vector<64x64xbf16>, vector<256x64xf32> -> vector<256x64xf32>
      %228 = arith.addf %219, %227 : vector<256x64xf32>
      %229 = vector.extract_strided_slice %152 {offsets = [2, 0, 0], sizes = [16, 16, 64], strides = [1, 1, 1]} : vector<18x16x64xbf16> to vector<16x16x64xbf16>
      %230 = vector.shape_cast %229 : vector<16x16x64xbf16> to vector<256x64xbf16>
      %c9_i32_156 = arith.constant 9 : i32
      %231 = arith.muli %146, %c9_i32_156 : i32
      %c8_i32 = arith.constant 8 : i32
      %232 = arith.addi %231, %c8_i32 : i32
      %233 = arith.index_cast %232 : i32 to index
      %c0_157 = arith.constant 0 : index
      %c0_158 = arith.constant 0 : index
      %234 = vector.load %arg4[%233, %c0_157, %c0_158] : memref<162x64x64xbf16, #tpu.memory_space<vmem>>, vector<1x64x64xbf16>
      %235 = vector.shape_cast %234 : vector<1x64x64xbf16> to vector<64x64xbf16>
      %cst_159 = arith.constant dense<0.000000e+00> : vector<256x64xf32>
      %236 = tpu.matmul %230, %235, %cst_159 {dimension_numbers = #tpu.dot_dimension_numbers<[1], [0], [0], [1], [0, 0, 1, 1], [], []>} : vector<256x64xbf16>, vector<64x64xbf16>, vector<256x64xf32> -> vector<256x64xf32>
      %237 = arith.addf %228, %236 : vector<256x64xf32>
      %238 = vector.broadcast %155 : vector<1x64xf32> to vector<256x64xf32>
      %239 = arith.addf %237, %238 : vector<256x64xf32>
      %cst_160 = arith.constant 0.000000e+00 : f32
      %240 = vector.broadcast %cst_160 : f32 to vector<256x64xf32>
      %241 = arith.maximumf %239, %240 : vector<256x64xf32>
      %242 = vector.shape_cast %241 : vector<256x64xf32> to vector<16x16x64xf32>
      %c1_161 = arith.constant 1 : index
      %c8_162 = arith.constant 8 : index
      %c0_163 = arith.constant 0 : index
      %243 = vector.load %arg10[%c1_161, %c8_162, %c0_163] : memref<18x32x64xf32, #tpu.memory_space<vmem>>, vector<16x16x64xf32>
      tpu.vector_store %arg10[%c1_161, %c8_162, %c0_163], %242 {strides = array<i32>} : memref<18x32x64xf32, #tpu.memory_space<vmem>>, vector<16x16x64xf32>,
      %c1_i32_164 = arith.constant 1 : i32
      %244 = arith.addi %146, %c1_i32_164 : i32
      %c0_165 = arith.constant 0 : index
      %c7_166 = arith.constant 7 : index
      %c0_167 = arith.constant 0 : index
      %245 = vector.load %arg10[%c0_165, %c7_166, %c0_167] : memref<18x32x64xf32, #tpu.memory_space<vmem>>, vector<18x16x64xf32>
      %246 = arith.truncf %245 : vector<18x16x64xf32> to vector<18x16x64xbf16>
      %c0_168 = arith.constant 0 : index
      %c8_169 = arith.constant 8 : index
      %c0_170 = arith.constant 0 : index
      %247 = vector.load %arg10[%c0_168, %c8_169, %c0_170] : memref<18x32x64xf32, #tpu.memory_space<vmem>>, vector<18x16x64xf32>
      %248 = arith.truncf %247 : vector<18x16x64xf32> to vector<18x16x64xbf16>
      %c0_171 = arith.constant 0 : index
      %c9_172 = arith.constant 9 : index
      %c0_173 = arith.constant 0 : index
      %249 = vector.load %arg10[%c0_171, %c9_172, %c0_173] : memref<18x32x64xf32, #tpu.memory_space<vmem>>, vector<18x16x64xf32>
      %250 = arith.truncf %249 : vector<18x16x64xf32> to vector<18x16x64xbf16>
      %251 = arith.index_cast %244 : i32 to index
      %c0_174 = arith.constant 0 : index
      %c0_175 = arith.constant 0 : index
      %252 = vector.load %arg5[%251, %c0_174, %c0_175] : memref<18x1x64xf32, #tpu.memory_space<vmem>>, vector<1x1x64xf32>
      %253 = vector.shape_cast %252 : vector<1x1x64xf32> to vector<1x64xf32>
      %cst_176 = arith.constant 0.000000e+00 : f32
      %254 = vector.broadcast %cst_176 : f32 to vector<256x64xf32>
      %255 = vector.extract_strided_slice %246 {offsets = [0, 0, 0], sizes = [16, 16, 64], strides = [1, 1, 1]} : vector<18x16x64xbf16> to vector<16x16x64xbf16>
      %256 = vector.shape_cast %255 : vector<16x16x64xbf16> to vector<256x64xbf16>
      %c9_i32_177 = arith.constant 9 : i32
      %257 = arith.muli %244, %c9_i32_177 : i32
      %c0_i32_178 = arith.constant 0 : i32
      %258 = arith.addi %257, %c0_i32_178 : i32
      %259 = arith.index_cast %258 : i32 to index
      %c0_179 = arith.constant 0 : index
      %c0_180 = arith.constant 0 : index
      %260 = vector.load %arg4[%259, %c0_179, %c0_180] : memref<162x64x64xbf16, #tpu.memory_space<vmem>>, vector<1x64x64xbf16>
      %261 = vector.shape_cast %260 : vector<1x64x64xbf16> to vector<64x64xbf16>
      %cst_181 = arith.constant dense<0.000000e+00> : vector<256x64xf32>
      %262 = tpu.matmul %256, %261, %cst_181 {dimension_numbers = #tpu.dot_dimension_numbers<[1], [0], [0], [1], [0, 0, 1, 1], [], []>} : vector<256x64xbf16>, vector<64x64xbf16>, vector<256x64xf32> -> vector<256x64xf32>
      %263 = arith.addf %254, %262 : vector<256x64xf32>
      %264 = vector.extract_strided_slice %248 {offsets = [0, 0, 0], sizes = [16, 16, 64], strides = [1, 1, 1]} : vector<18x16x64xbf16> to vector<16x16x64xbf16>
      %265 = vector.shape_cast %264 : vector<16x16x64xbf16> to vector<256x64xbf16>
      %c9_i32_182 = arith.constant 9 : i32
      %266 = arith.muli %244, %c9_i32_182 : i32
      %c1_i32_183 = arith.constant 1 : i32
      %267 = arith.addi %266, %c1_i32_183 : i32
      %268 = arith.index_cast %267 : i32 to index
      %c0_184 = arith.constant 0 : index
      %c0_185 = arith.constant 0 : index
      %269 = vector.load %arg4[%268, %c0_184, %c0_185] : memref<162x64x64xbf16, #tpu.memory_space<vmem>>, vector<1x64x64xbf16>
      %270 = vector.shape_cast %269 : vector<1x64x64xbf16> to vector<64x64xbf16>
      %cst_186 = arith.constant dense<0.000000e+00> : vector<256x64xf32>
      %271 = tpu.matmul %265, %270, %cst_186 {dimension_numbers = #tpu.dot_dimension_numbers<[1], [0], [0], [1], [0, 0, 1, 1], [], []>} : vector<256x64xbf16>, vector<64x64xbf16>, vector<256x64xf32> -> vector<256x64xf32>
      %272 = arith.addf %263, %271 : vector<256x64xf32>
      %273 = vector.extract_strided_slice %250 {offsets = [0, 0, 0], sizes = [16, 16, 64], strides = [1, 1, 1]} : vector<18x16x64xbf16> to vector<16x16x64xbf16>
      %274 = vector.shape_cast %273 : vector<16x16x64xbf16> to vector<256x64xbf16>
      %c9_i32_187 = arith.constant 9 : i32
      %275 = arith.muli %244, %c9_i32_187 : i32
      %c2_i32_188 = arith.constant 2 : i32
      %276 = arith.addi %275, %c2_i32_188 : i32
      %277 = arith.index_cast %276 : i32 to index
      %c0_189 = arith.constant 0 : index
      %c0_190 = arith.constant 0 : index
      %278 = vector.load %arg4[%277, %c0_189, %c0_190] : memref<162x64x64xbf16, #tpu.memory_space<vmem>>, vector<1x64x64xbf16>
      %279 = vector.shape_cast %278 : vector<1x64x64xbf16> to vector<64x64xbf16>
      %cst_191 = arith.constant dense<0.000000e+00> : vector<256x64xf32>
      %280 = tpu.matmul %274, %279, %cst_191 {dimension_numbers = #tpu.dot_dimension_numbers<[1], [0], [0], [1], [0, 0, 1, 1], [], []>} : vector<256x64xbf16>, vector<64x64xbf16>, vector<256x64xf32> -> vector<256x64xf32>
      %281 = arith.addf %272, %280 : vector<256x64xf32>
      %282 = vector.extract_strided_slice %246 {offsets = [1, 0, 0], sizes = [16, 16, 64], strides = [1, 1, 1]} : vector<18x16x64xbf16> to vector<16x16x64xbf16>
      %283 = vector.shape_cast %282 : vector<16x16x64xbf16> to vector<256x64xbf16>
      %c9_i32_192 = arith.constant 9 : i32
      %284 = arith.muli %244, %c9_i32_192 : i32
      %c3_i32_193 = arith.constant 3 : i32
      %285 = arith.addi %284, %c3_i32_193 : i32
      %286 = arith.index_cast %285 : i32 to index
      %c0_194 = arith.constant 0 : index
      %c0_195 = arith.constant 0 : index
      %287 = vector.load %arg4[%286, %c0_194, %c0_195] : memref<162x64x64xbf16, #tpu.memory_space<vmem>>, vector<1x64x64xbf16>
      %288 = vector.shape_cast %287 : vector<1x64x64xbf16> to vector<64x64xbf16>
      %cst_196 = arith.constant dense<0.000000e+00> : vector<256x64xf32>
      %289 = tpu.matmul %283, %288, %cst_196 {dimension_numbers = #tpu.dot_dimension_numbers<[1], [0], [0], [1], [0, 0, 1, 1], [], []>} : vector<256x64xbf16>, vector<64x64xbf16>, vector<256x64xf32> -> vector<256x64xf32>
      %290 = arith.addf %281, %289 : vector<256x64xf32>
      %291 = vector.extract_strided_slice %248 {offsets = [1, 0, 0], sizes = [16, 16, 64], strides = [1, 1, 1]} : vector<18x16x64xbf16> to vector<16x16x64xbf16>
      %292 = vector.shape_cast %291 : vector<16x16x64xbf16> to vector<256x64xbf16>
      %c9_i32_197 = arith.constant 9 : i32
      %293 = arith.muli %244, %c9_i32_197 : i32
      %c4_i32_198 = arith.constant 4 : i32
      %294 = arith.addi %293, %c4_i32_198 : i32
      %295 = arith.index_cast %294 : i32 to index
      %c0_199 = arith.constant 0 : index
      %c0_200 = arith.constant 0 : index
      %296 = vector.load %arg4[%295, %c0_199, %c0_200] : memref<162x64x64xbf16, #tpu.memory_space<vmem>>, vector<1x64x64xbf16>
      %297 = vector.shape_cast %296 : vector<1x64x64xbf16> to vector<64x64xbf16>
      %cst_201 = arith.constant dense<0.000000e+00> : vector<256x64xf32>
      %298 = tpu.matmul %292, %297, %cst_201 {dimension_numbers = #tpu.dot_dimension_numbers<[1], [0], [0], [1], [0, 0, 1, 1], [], []>} : vector<256x64xbf16>, vector<64x64xbf16>, vector<256x64xf32> -> vector<256x64xf32>
      %299 = arith.addf %290, %298 : vector<256x64xf32>
      %300 = vector.extract_strided_slice %250 {offsets = [1, 0, 0], sizes = [16, 16, 64], strides = [1, 1, 1]} : vector<18x16x64xbf16> to vector<16x16x64xbf16>
      %301 = vector.shape_cast %300 : vector<16x16x64xbf16> to vector<256x64xbf16>
      %c9_i32_202 = arith.constant 9 : i32
      %302 = arith.muli %244, %c9_i32_202 : i32
      %c5_i32_203 = arith.constant 5 : i32
      %303 = arith.addi %302, %c5_i32_203 : i32
      %304 = arith.index_cast %303 : i32 to index
      %c0_204 = arith.constant 0 : index
      %c0_205 = arith.constant 0 : index
      %305 = vector.load %arg4[%304, %c0_204, %c0_205] : memref<162x64x64xbf16, #tpu.memory_space<vmem>>, vector<1x64x64xbf16>
      %306 = vector.shape_cast %305 : vector<1x64x64xbf16> to vector<64x64xbf16>
      %cst_206 = arith.constant dense<0.000000e+00> : vector<256x64xf32>
      %307 = tpu.matmul %301, %306, %cst_206 {dimension_numbers = #tpu.dot_dimension_numbers<[1], [0], [0], [1], [0, 0, 1, 1], [], []>} : vector<256x64xbf16>, vector<64x64xbf16>, vector<256x64xf32> -> vector<256x64xf32>
      %308 = arith.addf %299, %307 : vector<256x64xf32>
      %309 = vector.extract_strided_slice %246 {offsets = [2, 0, 0], sizes = [16, 16, 64], strides = [1, 1, 1]} : vector<18x16x64xbf16> to vector<16x16x64xbf16>
      %310 = vector.shape_cast %309 : vector<16x16x64xbf16> to vector<256x64xbf16>
      %c9_i32_207 = arith.constant 9 : i32
      %311 = arith.muli %244, %c9_i32_207 : i32
      %c6_i32_208 = arith.constant 6 : i32
      %312 = arith.addi %311, %c6_i32_208 : i32
      %313 = arith.index_cast %312 : i32 to index
      %c0_209 = arith.constant 0 : index
      %c0_210 = arith.constant 0 : index
      %314 = vector.load %arg4[%313, %c0_209, %c0_210] : memref<162x64x64xbf16, #tpu.memory_space<vmem>>, vector<1x64x64xbf16>
      %315 = vector.shape_cast %314 : vector<1x64x64xbf16> to vector<64x64xbf16>
      %cst_211 = arith.constant dense<0.000000e+00> : vector<256x64xf32>
      %316 = tpu.matmul %310, %315, %cst_211 {dimension_numbers = #tpu.dot_dimension_numbers<[1], [0], [0], [1], [0, 0, 1, 1], [], []>} : vector<256x64xbf16>, vector<64x64xbf16>, vector<256x64xf32> -> vector<256x64xf32>
      %317 = arith.addf %308, %316 : vector<256x64xf32>
      %318 = vector.extract_strided_slice %248 {offsets = [2, 0, 0], sizes = [16, 16, 64], strides = [1, 1, 1]} : vector<18x16x64xbf16> to vector<16x16x64xbf16>
      %319 = vector.shape_cast %318 : vector<16x16x64xbf16> to vector<256x64xbf16>
      %c9_i32_212 = arith.constant 9 : i32
      %320 = arith.muli %244, %c9_i32_212 : i32
      %c7_i32_213 = arith.constant 7 : i32
      %321 = arith.addi %320, %c7_i32_213 : i32
      %322 = arith.index_cast %321 : i32 to index
      %c0_214 = arith.constant 0 : index
      %c0_215 = arith.constant 0 : index
      %323 = vector.load %arg4[%322, %c0_214, %c0_215] : memref<162x64x64xbf16, #tpu.memory_space<vmem>>, vector<1x64x64xbf16>
      %324 = vector.shape_cast %323 : vector<1x64x64xbf16> to vector<64x64xbf16>
      %cst_216 = arith.constant dense<0.000000e+00> : vector<256x64xf32>
      %325 = tpu.matmul %319, %324, %cst_216 {dimension_numbers = #tpu.dot_dimension_numbers<[1], [0], [0], [1], [0, 0, 1, 1], [], []>} : vector<256x64xbf16>, vector<64x64xbf16>, vector<256x64xf32> -> vector<256x64xf32>
      %326 = arith.addf %317, %325 : vector<256x64xf32>
      %327 = vector.extract_strided_slice %250 {offsets = [2, 0, 0], sizes = [16, 16, 64], strides = [1, 1, 1]} : vector<18x16x64xbf16> to vector<16x16x64xbf16>
      %328 = vector.shape_cast %327 : vector<16x16x64xbf16> to vector<256x64xbf16>
      %c9_i32_217 = arith.constant 9 : i32
      %329 = arith.muli %244, %c9_i32_217 : i32
      %c8_i32_218 = arith.constant 8 : i32
      %330 = arith.addi %329, %c8_i32_218 : i32
      %331 = arith.index_cast %330 : i32 to index
      %c0_219 = arith.constant 0 : index
      %c0_220 = arith.constant 0 : index
      %332 = vector.load %arg4[%331, %c0_219, %c0_220] : memref<162x64x64xbf16, #tpu.memory_space<vmem>>, vector<1x64x64xbf16>
      %333 = vector.shape_cast %332 : vector<1x64x64xbf16> to vector<64x64xbf16>
      %cst_221 = arith.constant dense<0.000000e+00> : vector<256x64xf32>
      %334 = tpu.matmul %328, %333, %cst_221 {dimension_numbers = #tpu.dot_dimension_numbers<[1], [0], [0], [1], [0, 0, 1, 1], [], []>} : vector<256x64xbf16>, vector<64x64xbf16>, vector<256x64xf32> -> vector<256x64xf32>
      %335 = arith.addf %326, %334 : vector<256x64xf32>
      %336 = vector.broadcast %253 : vector<1x64xf32> to vector<256x64xf32>
      %337 = arith.addf %335, %336 : vector<256x64xf32>
      %cst_222 = arith.constant 0.000000e+00 : f32
      %338 = vector.broadcast %cst_222 : f32 to vector<256x64xf32>
      %339 = arith.maximumf %337, %338 : vector<256x64xf32>
      %340 = vector.shape_cast %339 : vector<256x64xf32> to vector<16x16x64xf32>
      %c1_223 = arith.constant 1 : index
      %c8_224 = arith.constant 8 : index
      %c0_225 = arith.constant 0 : index
      %341 = vector.load %arg9[%c1_223, %c8_224, %c0_225] : memref<18x32x64xf32, #tpu.memory_space<vmem>>, vector<16x16x64xf32>
      tpu.vector_store %arg9[%c1_223, %c8_224, %c0_225], %340 {strides = array<i32>} : memref<18x32x64xf32, #tpu.memory_space<vmem>>, vector<16x16x64xf32>,
    }
    %c9_i32_52 = arith.constant 9 : i32
    %c0_53 = arith.constant 0 : index
    %c7_54 = arith.constant 7 : index
    %c0_55 = arith.constant 0 : index
    %76 = vector.load %arg9[%c0_53, %c7_54, %c0_55] : memref<18x32x64xf32, #tpu.memory_space<vmem>>, vector<18x16x64xf32>
    %77 = arith.truncf %76 : vector<18x16x64xf32> to vector<18x16x64xbf16>
    %c0_56 = arith.constant 0 : index
    %c8_57 = arith.constant 8 : index
    %c0_58 = arith.constant 0 : index
    %78 = vector.load %arg9[%c0_56, %c8_57, %c0_58] : memref<18x32x64xf32, #tpu.memory_space<vmem>>, vector<18x16x64xf32>
    %79 = arith.truncf %78 : vector<18x16x64xf32> to vector<18x16x64xbf16>
    %c0_59 = arith.constant 0 : index
    %c9_60 = arith.constant 9 : index
    %c0_61 = arith.constant 0 : index
    %80 = vector.load %arg9[%c0_59, %c9_60, %c0_61] : memref<18x32x64xf32, #tpu.memory_space<vmem>>, vector<18x16x64xf32>
    %81 = arith.truncf %80 : vector<18x16x64xf32> to vector<18x16x64xbf16>
    %c0_62 = arith.constant 0 : index
    %c0_63 = arith.constant 0 : index
    %82 = vector.load %arg7[%c0_62, %c0_63] : memref<1x3xf32, #tpu.memory_space<vmem>>, vector<1x3xf32>
    %cst_64 = arith.constant 0.000000e+00 : f32
    %83 = vector.broadcast %cst_64 : f32 to vector<256x3xf32>
    %84 = vector.extract_strided_slice %77 {offsets = [0, 0, 0], sizes = [16, 16, 64], strides = [1, 1, 1]} : vector<18x16x64xbf16> to vector<16x16x64xbf16>
    %85 = vector.shape_cast %84 : vector<16x16x64xbf16> to vector<256x64xbf16>
    %c0_65 = arith.constant 0 : index
    %c0_66 = arith.constant 0 : index
    %c0_67 = arith.constant 0 : index
    %86 = vector.load %arg6[%c0_65, %c0_66, %c0_67] : memref<9x64x3xbf16, #tpu.memory_space<vmem>>, vector<1x64x3xbf16>
    %87 = vector.shape_cast %86 : vector<1x64x3xbf16> to vector<64x3xbf16>
    %cst_68 = arith.constant dense<0.000000e+00> : vector<256x3xf32>
    %88 = tpu.matmul %85, %87, %cst_68 {dimension_numbers = #tpu.dot_dimension_numbers<[1], [0], [0], [1], [0, 0, 1, 1], [], []>} : vector<256x64xbf16>, vector<64x3xbf16>, vector<256x3xf32> -> vector<256x3xf32>
    %89 = arith.addf %83, %88 : vector<256x3xf32>
    %90 = vector.extract_strided_slice %79 {offsets = [0, 0, 0], sizes = [16, 16, 64], strides = [1, 1, 1]} : vector<18x16x64xbf16> to vector<16x16x64xbf16>
    %91 = vector.shape_cast %90 : vector<16x16x64xbf16> to vector<256x64xbf16>
    %c1_69 = arith.constant 1 : index
    %c0_70 = arith.constant 0 : index
    %c0_71 = arith.constant 0 : index
    %92 = vector.load %arg6[%c1_69, %c0_70, %c0_71] : memref<9x64x3xbf16, #tpu.memory_space<vmem>>, vector<1x64x3xbf16>
    %93 = vector.shape_cast %92 : vector<1x64x3xbf16> to vector<64x3xbf16>
    %cst_72 = arith.constant dense<0.000000e+00> : vector<256x3xf32>
    %94 = tpu.matmul %91, %93, %cst_72 {dimension_numbers = #tpu.dot_dimension_numbers<[1], [0], [0], [1], [0, 0, 1, 1], [], []>} : vector<256x64xbf16>, vector<64x3xbf16>, vector<256x3xf32> -> vector<256x3xf32>
    %95 = arith.addf %89, %94 : vector<256x3xf32>
    %96 = vector.extract_strided_slice %81 {offsets = [0, 0, 0], sizes = [16, 16, 64], strides = [1, 1, 1]} : vector<18x16x64xbf16> to vector<16x16x64xbf16>
    %97 = vector.shape_cast %96 : vector<16x16x64xbf16> to vector<256x64xbf16>
    %c2_73 = arith.constant 2 : index
    %c0_74 = arith.constant 0 : index
    %c0_75 = arith.constant 0 : index
    %98 = vector.load %arg6[%c2_73, %c0_74, %c0_75] : memref<9x64x3xbf16, #tpu.memory_space<vmem>>, vector<1x64x3xbf16>
    %99 = vector.shape_cast %98 : vector<1x64x3xbf16> to vector<64x3xbf16>
    %cst_76 = arith.constant dense<0.000000e+00> : vector<256x3xf32>
    %100 = tpu.matmul %97, %99, %cst_76 {dimension_numbers = #tpu.dot_dimension_numbers<[1], [0], [0], [1], [0, 0, 1, 1], [], []>} : vector<256x64xbf16>, vector<64x3xbf16>, vector<256x3xf32> -> vector<256x3xf32>
    %101 = arith.addf %95, %100 : vector<256x3xf32>
    %102 = vector.extract_strided_slice %77 {offsets = [1, 0, 0], sizes = [16, 16, 64], strides = [1, 1, 1]} : vector<18x16x64xbf16> to vector<16x16x64xbf16>
    %103 = vector.shape_cast %102 : vector<16x16x64xbf16> to vector<256x64xbf16>
    %c3_77 = arith.constant 3 : index
    %c0_78 = arith.constant 0 : index
    %c0_79 = arith.constant 0 : index
    %104 = vector.load %arg6[%c3_77, %c0_78, %c0_79] : memref<9x64x3xbf16, #tpu.memory_space<vmem>>, vector<1x64x3xbf16>
    %105 = vector.shape_cast %104 : vector<1x64x3xbf16> to vector<64x3xbf16>
    %cst_80 = arith.constant dense<0.000000e+00> : vector<256x3xf32>
    %106 = tpu.matmul %103, %105, %cst_80 {dimension_numbers = #tpu.dot_dimension_numbers<[1], [0], [0], [1], [0, 0, 1, 1], [], []>} : vector<256x64xbf16>, vector<64x3xbf16>, vector<256x3xf32> -> vector<256x3xf32>
    %107 = arith.addf %101, %106 : vector<256x3xf32>
    %108 = vector.extract_strided_slice %79 {offsets = [1, 0, 0], sizes = [16, 16, 64], strides = [1, 1, 1]} : vector<18x16x64xbf16> to vector<16x16x64xbf16>
    %109 = vector.shape_cast %108 : vector<16x16x64xbf16> to vector<256x64xbf16>
    %c4_81 = arith.constant 4 : index
    %c0_82 = arith.constant 0 : index
    %c0_83 = arith.constant 0 : index
    %110 = vector.load %arg6[%c4_81, %c0_82, %c0_83] : memref<9x64x3xbf16, #tpu.memory_space<vmem>>, vector<1x64x3xbf16>
    %111 = vector.shape_cast %110 : vector<1x64x3xbf16> to vector<64x3xbf16>
    %cst_84 = arith.constant dense<0.000000e+00> : vector<256x3xf32>
    %112 = tpu.matmul %109, %111, %cst_84 {dimension_numbers = #tpu.dot_dimension_numbers<[1], [0], [0], [1], [0, 0, 1, 1], [], []>} : vector<256x64xbf16>, vector<64x3xbf16>, vector<256x3xf32> -> vector<256x3xf32>
    %113 = arith.addf %107, %112 : vector<256x3xf32>
    %114 = vector.extract_strided_slice %81 {offsets = [1, 0, 0], sizes = [16, 16, 64], strides = [1, 1, 1]} : vector<18x16x64xbf16> to vector<16x16x64xbf16>
    %115 = vector.shape_cast %114 : vector<16x16x64xbf16> to vector<256x64xbf16>
    %c5_85 = arith.constant 5 : index
    %c0_86 = arith.constant 0 : index
    %c0_87 = arith.constant 0 : index
    %116 = vector.load %arg6[%c5_85, %c0_86, %c0_87] : memref<9x64x3xbf16, #tpu.memory_space<vmem>>, vector<1x64x3xbf16>
    %117 = vector.shape_cast %116 : vector<1x64x3xbf16> to vector<64x3xbf16>
    %cst_88 = arith.constant dense<0.000000e+00> : vector<256x3xf32>
    %118 = tpu.matmul %115, %117, %cst_88 {dimension_numbers = #tpu.dot_dimension_numbers<[1], [0], [0], [1], [0, 0, 1, 1], [], []>} : vector<256x64xbf16>, vector<64x3xbf16>, vector<256x3xf32> -> vector<256x3xf32>
    %119 = arith.addf %113, %118 : vector<256x3xf32>
    %120 = vector.extract_strided_slice %77 {offsets = [2, 0, 0], sizes = [16, 16, 64], strides = [1, 1, 1]} : vector<18x16x64xbf16> to vector<16x16x64xbf16>
    %121 = vector.shape_cast %120 : vector<16x16x64xbf16> to vector<256x64xbf16>
    %c6_89 = arith.constant 6 : index
    %c0_90 = arith.constant 0 : index
    %c0_91 = arith.constant 0 : index
    %122 = vector.load %arg6[%c6_89, %c0_90, %c0_91] : memref<9x64x3xbf16, #tpu.memory_space<vmem>>, vector<1x64x3xbf16>
    %123 = vector.shape_cast %122 : vector<1x64x3xbf16> to vector<64x3xbf16>
    %cst_92 = arith.constant dense<0.000000e+00> : vector<256x3xf32>
    %124 = tpu.matmul %121, %123, %cst_92 {dimension_numbers = #tpu.dot_dimension_numbers<[1], [0], [0], [1], [0, 0, 1, 1], [], []>} : vector<256x64xbf16>, vector<64x3xbf16>, vector<256x3xf32> -> vector<256x3xf32>
    %125 = arith.addf %119, %124 : vector<256x3xf32>
    %126 = vector.extract_strided_slice %79 {offsets = [2, 0, 0], sizes = [16, 16, 64], strides = [1, 1, 1]} : vector<18x16x64xbf16> to vector<16x16x64xbf16>
    %127 = vector.shape_cast %126 : vector<16x16x64xbf16> to vector<256x64xbf16>
    %c7_93 = arith.constant 7 : index
    %c0_94 = arith.constant 0 : index
    %c0_95 = arith.constant 0 : index
    %128 = vector.load %arg6[%c7_93, %c0_94, %c0_95] : memref<9x64x3xbf16, #tpu.memory_space<vmem>>, vector<1x64x3xbf16>
    %129 = vector.shape_cast %128 : vector<1x64x3xbf16> to vector<64x3xbf16>
    %cst_96 = arith.constant dense<0.000000e+00> : vector<256x3xf32>
    %130 = tpu.matmul %127, %129, %cst_96 {dimension_numbers = #tpu.dot_dimension_numbers<[1], [0], [0], [1], [0, 0, 1, 1], [], []>} : vector<256x64xbf16>, vector<64x3xbf16>, vector<256x3xf32> -> vector<256x3xf32>
    %131 = arith.addf %125, %130 : vector<256x3xf32>
    %132 = vector.extract_strided_slice %81 {offsets = [2, 0, 0], sizes = [16, 16, 64], strides = [1, 1, 1]} : vector<18x16x64xbf16> to vector<16x16x64xbf16>
    %133 = vector.shape_cast %132 : vector<16x16x64xbf16> to vector<256x64xbf16>
    %c8_97 = arith.constant 8 : index
    %c0_98 = arith.constant 0 : index
    %c0_99 = arith.constant 0 : index
    %134 = vector.load %arg6[%c8_97, %c0_98, %c0_99] : memref<9x64x3xbf16, #tpu.memory_space<vmem>>, vector<1x64x3xbf16>
    %135 = vector.shape_cast %134 : vector<1x64x3xbf16> to vector<64x3xbf16>
    %cst_100 = arith.constant dense<0.000000e+00> : vector<256x3xf32>
    %136 = tpu.matmul %133, %135, %cst_100 {dimension_numbers = #tpu.dot_dimension_numbers<[1], [0], [0], [1], [0, 0, 1, 1], [], []>} : vector<256x64xbf16>, vector<64x3xbf16>, vector<256x3xf32> -> vector<256x3xf32>
    %137 = arith.addf %131, %136 : vector<256x3xf32>
    %138 = vector.broadcast %82 : vector<1x3xf32> to vector<256x3xf32>
    %139 = arith.addf %137, %138 : vector<256x3xf32>
    %c0_101 = arith.constant 0 : index
    %c1_102 = arith.constant 1 : index
    %c8_103 = arith.constant 8 : index
    %c0_104 = arith.constant 0 : index
    %140 = vector.load %arg1[%c0_101, %c1_102, %c8_103, %c0_104] : memref<1x18x32x3xf32, #tpu.memory_space<vmem>>, vector<1x16x16x3xf32>
    %141 = vector.shape_cast %140 : vector<1x16x16x3xf32> to vector<16x16x3xf32>
    %142 = vector.shape_cast %141 : vector<16x16x3xf32> to vector<256x3xf32>
    %143 = arith.addf %139, %142 : vector<256x3xf32>
    %144 = vector.shape_cast %143 : vector<256x3xf32> to vector<1x16x16x3xf32>
    %c0_105 = arith.constant 0 : index
    %c0_106 = arith.constant 0 : index
    %c0_107 = arith.constant 0 : index
    %c0_108 = arith.constant 0 : index
    %145 = vector.load %arg8[%c0_105, %c0_106, %c0_107, %c0_108] : memref<1x16x16x3xf32, #tpu.memory_space<vmem>>, vector<1x16x16x3xf32>
    tpu.vector_store %arg8[%c0_105, %c0_106, %c0_107, %c0_108], %144 {strides = array<i32>} : memref<1x16x16x3xf32, #tpu.memory_space<vmem>>, vector<1x16x16x3xf32>,
    return
  }
  func.func @transform_0(%arg0: i32) -> (i32, i32, i32, i32) {
    %c0_i32 = arith.constant 0 : i32
    %c0_i32_0 = arith.constant 0 : i32
    %c0_i32_1 = arith.constant 0 : i32
    %c0_i32_2 = arith.constant 0 : i32
    return %arg0, %c0_i32, %c0_i32_0, %c0_i32_1 : i32, i32, i32, i32
  }
  func.func @transform_1(%arg0: i32) -> (i32, i32, i32) {
    %c0_i32 = arith.constant 0 : i32
    %c0_i32_0 = arith.constant 0 : i32
    %c0_i32_1 = arith.constant 0 : i32
    %c0_i32_2 = arith.constant 0 : i32
    return %c0_i32, %c0_i32_0, %c0_i32_1 : i32, i32, i32
  }
  func.func @transform_2(%arg0: i32) -> (i32, i32) {
    %c0_i32 = arith.constant 0 : i32
    %c0_i32_0 = arith.constant 0 : i32
    %c0_i32_1 = arith.constant 0 : i32
    return %c0_i32, %c0_i32_0 : i32, i32
  }
  func.func @transform_3(%arg0: i32) -> (i32, i32, i32) {
    %c0_i32 = arith.constant 0 : i32
    %c0_i32_0 = arith.constant 0 : i32
    %c0_i32_1 = arith.constant 0 : i32
    %c0_i32_2 = arith.constant 0 : i32
    return %c0_i32, %c0_i32_0, %c0_i32_1 : i32, i32, i32
  }
  func.func @transform_4(%arg0: i32) -> (i32, i32, i32) {
    %c0_i32 = arith.constant 0 : i32
    %c0_i32_0 = arith.constant 0 : i32
    %c0_i32_1 = arith.constant 0 : i32
    %c0_i32_2 = arith.constant 0 : i32
    return %c0_i32, %c0_i32_0, %c0_i32_1 : i32, i32, i32
  }
  func.func @transform_5(%arg0: i32) -> (i32, i32, i32) {
    %c0_i32 = arith.constant 0 : i32
    %c0_i32_0 = arith.constant 0 : i32
    %c0_i32_1 = arith.constant 0 : i32
    %c0_i32_2 = arith.constant 0 : i32
    return %c0_i32, %c0_i32_0, %c0_i32_1 : i32, i32, i32
  }
  func.func @transform_6(%arg0: i32) -> (i32, i32) {
    %c0_i32 = arith.constant 0 : i32
    %c0_i32_0 = arith.constant 0 : i32
    %c0_i32_1 = arith.constant 0 : i32
    return %c0_i32, %c0_i32_0 : i32, i32
  }
  func.func @transform_7(%arg0: i32) -> (i32, i32, i32, i32) {
    %c0_i32 = arith.constant 0 : i32
    %c0_i32_0 = arith.constant 0 : i32
    %c0_i32_1 = arith.constant 0 : i32
    %c0_i32_2 = arith.constant 0 : i32
    return %arg0, %c0_i32, %c0_i32_0, %c0_i32_1 : i32, i32, i32, i32
  }
}

</mosaic_0001>

<bundles_post_ra>
// kernel: vdsr_forward.1
= control target key start
LH: loop header
LB: loop body
LE: loop exit
PB: predicated region body
PF: predicated region fallthrough
CT: control target
= control target key end

     0   :  { %s14283_s24 = smov 0   ;;  %s16862_s0 = inlined_call_operand.vmem [shape: f32[2,18,32,3], index: 0, kind: input, shape index: {}]   ;;  %s16863_s1 = inlined_call_operand.vmem [shape: bf16[9,3,64], index: 1, kind: input, shape index: {}]   ;;  %s16864_s2 = inlined_call_operand.vmem [shape: f32[1,64], index: 2, kind: input, shape index: {}]   ;;  %s16865_s3 = inlined_call_operand.vmem [shape: bf16[162,64,64], index: 3, kind: input, shape index: {}]   ;;  %s16866_s4 = inlined_call_operand.vmem [shape: f32[18,1,64], index: 4, kind: input, shape index: {}]   ;;  %s16867_s5 = inlined_call_operand.vmem [shape: bf16[9,64,3], index: 5, kind: input, shape index: {}]   ;;  %s16868_s6 = inlined_call_operand.vmem [shape: f32[1,3], index: 6, kind: input, shape index: {}]   ;;  %s16869_s7 = inlined_call_operand.vmem [shape: f32[2,16,16,3], index: 7, kind: output, shape index: {}]  }
   0x1 LB: > { %s10006_s25 = sadd.s32 4294967295, %s14235_s24   ;;  %p10010_p0 = scmp.ge.s32.totalorder %s14235_s24, 1  ;;  %s14235_s24 = sphi %s14283_s24, %s17_s24  }
   0x2   : > { %p237_p1 = scmp.lt.s32.totalorder %s14235_s24, 3 }
   0x4   : > { %p238_p2 = pnand %p10010_p0, %p237_p1 }
   0x5   : > { %v10014_v0 = vld [vmem:[%s16863_s1 + $0x2] sm:$0x3] (!%p238_p2)  ;;  %vm640_vm0 = vcmask (!%p238_p2), 1040384   ;;  %vm641_vm1 = vcmask (!%p238_p2), 1041408   ;;  %p269_p3 = scmp.lt.s32.totalorder (!%p238_p2), %s10006_s25, 1  ;;  %v14241_v1 = vmov (!%p238_p2), 65535  }
   0x6   : > { %241 = sbr.rel (%p238_p2) target bundleno = 2587 (0xa1b), region = 48  ;;  %v642_v2 = vsel (!%p238_p2), %vm640_vm0, 4294967295, %v14241_v1  ;;  %v10081_v3 = vld [vmem:[%s16863_s1 + $0x8] sm:$0x3] (!%p238_p2)  ;;  %v588_v4 = vld [vmem:[%s16863_s1] sm:$0x3] (!%p238_p2) }
   0x7   : > { %v14300_v5 = vsel (!%p238_p2), %vm641_vm1, %v642_v2, 0  ;;  %v10098_v6 = vld [vmem:[%s16863_s1 + $0xa] sm:$0x3] (!%p238_p2)  ;;  %v10115_v11 = vld [vmem:[%s16863_s1 + $0xc] sm:$0x3] (!%p238_p2)  ;;  %vm591_vm2 = vcmask (!%p238_p2), 23552  }
   0x8   : > { %v645_v7 = vand.u32 (!%p238_p2), %v10014_v0, %v14300_v5  ;;  %v14307_v8 = vand.u32 (!%p238_p2), %v10081_v3, %v14300_v5  ;;  %v857_v9 = vand.u32 (!%p238_p2), %v14300_v5, %v588_v4  ;;  %v1674_v10 = vand.u32 (!%p238_p2), %v10098_v6, %v14300_v5  ;;  %v10047_v12 = vld [vmem:[%s16863_s1 + $0x4] sm:$0x3] (!%p238_p2)  ;;  %v10132_v54 = vld [vmem:[%s16863_s1 + $0xe] sm:$0x3] (!%p238_p2)  ;;  %s15208_s9 = smov (!%p238_p2), 0  }
   0x9   : > { %v1875_v25 = vand.u32 (!%p238_p2), %v10115_v11, %v14300_v5  ;;  %v14346_v26 = vand.u32 (!%p238_p2), %v10047_v12, %v14300_v5  ;;  %v14423_v58 = vand.u32 (!%p238_p2), %v10132_v54, %v14300_v5  ;;  %vm280_vm3 = vcmask (!%p238_p2), 523264  }
   0xa   : > { %11678 = vmatprep.subr.bf16.mxu1 (!%p238_p2), %v645_v7  ;;  %11814 = vmatprep.subr.bf16.mxu0 (!%p238_p2), %v14307_v8 }
   0xb   : > { %11679 = vmatpush3.bf16.msra.mxu1 (!%p238_p2), %v645_v7  ;;  %11815 = vmatpush3.bf16.msra.mxu0 (!%p238_p2), %v14307_v8 }
   0xc   : > { %11712 = vmatprep.subr.bf16.mxu1 (!%p238_p2), %v857_v9  ;;  %11848 = vmatprep.subr.bf16.mxu0 (!%p238_p2), %v1674_v10 }
   0xd   : > { %s16871_s25 = smov (!%p269_p3, %s10006_s25), 1 }
   0xe   : > { %s14098_s11 = smul.u32 576, %s16871_s25  ;;  %s10983_s12 = sshll.u32 %s16871_s25, 8 }
   0xf   : > { %s14315_s15 = scalar_lea.vmem %s16869_s7, %s10983_s12 }
  0x10   : > { %s14321_s18 = scalar_lea.vmem %s16862_s0, %s14098_s11 }
  0x11   : > { %v479_v13 = vld [vmem:[%s14321_s18 + $0x8] sm:$0xff]  ;;  %v480_v14 = vld [vmem:[%s14321_s18 + $0x10] sm:$0xff] }
  0x12   : > { %v481_v15 = vld [vmem:[%s14321_s18 + $0x28] sm:$0xff]  ;;  %v515_v16 = vpack.c.bf16 %v480_v14, %v479_v13  ;;  %v482_v17 = vld [vmem:[%s14321_s18 + $0x30] sm:$0xff] }
  0x13   : > { %v483_v18 = vld [vmem:[%s14321_s18 + $0x48] sm:$0xff]  ;;  %v484_v19 = vld [vmem:[%s14321_s18 + $0x50] sm:$0xff]  ;;  %v516_v20 = vpack.c.bf16 %v482_v17, %v481_v15 }
  0x14   : > { %v14335_v21 = vpack.c.bf16 %v484_v19, %v483_v18  ;;  %v485_v22 = vld [vmem:[%s14321_s18 + $0x68] sm:$0xff]  ;;  %v486_v23 = vld [vmem:[%s14321_s18 + $0x70] sm:$0xff]  ;;  %11680 = vmatprep.mubr.msk.bf16.mxu1 %vm591_vm2, %v515_v16 }
  0x15   : > { %v14340_v24 = vpack.c.bf16 %v486_v23, %v485_v22  ;;  %11816 = vmatprep.mubr.msk.bf16.mxu0 %vm591_vm2, %v516_v20  ;;  %11681 = vmatmul.mubr.msk.bf16.vlgmr.msra.gmra.mrb[0].mxu1 %vm591_vm2, %v516_v20  ;;  %v487_v27 = vld [vmem:[%s14321_s18 + $0x88] sm:$0xff]  ;;  %v488_v28 = vld [vmem:[%s14321_s18 + $0x90] sm:$0xff] }
  0x16   : > { %11713 = vmatpush3.bf16.msra.mxu1 %v857_v9  ;;  %11817 = vmatmul.mubr.msk.bf16.vlgmr.msra.gmra.mrb[0].mxu0 %vm591_vm2, %v14335_v21  ;;  %v489_v29 = vld [vmem:[%s14321_s18 + $0xa8] sm:$0xff]  ;;  %v490_v30 = vld [vmem:[%s14321_s18 + $0xb0] sm:$0xff]  ;;  %v14359_v31 = vpack.c.bf16 %v488_v28, %v487_v27 }
  0x17   : > { %11849 = vmatpush3.bf16.msra.mxu0 %v1674_v10  ;;  %11684 = vmatprep.mubr.msk.bf16.mxu1 %vm591_vm2, %v14335_v21  ;;  %v14361_v32 = vpack.c.bf16 %v490_v30, %v489_v29  ;;  %v491_v33 = vld [vmem:[%s14321_s18 + $0xc8] sm:$0xff]  ;;  %v492_v34 = vld [vmem:[%s14321_s18 + $0xd0] sm:$0xff] }
  0x18   : > { %11820 = vmatprep.mubr.msk.bf16.mxu0 %vm591_vm2, %v14340_v24  ;;  %11882 = vmatprep.subr.bf16.mxu0 %v1875_v25  ;;  %v493_v35 = vld [vmem:[%s14321_s18 + $0xe8] sm:$0xff]  ;;  %v494_v36 = vld [vmem:[%s14321_s18 + $0xf0] sm:$0xff]  ;;  %v14375_v37 = vpack.c.bf16 %v492_v34, %v491_v33 }
  0x19   : > { %11746 = vmatprep.subr.bf16.mxu1 %v14346_v26  ;;  %v14377_v38 = vpack.c.bf16 %v494_v36, %v493_v35  ;;  %v495_v39 = vld [vmem:[%s14321_s18 + $0x108] sm:$0xff]  ;;  %v496_v40 = vld [vmem:[%s14321_s18 + $0x110] sm:$0xff] }
  0x1a   : > { %v535_v41 = vld [vmem:[%s14321_s18 + $0x29] sm:$0xff]  ;;  %v536_v42 = vld [vmem:[%s14321_s18 + $0x31] sm:$0xff]  ;;  %v14391_v43 = vpack.c.bf16 %v496_v40, %v495_v39 }
  0x1b   : > { %v14393_v44 = vpack.c.bf16 %v536_v42, %v535_v41  ;;  %v497_v45 = vld [vmem:[%s14321_s18 + $0x128] sm:$0xff]  ;;  %v498_v46 = vld [vmem:[%s14321_s18 + $0x130] sm:$0xff] }
  0x1c   : > { %v537_v47 = vld [vmem:[%s14321_s18 + $0x49] sm:$0xff]  ;;  %v538_v48 = vld [vmem:[%s14321_s18 + $0x51] sm:$0xff]  ;;  %v14411_v53 = vpack.c.bf16 %v498_v46, %v497_v45 }
  0x1d   : > { %11685 = vmatmul.mubr.msk.bf16.gmra.mrb[4].mxu1 %vm591_vm2, %v14340_v24  ;;  %v499_v49 = vld [vmem:[%s14321_s18 + $0x148] sm:$0xff]  ;;  %v500_v50 = vld [vmem:[%s14321_s18 + $0x150] sm:$0xff]  ;;  %v14416_v55 = vpack.c.bf16 %v538_v48, %v537_v47 }
  0x1e   : > { %11821 = vmatmul.mubr.msk.bf16.gmra.mrb[4].mxu0 %vm591_vm2, %v14359_v31  ;;  %11688 = vmatprep.mubr.msk.bf16.mxu1 %vm591_vm2, %v14359_v31  ;;  %v539_v51 = vld [vmem:[%s14321_s18 + $0x69] sm:$0xff]  ;;  %v540_v52 = vld [vmem:[%s14321_s18 + $0x71] sm:$0xff]  ;;  %v14418_v56 = vpack.c.bf16 %v500_v50, %v499_v49 }
  0x1f   : > { %11824 = vmatprep.mubr.msk.bf16.mxu0 %vm591_vm2, %v14361_v32  ;;  %v14420_v57 = vpack.c.bf16 %v540_v52, %v539_v51  ;;  %v501_v59 = vld [vmem:[%s14321_s18 + $0x168] sm:$0xff]  ;;  %v502_v60 = vld [vmem:[%s14321_s18 + $0x170] sm:$0xff]  ;;  %v10064_v51 = vld [vmem:[%s16863_s1 + $0x6] sm:$0x3] }
  0x20   : > { %v541_v61 = vld [vmem:[%s14321_s18 + $0x89] sm:$0xff]  ;;  %v542_v62 = vld [vmem:[%s14321_s18 + $0x91] sm:$0xff]  ;;  %v14442_v3 = vpack.c.bf16 %v502_v60, %v501_v59  ;;  %v14523_v60 = vand.u32 %v10064_v51, %v14300_v5 }
  0x21   : > { %v503_v63 = vld [vmem:[%s14321_s18 + $0x188] sm:$0xff]  ;;  %v504_v0 = vld [vmem:[%s14321_s18 + $0x190] sm:$0xff]  ;;  %v14444_v4 = vpack.c.bf16 %v542_v62, %v541_v61 }
  0x22   : > { %v543_v1 = vld [vmem:[%s14321_s18 + $0xa9] sm:$0xff]  ;;  %v544_v2 = vld [vmem:[%s14321_s18 + $0xb1] sm:$0xff]  ;;  %v14446_v6 = vpack.c.bf16 %v504_v0, %v503_v63 }
  0x23   : > { %v14448_v7 = vpack.c.bf16 %v544_v2, %v543_v1  ;;  %v505_v9 = vld [vmem:[%s14321_s18 + $0x1a8] sm:$0xff]  ;;  %v506_v10 = vld [vmem:[%s14321_s18 + $0x1b0] sm:$0xff] }
  0x24   : > { %v545_v11 = vld [vmem:[%s14321_s18 + $0xc9] sm:$0xff]  ;;  %v546_v12 = vld [vmem:[%s14321_s18 + $0xd1] sm:$0xff]  ;;  %v14466_v17 = vpack.c.bf16 %v506_v10, %v505_v9 }
  0x25   : > { %11689 = vmatmul.mubr.msk.bf16.gmra.mrb[8].mxu1 %vm591_vm2, %v14361_v32  ;;  %v507_v13 = vld [vmem:[%s14321_s18 + $0x1c8] sm:$0xff]  ;;  %v508_v14 = vld [vmem:[%s14321_s18 + $0x1d0] sm:$0xff]  ;;  %v14468_v18 = vpack.c.bf16 %v546_v12, %v545_v11 }
  0x26   : > { %11825 = vmatmul.mubr.msk.bf16.gmra.mrb[8].mxu0 %vm591_vm2, %v14375_v37  ;;  %11692 = vmatprep.mubr.msk.bf16.mxu1 %vm591_vm2, %v14375_v37  ;;  %v547_v15 = vld [vmem:[%s14321_s18 + $0xe9] sm:$0xff]  ;;  %v548_v16 = vld [vmem:[%s14321_s18 + $0xf1] sm:$0xff]  ;;  %v14470_v19 = vpack.c.bf16 %v508_v14, %v507_v13 }
  0x27   : > { %11828 = vmatprep.mubr.msk.bf16.mxu0 %vm591_vm2, %v14377_v38  ;;  %v14472_v20 = vpack.c.bf16 %v548_v16, %v547_v15  ;;  %v509_v22 = vld [vmem:[%s14321_s18 + $0x1e8] sm:$0xff]  ;;  %v510_v23 = vld [vmem:[%s14321_s18 + $0x1f0] sm:$0xff] }
  0x28   : > { %v550_v27 = vld [vmem:[%s14321_s18 + $0x111] sm:$0xff]  ;;  %v425_v28 = vld [vmem:[%s14321_s18 + $0x7] sm:$0xff]  ;;  %v14490_v34 = vpack.c.bf16 %v510_v23, %v509_v22 }
  0x29   : > { %v426_v29 = vld [vmem:[%s14321_s18 + $0xf] sm:$0xff]  ;;  %v427_v40 = vld [vmem:[%s14321_s18 + $0x27] sm:$0xff] }
  0x2a   : > { %v551_v30 = vld [vmem:[%s14321_s18 + $0x129] sm:$0xff]  ;;  %v552_v33 = vld [vmem:[%s14321_s18 + $0x131] sm:$0xff]  ;;  %v461_v36 = vpack.c.bf16 %v426_v29, %v425_v28 }
  0x2b   : > { %v14494_v39 = vpack.c.bf16 %v552_v33, %v551_v30  ;;  %v428_v41 = vld [vmem:[%s14321_s18 + $0x2f] sm:$0xff]  ;;  %v429_v46 = vld [vmem:[%s14321_s18 + $0x47] sm:$0xff] }
  0x2c   : > { %v553_v42 = vld [vmem:[%s14321_s18 + $0x149] sm:$0xff]  ;;  %v554_v45 = vld [vmem:[%s14321_s18 + $0x151] sm:$0xff]  ;;  %v14511_v50 = vpack.c.bf16 %v428_v41, %v427_v40 }
  0x2d   : > { %11693 = vmatmul.mubr.msk.bf16.gmra.mrb[12].mxu1 %vm591_vm2, %v14377_v38  ;;  %v430_v47 = vld [vmem:[%s14321_s18 + $0x4f] sm:$0xff]  ;;  %v14516_v52 = vpack.c.bf16 %v554_v45, %v553_v42  ;;  %v431_v61 = vld [vmem:[%s14321_s18 + $0x67] sm:$0xff] }
  0x2e   : > { %11829 = vmatmul.mubr.msk.bf16.gmra.mrb[12].mxu0 %vm591_vm2, %v14391_v43  ;;  %11696 = vmatprep.mubr.msk.bf16.mxu1 %vm591_vm2, %v14391_v43  ;;  %v555_v48 = vld [vmem:[%s14321_s18 + $0x169] sm:$0xff]  ;;  %v556_v49 = vld [vmem:[%s14321_s18 + $0x171] sm:$0xff]  ;;  %v14518_v54 = vpack.c.bf16 %v430_v47, %v429_v46 }
  0x2f   : > { %11850 = vmatprep.mubr.msk.bf16.mxu0 %vm591_vm2, %v14393_v44  ;;  %v14520_v59 = vpack.c.bf16 %v556_v49, %v555_v48  ;;  %v432_v62 = vld [vmem:[%s14321_s18 + $0x6f] sm:$0xff]  ;;  %v433_v1 = vld [vmem:[%s14321_s18 + $0x87] sm:$0xff] }
  0x30   : > { %v557_v63 = vld [vmem:[%s14321_s18 + $0x189] sm:$0xff]  ;;  %v558_v0 = vld [vmem:[%s14321_s18 + $0x191] sm:$0xff]  ;;  %v14543_v10 = vpack.c.bf16 %v432_v62, %v431_v61 }
  0x31   : > { %v434_v2 = vld [vmem:[%s14321_s18 + $0x8f] sm:$0xff]  ;;  %v14545_v11 = vpack.c.bf16 %v558_v0, %v557_v63  ;;  %v435_v14 = vld [vmem:[%s14321_s18 + $0xa7] sm:$0xff] }
  0x32   : > { %v560_v9 = vld [vmem:[%s14321_s18 + $0x1b1] sm:$0xff]  ;;  %v14547_v12 = vpack.c.bf16 %v434_v2, %v433_v1  ;;  %v561_v16 = vld [vmem:[%s14321_s18 + $0x1c9] sm:$0xff] }
  0x33   : > { %v436_v15 = vld [vmem:[%s14321_s18 + $0xaf] sm:$0xff]  ;;  %v437_v23 = vld [vmem:[%s14321_s18 + $0xc7] sm:$0xff] }
  0x34   : > { %v562_v22 = vld [vmem:[%s14321_s18 + $0x1d1] sm:$0xff]  ;;  %v14567_v29 = vpack.c.bf16 %v436_v15, %v435_v14  ;;  %v439_v40 = vld [vmem:[%s14321_s18 + $0xe7] sm:$0xff] }
  0x35   : > { %11697 = vmatmul.mubr.msk.bf16.gmra.mrb[16].mxu1 %vm591_vm2, %v14411_v53  ;;  %v564_v28 = vld [vmem:[%s14321_s18 + $0x1f1] sm:$0xff]  ;;  %v14569_v30 = vpack.c.bf16 %v562_v22, %v561_v16  ;;  %v565_v42 = vld [vmem:[%s14321_s18 + $0x209] sm:$0xff] }
  0x36   : > { %11851 = vmatmul.mubr.msk.bf16.vlgmr.msra.gmra.mrb[0].mxu0 %vm591_vm2, %v14416_v55  ;;  %11700 = vmatprep.mubr.msk.bf16.mxu1 %vm591_vm2, %v14418_v56  ;;  %v440_v41 = vld [vmem:[%s14321_s18 + $0xef] sm:$0xff]  ;;  %v441_v46 = vld [vmem:[%s14321_s18 + $0x107] sm:$0xff] }
  0x37   : > { %11883 = vmatpush3.bf16.msra.mxu0 %v1875_v25  ;;  %11854 = vmatprep.mubr.msk.bf16.mxu0 %vm591_vm2, %v14420_v57  ;;  %v549_v25 = vld [vmem:[%s14321_s18 + $0x109] sm:$0xff]  ;;  %v566_v45 = vld [vmem:[%s14321_s18 + $0x211] sm:$0xff]  ;;  %v14589_v48 = vpack.c.bf16 %v440_v41, %v439_v40 }
  0x38   : > { %11916 = vmatprep.subr.bf16.mxu0 %v14423_v58  ;;  %v14492_v35 = vpack.c.bf16 %v550_v27, %v549_v25  ;;  %v438_v25 = vld [vmem:[%s14321_s18 + $0xcf] sm:$0xff]  ;;  %v14591_v49 = vpack.c.bf16 %v566_v45, %v565_v42  ;;  %v443_v61 = vld [vmem:[%s14321_s18 + $0x127] sm:$0xff] }
  0x39   : > { %v563_v27 = vld [vmem:[%s14321_s18 + $0x1e9] sm:$0xff]  ;;  %v14571_v33 = vpack.c.bf16 %v438_v25, %v437_v23 }
  0x3a   : > { %v442_v47 = vld [vmem:[%s14321_s18 + $0x10f] sm:$0xff]  ;;  %v445_v63 = vld [vmem:[%s14321_s18 + $0x147] sm:$0xff] }
  0x3b   : > { %v14593_v51 = vpack.c.bf16 %v442_v47, %v441_v46  ;;  %v444_v62 = vld [vmem:[%s14321_s18 + $0x12f] sm:$0xff]  ;;  %v447_v14 = vld [vmem:[%s14321_s18 + $0x167] sm:$0xff] }
  0x3c   : > { %v446_v0 = vld [vmem:[%s14321_s18 + $0x14f] sm:$0xff]  ;;  %v14607_v1 = vpack.c.bf16 %v444_v62, %v443_v61  ;;  %v455_v42 = vld [vmem:[%s14321_s18 + $0x1e7] sm:$0xff] }
  0x3d   : > { %11701 = vmatmul.mubr.msk.bf16.gmra.mrb[20].mxu1 %vm591_vm2, %v14442_v3  ;;  %v10149_v2 = vld [vmem:[%s16863_s1 + $0x10] sm:$0x3] }
  0x3e   : > { %11855 = vmatmul.mubr.msk.bf16.gmra.mrb[4].mxu0 %vm591_vm2, %v14444_v4  ;;  %11704 = vmatprep.mubr.msk.bf16.mxu1 %vm591_vm2, %v14446_v6  ;;  %v448_v15 = vld [vmem:[%s14321_s18 + $0x16f] sm:$0xff] }
  0x3f   : > { %11858 = vmatprep.mubr.msk.bf16.mxu0 %vm591_vm2, %v14448_v7  ;;  %v450_v16 = vld [vmem:[%s14321_s18 + $0x18f] sm:$0xff]  ;;  %v14631_v22 = vpack.c.bf16 %v448_v15, %v447_v14 }
  0x40   : > { %v452_v25 = vld [vmem:[%s14321_s18 + $0x1af] sm:$0xff] }
  0x41   : > { %v456_v45 = vld [vmem:[%s14321_s18 + $0x1ef] sm:$0xff] }
  0x42   : > { %v533_v46 = vld [vmem:[%s14321_s18 + $0x9] sm:$0xff]  ;;  %v534_v47 = vld [vmem:[%s14321_s18 + $0x11] sm:$0xff]  ;;  %v14663_v61 = vpack.c.bf16 %v456_v45, %v455_v42 }
  0x43   : > { %v569_v62 = vpack.c.bf16 %v534_v47, %v533_v46 }
  0x45   : > { %11705 = vmatmul.mubr.msk.bf16.gmra.mrb[24].mxu1 %vm591_vm2, %v14466_v17 }
  0x46   : > { %11859 = vmatmul.mubr.msk.bf16.gmra.mrb[8].mxu0 %vm591_vm2, %v14468_v18  ;;  %11708 = vmatprep.mubr.msk.bf16.mxu1 %vm591_vm2, %v14470_v19 }
  0x47   : > { %11862 = vmatprep.mubr.msk.bf16.mxu0 %vm591_vm2, %v14472_v20 }
  0x4d   : > { %11709 = vmatmul.mubr.msk.bf16.gmra.mrb[28].mxu1 %vm591_vm2, %v14490_v34 }
  0x4e   : > { %11863 = vmatmul.mubr.msk.bf16.gmra.mrb[12].mxu0 %vm591_vm2, %v14492_v35  ;;  %11714 = vmatprep.mubr.msk.bf16.mxu1 %vm591_vm2, %v461_v36  ;;  %v14573_v36 = vpack.c.bf16 %v564_v28, %v563_v27  ;;  %v453_v27 = vld [vmem:[%s14321_s18 + $0x1c7] sm:$0xff]  ;;  %v454_v28 = vld [vmem:[%s14321_s18 + $0x1cf] sm:$0xff] }
  0x4f   : > { %11866 = vmatprep.mubr.msk.bf16.mxu0 %vm591_vm2, %v14494_v39  ;;  %v14649_v41 = vpack.c.bf16 %v454_v28, %v453_v27 }
  0x55   : > { %11715 = vmatmul.mubr.msk.bf16.vlgmr.msra.gmra.mrb[0].mxu1 %vm591_vm2, %v14511_v50 }
  0x56   : > { %11747 = vmatpush3.bf16.msra.mxu1 %v14346_v26  ;;  %11867 = vmatmul.mubr.msk.bf16.gmra.mrb[16].mxu0 %vm591_vm2, %v14516_v52  ;;  %v559_v26 = vld [vmem:[%s14321_s18 + $0x1a9] sm:$0xff] }
  0x57   : > { %11718 = vmatprep.mubr.msk.bf16.mxu1 %vm591_vm2, %v14518_v54  ;;  %11870 = vmatprep.mubr.msk.bf16.mxu0 %vm591_vm2, %v14520_v59  ;;  %v14549_v13 = vpack.c.bf16 %v560_v9, %v559_v26  ;;  %v14612_v26 = vpack.c.bf16 %v446_v0, %v445_v63  ;;  %v14615_v9 = vand.u32 %v10149_v2, %v14300_v5  ;;  %v449_v5 = vld [vmem:[%s14321_s18 + $0x187] sm:$0xff]  ;;  %v460_v2 = vld [vmem:[%s14321_s18 + $0x22f] sm:$0xff] }
  0x58   : > { %11780 = vmatprep.subr.bf16.mxu1 %v14523_v60  ;;  %v14633_v23 = vpack.c.bf16 %v450_v16, %v449_v5  ;;  %v459_v0 = vld [vmem:[%s14321_s18 + $0x227] sm:$0xff] }
  0x59   : > { %v478_v14 = vpack.c.bf16 %v460_v2, %v459_v0 }
  0x5d   : > { %11719 = vmatmul.mubr.msk.bf16.gmra.mrb[4].mxu1 %vm591_vm2, %v14543_v10 }
  0x5e   : > { %11871 = vmatmul.mubr.msk.bf16.gmra.mrb[20].mxu0 %vm591_vm2, %v14545_v11  ;;  %11722 = vmatprep.mubr.msk.bf16.mxu1 %vm591_vm2, %v14547_v12 }
  0x5f   : > { %11874 = vmatprep.mubr.msk.bf16.mxu0 %vm591_vm2, %v14549_v13 }
  0x65   : > { %11723 = vmatmul.mubr.msk.bf16.gmra.mrb[8].mxu1 %vm591_vm2, %v14567_v29 }
  0x66   : > { %11875 = vmatmul.mubr.msk.bf16.gmra.mrb[24].mxu0 %vm591_vm2, %v14569_v30  ;;  %11726 = vmatprep.mubr.msk.bf16.mxu1 %vm591_vm2, %v14571_v33 }
  0x67   : > { %11878 = vmatprep.mubr.msk.bf16.mxu0 %vm591_vm2, %v14573_v36 }
  0x6d   : > { %11727 = vmatmul.mubr.msk.bf16.gmra.mrb[12].mxu1 %vm591_vm2, %v14589_v48 }
  0x6e   : > { %11879 = vmatmul.mubr.msk.bf16.gmra.mrb[28].mxu0 %vm591_vm2, %v14591_v49  ;;  %11730 = vmatprep.mubr.msk.bf16.mxu1 %vm591_vm2, %v14593_v51 }
  0x6f   : > { %11884 = vmatprep.mubr.msk.bf16.mxu0 %vm591_vm2, %v14518_v54 }
  0x75   : > { %11731 = vmatmul.mubr.msk.bf16.gmra.mrb[16].mxu1 %vm591_vm2, %v14607_v1 }
  0x76   : > { %11885 = vmatmul.mubr.msk.bf16.vlgmr.msra.gmra.mrb[0].mxu0 %vm591_vm2, %v14543_v10  ;;  %11734 = vmatprep.mubr.msk.bf16.mxu1 %vm591_vm2, %v14612_v26 }
  0x77   : > { %11917 = vmatpush3.bf16.msra.mxu0 %v14423_v58  ;;  %11888 = vmatprep.mubr.msk.bf16.mxu0 %vm591_vm2, %v14547_v12  ;;  %v451_v58 = vld [vmem:[%s14321_s18 + $0x1a7] sm:$0xff] }
  0x78   : > { %11950 = vmatprep.subr.bf16.mxu0 %v14615_v9  ;;  %v14647_v40 = vpack.c.bf16 %v452_v25, %v451_v58 }
  0x7d   : > { %11735 = vmatmul.mubr.msk.bf16.gmra.mrb[20].mxu1 %vm591_vm2, %v14631_v22 }
  0x7e   : > { %11889 = vmatmul.mubr.msk.bf16.gmra.mrb[4].mxu0 %vm591_vm2, %v14567_v29  ;;  %11738 = vmatprep.mubr.msk.bf16.mxu1 %vm591_vm2, %v14633_v23 }
  0x7f   : > { %11892 = vmatprep.mubr.msk.bf16.mxu0 %vm591_vm2, %v14571_v33 }
  0x85   : > { %11739 = vmatmul.mubr.msk.bf16.gmra.mrb[24].mxu1 %vm591_vm2, %v14647_v40 }
  0x86   : > { %11893 = vmatmul.mubr.msk.bf16.gmra.mrb[8].mxu0 %vm591_vm2, %v14589_v48  ;;  %11742 = vmatprep.mubr.msk.bf16.mxu1 %vm591_vm2, %v14649_v41 }
  0x87   : > { %11896 = vmatprep.mubr.msk.bf16.mxu0 %vm591_vm2, %v14593_v51 }
  0x8d   : > { %11743 = vmatmul.mubr.msk.bf16.gmra.mrb[28].mxu1 %vm591_vm2, %v14663_v61 }
  0x8e   : > { %11897 = vmatmul.mubr.msk.bf16.gmra.mrb[12].mxu0 %vm591_vm2, %v14607_v1  ;;  %11748 = vmatprep.mubr.msk.bf16.mxu1 %vm591_vm2, %v569_v62 }
  0x8f   : > { %11900 = vmatprep.mubr.msk.bf16.mxu0 %vm591_vm2, %v14612_v26 }
  0x95   : > { %11749 = vmatmul.mubr.msk.bf16.vlgmr.msra.gmra.mrb[0].mxu1 %vm591_vm2, %v14393_v44  ;;  %v457_v44 = vld [vmem:[%s14321_s18 + $0x207] sm:$0xff] }
  0x96   : > { %11781 = vmatpush3.bf16.msra.mxu1 %v14523_v60  ;;  %11901 = vmatmul.mubr.msk.bf16.gmra.mrb[16].mxu0 %vm591_vm2, %v14631_v22  ;;  %v458_v60 = vld [vmem:[%s14321_s18 + $0x20f] sm:$0xff] }
  0x97   : > { %11752 = vmatprep.mubr.msk.bf16.mxu1 %vm591_vm2, %v14416_v55  ;;  %11904 = vmatprep.mubr.msk.bf16.mxu0 %vm591_vm2, %v14633_v23  ;;  %v14692_v63 = vpack.c.bf16 %v458_v60, %v457_v44 }
  0x98   : > { %13064 = vmatprep.subr.bf16.mxu1 %v14307_v8 }
  0x9d   : > { %11753 = vmatmul.mubr.msk.bf16.gmra.mrb[4].mxu1 %vm591_vm2, %v14420_v57 }
  0x9e   : > { %11905 = vmatmul.mubr.msk.bf16.gmra.mrb[20].mxu0 %vm591_vm2, %v14647_v40  ;;  %11756 = vmatprep.mubr.msk.bf16.mxu1 %vm591_vm2, %v14444_v4 }
  0x9f   : > { %11908 = vmatprep.mubr.msk.bf16.mxu0 %vm591_vm2, %v14649_v41 }
  0xa5   : > { %11757 = vmatmul.mubr.msk.bf16.gmra.mrb[8].mxu1 %vm591_vm2, %v14448_v7 }
  0xa6   : > { %11909 = vmatmul.mubr.msk.bf16.gmra.mrb[24].mxu0 %vm591_vm2, %v14663_v61  ;;  %11760 = vmatprep.mubr.msk.bf16.mxu1 %vm591_vm2, %v14468_v18 }
  0xa7   : > { %11912 = vmatprep.mubr.msk.bf16.mxu0 %vm591_vm2, %v14692_v63 }
  0xad   : > { %11761 = vmatmul.mubr.msk.bf16.gmra.mrb[12].mxu1 %vm591_vm2, %v14472_v20 }
  0xae   : > { %11913 = vmatmul.mubr.msk.bf16.gmra.mrb[28].mxu0 %vm591_vm2, %v478_v14  ;;  %11764 = vmatprep.mubr.msk.bf16.mxu1 %vm591_vm2, %v14492_v35 }
  0xaf   : > { %11918 = vmatprep.mubr.msk.bf16.mxu0 %vm591_vm2, %v14335_v21  ;;  %v512_v21 = vld [vmem:[%s14321_s18 + $0x210] sm:$0xff] }
  0xb5   : > { %11765 = vmatmul.mubr.msk.bf16.gmra.mrb[16].mxu1 %vm591_vm2, %v14494_v39 }
  0xb6   : > { %11919 = vmatmul.mubr.msk.bf16.vlgmr.msra.gmra.mrb[0].mxu0 %vm591_vm2, %v14340_v24  ;;  %11768 = vmatprep.mubr.msk.bf16.mxu1 %vm591_vm2, %v14516_v52 }
  0xb7   : > { %11951 = vmatpush3.bf16.msra.mxu0 %v14615_v9  ;;  %11922 = vmatprep.mubr.msk.bf16.mxu0 %vm591_vm2, %v14359_v31  ;;  %v513_v31 = vld [vmem:[%s14321_s18 + $0x228] sm:$0xff] }
  0xbd   : > { %11769 = vmatmul.mubr.msk.bf16.gmra.mrb[20].mxu1 %vm591_vm2, %v14520_v59 }
  0xbe   : > { %11923 = vmatmul.mubr.msk.bf16.gmra.mrb[4].mxu0 %vm591_vm2, %v14361_v32  ;;  %11772 = vmatprep.mubr.msk.bf16.mxu1 %vm591_vm2, %v14545_v11  ;;  %v514_v32 = vld [vmem:[%s14321_s18 + $0x230] sm:$0xff] }
  0xbf   : > { %11926 = vmatprep.mubr.msk.bf16.mxu0 %vm591_vm2, %v14375_v37  ;;  %v532_v37 = vpack.c.bf16 %v514_v32, %v513_v31 }
  0xc5   : > { %11773 = vmatmul.mubr.msk.bf16.gmra.mrb[24].mxu1 %vm591_vm2, %v14549_v13 }
  0xc6   : > { %11927 = vmatmul.mubr.msk.bf16.gmra.mrb[8].mxu0 %vm591_vm2, %v14377_v38  ;;  %11776 = vmatprep.mubr.msk.bf16.mxu1 %vm591_vm2, %v14569_v30  ;;  %v567_v38 = vld [vmem:[%s14321_s18 + $0x229] sm:$0xff] }
  0xc7   : > { %11930 = vmatprep.mubr.msk.bf16.mxu0 %vm591_vm2, %v14391_v43  ;;  %v568_v43 = vld [vmem:[%s14321_s18 + $0x231] sm:$0xff] }
  0xcd   : > { %11777 = vmatmul.mubr.msk.bf16.gmra.mrb[28].mxu1 %vm591_vm2, %v14573_v36 }
  0xce   : > { %11931 = vmatmul.mubr.msk.bf16.gmra.mrb[12].mxu0 %vm591_vm2, %v14411_v53  ;;  %11782 = vmatprep.mubr.msk.bf16.mxu1 %vm591_vm2, %v14511_v50 }
  0xcf   : > { %11934 = vmatprep.mubr.msk.bf16.mxu0 %vm591_vm2, %v14418_v56 }
  0xd5   : > { %11783 = vmatmul.mubr.msk.bf16.vlgmr.msra.gmra.mrb[0].mxu1 %vm591_vm2, %v14518_v54 }
  0xd6   : > { %13065 = vmatpush3.bf16.msra.mxu1 %v14307_v8  ;;  %11935 = vmatmul.mubr.msk.bf16.gmra.mrb[16].mxu0 %vm591_vm2, %v14442_v3  ;;  %v511_v8 = vld [vmem:[%s14321_s18 + $0x208] sm:$0xff] }
  0xd7   : > { %11786 = vmatprep.mubr.msk.bf16.mxu1 %vm591_vm2, %v14543_v10  ;;  %11938 = vmatprep.mubr.msk.bf16.mxu0 %vm591_vm2, %v14446_v6  ;;  %v531_v24 = vpack.c.bf16 %v512_v21, %v511_v8 }
  0xdd   : > { %11787 = vmatmul.mubr.msk.bf16.gmra.mrb[4].mxu1 %vm591_vm2, %v14547_v12 }
  0xde   : > { %11939 = vmatmul.mubr.msk.bf16.gmra.mrb[20].mxu0 %vm591_vm2, %v14466_v17  ;;  %11790 = vmatprep.mubr.msk.bf16.mxu1 %vm591_vm2, %v14567_v29 }
  0xdf   : > { %11942 = vmatprep.mubr.msk.bf16.mxu0 %vm591_vm2, %v14470_v19 }
  0xe5   : > { %11791 = vmatmul.mubr.msk.bf16.gmra.mrb[8].mxu1 %vm591_vm2, %v14571_v33 }
  0xe6   : > { %11943 = vmatmul.mubr.msk.bf16.gmra.mrb[24].mxu0 %vm591_vm2, %v14490_v34  ;;  %11794 = vmatprep.mubr.msk.bf16.mxu1 %vm591_vm2, %v14589_v48 }
  0xe7   : > { %11946 = vmatprep.mubr.msk.bf16.mxu0 %vm591_vm2, %v531_v24 }
  0xed   : > { %11795 = vmatmul.mubr.msk.bf16.gmra.mrb[12].mxu1 %vm591_vm2, %v14593_v51 }
  0xee   : > { %11947 = vmatmul.mubr.msk.bf16.gmra.mrb[28].mxu0 %vm591_vm2, %v532_v37  ;;  %11798 = vmatprep.mubr.msk.bf16.mxu1 %vm591_vm2, %v14607_v1 }
  0xef   : > { %11952 = vmatprep.mubr.msk.bf16.mxu0 %vm591_vm2, %v14416_v55  ;;  %v14242_v55 = vmov 0.0  }
  0xf0   : > { %290 = vst.msk [vmem:[#allocation2 + $0x48] sm:$0xff] %vm280_vm3, %v14242_v55  ;;  %281 = vst.msk [vmem:[#allocation2] sm:$0xff] %vm280_vm3, %v14242_v55 }
  0xf1   : > { %282 = vst.msk [vmem:[#allocation2 + $0x8] sm:$0xff] %vm280_vm3, %v14242_v55  ;;  %283 = vst.msk [vmem:[#allocation2 + $0x10] sm:$0xff] %vm280_vm3, %v14242_v55 }
  0xf2   : > { %284 = vst.msk [vmem:[#allocation2 + $0x18] sm:$0xff] %vm280_vm3, %v14242_v55  ;;  %285 = vst.msk [vmem:[#allocation2 + $0x20] sm:$0xff] %vm280_vm3, %v14242_v55 }
  0xf3   : > { %286 = vst.msk [vmem:[#allocation2 + $0x28] sm:$0xff] %vm280_vm3, %v14242_v55  ;;  %287 = vst.msk [vmem:[#allocation2 + $0x30] sm:$0xff] %vm280_vm3, %v14242_v55 }
  0xf4   : > { %288 = vst.msk [vmem:[#allocation2 + $0x38] sm:$0xff] %vm280_vm3, %v14242_v55  ;;  %289 = vst.msk [vmem:[#allocation2 + $0x40] sm:$0xff] %vm280_vm3, %v14242_v55 }
  0xf5   : > { %11799 = vmatmul.mubr.msk.bf16.gmra.mrb[16].mxu1 %vm591_vm2, %v14612_v26  ;;  %291 = vst.msk [vmem:[#allocation2 + $0x50] sm:$0xff] %vm280_vm3, %v14242_v55  ;;  %292 = vst.msk [vmem:[#allocation2 + $0x58] sm:$0xff] %vm280_vm3, %v14242_v55 }
  0xf6   : > { %11953 = vmatmul.mubr.msk.bf16.vlgmr.msra.gmra.mrb[0].mxu0 %vm591_vm2, %v14420_v57  ;;  %11802 = vmatprep.mubr.msk.bf16.mxu1 %vm591_vm2, %v14631_v22  ;;  %293 = vst.msk [vmem:[#allocation2 + $0x60] sm:$0xff] %vm280_vm3, %v14242_v55  ;;  %294 = vst.msk [vmem:[#allocation2 + $0x68] sm:$0xff] %vm280_vm3, %v14242_v55 }
  0xf7   : > { %11956 = vmatprep.mubr.msk.bf16.mxu0 %vm591_vm2, %v14444_v4  ;;  %295 = vst.msk [vmem:[#allocation2 + $0x70] sm:$0xff] %vm280_vm3, %v14242_v55  ;;  %296 = vst.msk [vmem:[#allocation2 + $0x78] sm:$0xff] %vm280_vm3, %v14242_v55 }
  0xf8   : > { %297 = vst.msk [vmem:[#allocation2 + $0x80] sm:$0xff] %vm280_vm3, %v14242_v55  ;;  %298 = vst.msk [vmem:[#allocation2 + $0x88] sm:$0xff] %vm280_vm3, %v14242_v55 }
  0xf9   : > { %299 = vst.msk [vmem:[#allocation2 + $0x90] sm:$0xff] %vm280_vm3, %v14242_v55  ;;  %300 = vst.msk [vmem:[#allocation2 + $0x98] sm:$0xff] %vm280_vm3, %v14242_v55 }
  0xfa   : > { %301 = vst.msk [vmem:[#allocation2 + $0xa0] sm:$0xff] %vm280_vm3, %v14242_v55  ;;  %302 = vst.msk [vmem:[#allocation2 + $0xa8] sm:$0xff] %vm280_vm3, %v14242_v55 }
  0xfb   : > { %303 = vst.msk [vmem:[#allocation2 + $0xb0] sm:$0xff] %vm280_vm3, %v14242_v55  ;;  %304 = vst.msk [vmem:[#allocation2 + $0xb8] sm:$0xff] %vm280_vm3, %v14242_v55 }
  0xfc   : > { %305 = vst.msk [vmem:[#allocation2 + $0xc0] sm:$0xff] %vm280_vm3, %v14242_v55  ;;  %306 = vst.msk [vmem:[#allocation2 + $0xc8] sm:$0xff] %vm280_vm3, %v14242_v55 }
  0xfd   : > { %11803 = vmatmul.mubr.msk.bf16.gmra.mrb[20].mxu1 %vm591_vm2, %v14633_v23  ;;  %307 = vst.msk [vmem:[#allocation2 + $0xd0] sm:$0xff] %vm280_vm3, %v14242_v55  ;;  %308 = vst.msk [vmem:[#allocation2 + $0xd8] sm:$0xff] %vm280_vm3, %v14242_v55 }
  0xfe   : > { %11957 = vmatmul.mubr.msk.bf16.gmra.mrb[4].mxu0 %vm591_vm2, %v14448_v7  ;;  %11806 = vmatprep.mubr.msk.bf16.mxu1 %vm591_vm2, %v14647_v40  ;;  %309 = vst.msk [vmem:[#allocation2 + $0xe0] sm:$0xff] %vm280_vm3, %v14242_v55  ;;  %310 = vst.msk [vmem:[#allocation2 + $0xe8] sm:$0xff] %vm280_vm3, %v14242_v55 }
  0xff   : > { %11960 = vmatprep.mubr.msk.bf16.mxu0 %vm591_vm2, %v14468_v18  ;;  %311 = vst.msk [vmem:[#allocation2 + $0xf0] sm:$0xff] %vm280_vm3, %v14242_v55  ;;  %312 = vst.msk [vmem:[#allocation2 + $0xf8] sm:$0xff] %vm280_vm3, %v14242_v55 }
 0x100   : > { %313 = vst.msk [vmem:[#allocation2 + $0x100] sm:$0xff] %vm280_vm3, %v14242_v55  ;;  %314 = vst.msk [vmem:[#allocation2 + $0x108] sm:$0xff] %vm280_vm3, %v14242_v55 }
 0x101   : > { %315 = vst.msk [vmem:[#allocation2 + $0x110] sm:$0xff] %vm280_vm3, %v14242_v55  ;;  %316 = vst.msk [vmem:[#allocation2 + $0x118] sm:$0xff] %vm280_vm3, %v14242_v55 }
 0x102   : > { %317 = vst.msk [vmem:[#allocation2 + $0x120] sm:$0xff] %vm280_vm3, %v14242_v55  ;;  %318 = vst.msk [vmem:[#allocation2 + $0x128] sm:$0xff] %vm280_vm3, %v14242_v55 }
 0x103   : > { %319 = vst.msk [vmem:[#allocation2 + $0x130] sm:$0xff] %vm280_vm3, %v14242_v55  ;;  %320 = vst.msk [vmem:[#allocation2 + $0x138] sm:$0xff] %vm280_vm3, %v14242_v55 }
 0x104   : > { %321 = vst.msk [vmem:[#allocation2 + $0x140] sm:$0xff] %vm280_vm3, %v14242_v55  ;;  %322 = vst.msk [vmem:[#allocation2 + $0x148] sm:$0xff] %vm280_vm3, %v14242_v55 }
 0x105   : > { %11807 = vmatmul.mubr.msk.bf16.gmra.mrb[24].mxu1 %vm591_vm2, %v14649_v41  ;;  %323 = vst.msk [vmem:[#allocation2 + $0x150] sm:$0xff] %vm280_vm3, %v14242_v55  ;;  %324 = vst.msk [vmem:[#allocation2 + $0x158] sm:$0xff] %vm280_vm3, %v14242_v55 }
 0x106   : > { %11961 = vmatmul.mubr.msk.bf16.gmra.mrb[8].mxu0 %vm591_vm2, %v14472_v20  ;;  %11810 = vmatprep.mubr.msk.bf16.mxu1 %vm591_vm2, %v14663_v61  ;;  %325 = vst.msk [vmem:[#allocation2 + $0x160] sm:$0xff] %vm280_vm3, %v14242_v55  ;;  %326 = vst.msk [vmem:[#allocation2 + $0x168] sm:$0xff] %vm280_vm3, %v14242_v55 }
 0x107   : > { %11964 = vmatprep.mubr.msk.bf16.mxu0 %vm591_vm2, %v14492_v35  ;;  %327 = vst.msk [vmem:[#allocation2 + $0x170] sm:$0xff] %vm280_vm3, %v14242_v55  ;;  %328 = vst.msk [vmem:[#allocation2 + $0x178] sm:$0xff] %vm280_vm3, %v14242_v55 }
 0x108   : > { %329 = vst.msk [vmem:[#allocation2 + $0x180] sm:$0xff] %vm280_vm3, %v14242_v55  ;;  %330 = vst.msk [vmem:[#allocation2 + $0x188] sm:$0xff] %vm280_vm3, %v14242_v55 }
 0x109   : > { %331 = vst.msk [vmem:[#allocation2 + $0x190] sm:$0xff] %vm280_vm3, %v14242_v55  ;;  %332 = vst.msk [vmem:[#allocation2 + $0x198] sm:$0xff] %vm280_vm3, %v14242_v55 }
 0x10a   : > { %333 = vst.msk [vmem:[#allocation2 + $0x1a0] sm:$0xff] %vm280_vm3, %v14242_v55  ;;  %334 = vst.msk [vmem:[#allocation2 + $0x1a8] sm:$0xff] %vm280_vm3, %v14242_v55 }
 0x10b   : > { %335 = vst.msk [vmem:[#allocation2 + $0x1b0] sm:$0xff] %vm280_vm3, %v14242_v55  ;;  %336 = vst.msk [vmem:[#allocation2 + $0x1b8] sm:$0xff] %vm280_vm3, %v14242_v55 }
 0x10c   : > { %337 = vst.msk [vmem:[#allocation2 + $0x1c0] sm:$0xff] %vm280_vm3, %v14242_v55  ;;  %338 = vst.msk [vmem:[#allocation2 + $0x1c8] sm:$0xff] %vm280_vm3, %v14242_v55 }
 0x10d   : > { %11811 = vmatmul.mubr.msk.bf16.gmra.mrb[28].mxu1 %vm591_vm2, %v14692_v63  ;;  %339 = vst.msk [vmem:[#allocation2 + $0x1d0] sm:$0xff] %vm280_vm3, %v14242_v55  ;;  %340 = vst.msk [vmem:[#allocation2 + $0x1d8] sm:$0xff] %vm280_vm3, %v14242_v55 }
 0x10e   : > { %11965 = vmatmul.mubr.msk.bf16.gmra.mrb[12].mxu0 %vm591_vm2, %v14494_v39  ;;  %11832 = vmatprep.mubr.msk.bf16.mxu1 %vm591_vm2, %v14411_v53  ;;  %v586_v53 = vpack.c.bf16 %v568_v43, %v567_v38  ;;  %341 = vst.msk [vmem:[#allocation2 + $0x1e0] sm:$0xff] %vm280_vm3, %v14242_v55  ;;  %342 = vst.msk [vmem:[#allocation2 + $0x1e8] sm:$0xff] %vm280_vm3, %v14242_v55 }
 0x10f   : > { %11968 = vmatprep.mubr.msk.bf16.mxu0 %vm591_vm2, %v14516_v52  ;;  %343 = vst.msk [vmem:[#allocation2 + $0x1f0] sm:$0xff] %vm280_vm3, %v14242_v55  ;;  %344 = vst.msk [vmem:[#allocation2 + $0x1f8] sm:$0xff] %vm280_vm3, %v14242_v55 }
 0x110   : > { %345 = vst.msk [vmem:[#allocation2 + $0x200] sm:$0xff] %vm280_vm3, %v14242_v55  ;;  %346 = vst.msk [vmem:[#allocation2 + $0x208] sm:$0xff] %vm280_vm3, %v14242_v55 }
 0x111   : > { %347 = vst.msk [vmem:[#allocation2 + $0x210] sm:$0xff] %vm280_vm3, %v14242_v55  ;;  %348 = vst.msk [vmem:[#allocation2 + $0x218] sm:$0xff] %vm280_vm3, %v14242_v55 }
 0x112   : > { %349 = vst.msk [vmem:[#allocation2 + $0x220] sm:$0xff] %vm280_vm3, %v14242_v55  ;;  %350 = vst.msk [vmem:[#allocation2 + $0x228] sm:$0xff] %vm280_vm3, %v14242_v55 }
 0x113   : > { %351 = vst.msk [vmem:[#allocation2 + $0x230] sm:$0xff] %vm280_vm3, %v14242_v55  ;;  %352 = vst.msk [vmem:[#allocation2 + $0x238] sm:$0xff] %vm280_vm3, %v14242_v55 }
 0x114   : > { %353 = vst.msk [vmem:[#allocation3] sm:$0xff] %vm280_vm3, %v14242_v55  ;;  %354 = vst.msk [vmem:[#allocation3 + $0x8] sm:$0xff] %vm280_vm3, %v14242_v55 }
 0x115   : > { %11833 = vmatmul.mubr.msk.bf16.vlgmr.msra.gmra.mrb[16].mxu1 %vm591_vm2, %v14418_v56  ;;  %355 = vst.msk [vmem:[#allocation3 + $0x10] sm:$0xff] %vm280_vm3, %v14242_v55  ;;  %356 = vst.msk [vmem:[#allocation3 + $0x18] sm:$0xff] %vm280_vm3, %v14242_v55 }
 0x116   : > { %11969 = vmatmul.mubr.msk.bf16.gmra.mrb[16].mxu0 %vm591_vm2, %v14520_v59  ;;  %11836 = vmatprep.mubr.msk.bf16.mxu1 %vm591_vm2, %v14442_v3  ;;  %357 = vst.msk [vmem:[#allocation3 + $0x20] sm:$0xff] %vm280_vm3, %v14242_v55  ;;  %358 = vst.msk [vmem:[#allocation3 + $0x28] sm:$0xff] %vm280_vm3, %v14242_v55  ;;  %v15138_v59 = vld [vmem:[%s16864_s2] ss:$0 sm:$0xff] }
 0x117   : > { %11972 = vmatprep.mubr.msk.bf16.mxu0 %vm591_vm2, %v14545_v11  ;;  %359 = vst.msk [vmem:[#allocation3 + $0x30] sm:$0xff] %vm280_vm3, %v14242_v55  ;;  %360 = vst.msk [vmem:[#allocation3 + $0x38] sm:$0xff] %vm280_vm3, %v14242_v55 }
 0x118   : > { %361 = vst.msk [vmem:[#allocation3 + $0x40] sm:$0xff] %vm280_vm3, %v14242_v55  ;;  %362 = vst.msk [vmem:[#allocation3 + $0x48] sm:$0xff] %vm280_vm3, %v14242_v55 }
 0x119   : > { %363 = vst.msk [vmem:[#allocation3 + $0x50] sm:$0xff] %vm280_vm3, %v14242_v55  ;;  %364 = vst.msk [vmem:[#allocation3 + $0x58] sm:$0xff] %vm280_vm3, %v14242_v55 }
 0x11a   : > { %365 = vst.msk [vmem:[#allocation3 + $0x60] sm:$0xff] %vm280_vm3, %v14242_v55  ;;  %366 = vst.msk [vmem:[#allocation3 + $0x68] sm:$0xff] %vm280_vm3, %v14242_v55 }
 0x11b   : > { %367 = vst.msk [vmem:[#allocation3 + $0x70] sm:$0xff] %vm280_vm3, %v14242_v55  ;;  %368 = vst.msk [vmem:[#allocation3 + $0x78] sm:$0xff] %vm280_vm3, %v14242_v55 }
 0x11c   : > { %369 = vst.msk [vmem:[#allocation3 + $0x80] sm:$0xff] %vm280_vm3, %v14242_v55  ;;  %370 = vst.msk [vmem:[#allocation3 + $0x88] sm:$0xff] %vm280_vm3, %v14242_v55 }
 0x11d   : > { %11837 = vmatmul.mubr.msk.bf16.gmra.mrb[20].mxu1 %vm591_vm2, %v14446_v6  ;;  %371 = vst.msk [vmem:[#allocation3 + $0x90] sm:$0xff] %vm280_vm3, %v14242_v55  ;;  %372 = vst.msk [vmem:[#allocation3 + $0x98] sm:$0xff] %vm280_vm3, %v14242_v55 }
 0x11e   : > { %11973 = vmatmul.mubr.msk.bf16.gmra.mrb[20].mxu0 %vm591_vm2, %v14549_v13  ;;  %11840 = vmatprep.mubr.msk.bf16.mxu1 %vm591_vm2, %v14466_v17  ;;  %373 = vst.msk [vmem:[#allocation3 + $0xa0] sm:$0xff] %vm280_vm3, %v14242_v55  ;;  %374 = vst.msk [vmem:[#allocation3 + $0xa8] sm:$0xff] %vm280_vm3, %v14242_v55 }
 0x11f   : > { %11976 = vmatprep.mubr.msk.bf16.mxu0 %vm591_vm2, %v14569_v30  ;;  %375 = vst.msk [vmem:[#allocation3 + $0xb0] sm:$0xff] %vm280_vm3, %v14242_v55  ;;  %376 = vst.msk [vmem:[#allocation3 + $0xb8] sm:$0xff] %vm280_vm3, %v14242_v55 }
 0x120   : > { %377 = vst.msk [vmem:[#allocation3 + $0xc0] sm:$0xff] %vm280_vm3, %v14242_v55  ;;  %378 = vst.msk [vmem:[#allocation3 + $0xc8] sm:$0xff] %vm280_vm3, %v14242_v55 }
 0x121   : > { %379 = vst.msk [vmem:[#allocation3 + $0xd0] sm:$0xff] %vm280_vm3, %v14242_v55  ;;  %380 = vst.msk [vmem:[#allocation3 + $0xd8] sm:$0xff] %vm280_vm3, %v14242_v55 }
 0x122   : > { %381 = vst.msk [vmem:[#allocation3 + $0xe0] sm:$0xff] %vm280_vm3, %v14242_v55  ;;  %382 = vst.msk [vmem:[#allocation3 + $0xe8] sm:$0xff] %vm280_vm3, %v14242_v55 }
 0x123   : > { %383 = vst.msk [vmem:[#allocation3 + $0xf0] sm:$0xff] %vm280_vm3, %v14242_v55  ;;  %384 = vst.msk [vmem:[#allocation3 + $0xf8] sm:$0xff] %vm280_vm3, %v14242_v55 }
 0x124   : > { %385 = vst.msk [vmem:[#allocation3 + $0x100] sm:$0xff] %vm280_vm3, %v14242_v55  ;;  %386 = vst.msk [vmem:[#allocation3 + $0x108] sm:$0xff] %vm280_vm3, %v14242_v55 }
 0x125   : > { %11841 = vmatmul.mubr.msk.bf16.gmra.mrb[24].mxu1 %vm591_vm2, %v14470_v19  ;;  %387 = vst.msk [vmem:[#allocation3 + $0x110] sm:$0xff] %vm280_vm3, %v14242_v55  ;;  %388 = vst.msk [vmem:[#allocation3 + $0x118] sm:$0xff] %vm280_vm3, %v14242_v55 }
 0x126   : > { %11977 = vmatmul.mubr.msk.bf16.gmra.mrb[24].mxu0 %vm591_vm2, %v14573_v36  ;;  %11844 = vmatprep.mubr.msk.bf16.mxu1 %vm591_vm2, %v14490_v34  ;;  %389 = vst.msk [vmem:[#allocation3 + $0x120] sm:$0xff] %vm280_vm3, %v14242_v55  ;;  %390 = vst.msk [vmem:[#allocation3 + $0x128] sm:$0xff] %vm280_vm3, %v14242_v55 }
 0x127   : > { %11980 = vmatprep.mubr.msk.bf16.mxu0 %vm591_vm2, %v14591_v49  ;;  %391 = vst.msk [vmem:[#allocation3 + $0x130] sm:$0xff] %vm280_vm3, %v14242_v55  ;;  %392 = vst.msk [vmem:[#allocation3 + $0x138] sm:$0xff] %vm280_vm3, %v14242_v55 }
 0x128   : > { %393 = vst.msk [vmem:[#allocation3 + $0x140] sm:$0xff] %vm280_vm3, %v14242_v55  ;;  %394 = vst.msk [vmem:[#allocation3 + $0x148] sm:$0xff] %vm280_vm3, %v14242_v55 }
 0x129   : > { %395 = vst.msk [vmem:[#allocation3 + $0x150] sm:$0xff] %vm280_vm3, %v14242_v55  ;;  %396 = vst.msk [vmem:[#allocation3 + $0x158] sm:$0xff] %vm280_vm3, %v14242_v55 }
 0x12a   : > { %397 = vst.msk [vmem:[#allocation3 + $0x160] sm:$0xff] %vm280_vm3, %v14242_v55  ;;  %398 = vst.msk [vmem:[#allocation3 + $0x168] sm:$0xff] %vm280_vm3, %v14242_v55 }
 0x12b   : > { %399 = vst.msk [vmem:[#allocation3 + $0x170] sm:$0xff] %vm280_vm3, %v14242_v55  ;;  %400 = vst.msk [vmem:[#allocation3 + $0x178] sm:$0xff] %vm280_vm3, %v14242_v55 }
 0x12c   : > { %401 = vst.msk [vmem:[#allocation3 + $0x180] sm:$0xff] %vm280_vm3, %v14242_v55  ;;  %402 = vst.msk [vmem:[#allocation3 + $0x188] sm:$0xff] %vm280_vm3, %v14242_v55 }
 0x12d   : > { %11845 = vmatmul.mubr.msk.bf16.gmra.mrb[28].mxu1 %vm591_vm2, %v531_v24  ;;  %403 = vst.msk [vmem:[#allocation3 + $0x190] sm:$0xff] %vm280_vm3, %v14242_v55  ;;  %404 = vst.msk [vmem:[#allocation3 + $0x198] sm:$0xff] %vm280_vm3, %v14242_v55 }
 0x12e   : > { %11981 = vmatmul.mubr.msk.bf16.gmra.mrb[28].mxu0 %vm591_vm2, %v586_v53  ;;  %405 = vst.msk [vmem:[#allocation3 + $0x1a0] sm:$0xff] %vm280_vm3, %v14242_v55  ;;  %406 = vst.msk [vmem:[#allocation3 + $0x1a8] sm:$0xff] %vm280_vm3, %v14242_v55 }
 0x12f   : > { %407 = vst.msk [vmem:[#allocation3 + $0x1b0] sm:$0xff] %vm280_vm3, %v14242_v55  ;;  %408 = vst.msk [vmem:[#allocation3 + $0x1b8] sm:$0xff] %vm280_vm3, %v14242_v55 }
 0x130   : > { %409 = vst.msk [vmem:[#allocation3 + $0x1c0] sm:$0xff] %vm280_vm3, %v14242_v55  ;;  %410 = vst.msk [vmem:[#allocation3 + $0x1c8] sm:$0xff] %vm280_vm3, %v14242_v55 }
 0x131   : > { %411 = vst.msk [vmem:[#allocation3 + $0x1d0] sm:$0xff] %vm280_vm3, %v14242_v55  ;;  %412 = vst.msk [vmem:[#allocation3 + $0x1d8] sm:$0xff] %vm280_vm3, %v14242_v55 }
 0x132   : > { %413 = vst.msk [vmem:[#allocation3 + $0x1e0] sm:$0xff] %vm280_vm3, %v14242_v55  ;;  %414 = vst.msk [vmem:[#allocation3 + $0x1e8] sm:$0xff] %vm280_vm3, %v14242_v55 }
 0x133   : > { %415 = vst.msk [vmem:[#allocation3 + $0x1f0] sm:$0xff] %vm280_vm3, %v14242_v55  ;;  %416 = vst.msk [vmem:[#allocation3 + $0x1f8] sm:$0xff] %vm280_vm3, %v14242_v55 }
 0x134   : > { %417 = vst.msk [vmem:[#allocation3 + $0x200] sm:$0xff] %vm280_vm3, %v14242_v55  ;;  %418 = vst.msk [vmem:[#allocation3 + $0x208] sm:$0xff] %vm280_vm3, %v14242_v55 }
 0x135   : > { %419 = vst.msk [vmem:[#allocation3 + $0x210] sm:$0xff] %vm280_vm3, %v14242_v55  ;;  %420 = vst.msk [vmem:[#allocation3 + $0x218] sm:$0xff] %vm280_vm3, %v14242_v55 }
 0x136   : > { %421 = vst.msk [vmem:[#allocation3 + $0x220] sm:$0xff] %vm280_vm3, %v14242_v55  ;;  %422 = vst.msk [vmem:[#allocation3 + $0x228] sm:$0xff] %vm280_vm3, %v14242_v55 }
 0x137   : > { %423 = vst.msk [vmem:[#allocation3 + $0x230] sm:$0xff] %vm280_vm3, %v14242_v55  ;;  %424 = vst.msk [vmem:[#allocation3 + $0x238] sm:$0xff] %vm280_vm3, %v14242_v55 }
 0x1a8   : > { %v11784_v56 = vpop.f32.mrb[0].mxu1 }
 0x1a9   : > { %v1308_v57 = vpop.f32.mrb[1].mxu1 }
 0x1aa   : > { %v11785_v3 = vpop.f32.mrb[2].mxu1 }
 0x1ab   : > { %v1311_v4 = vpop.f32.mrb[3].mxu1 }
 0x1b0   : > { %v11788_v6 = vpop.f32.mrb[4].mxu1 }
 0x1b1   : > { %v1324_v7 = vpop.f32.mrb[5].mxu1 }
 0x1b2   : > { %v11789_v17 = vpop.f32.mrb[6].mxu1 }
 0x1b3   : > { %v1327_v18 = vpop.f32.mrb[7].mxu1 }
 0x1b8   : > { %v11792_v19 = vpop.f32.mrb[8].mxu1 }
 0x1b9   : > { %v1340_v20 = vpop.f32.mrb[9].mxu1 }
 0x1ba   : > { %v11793_v34 = vpop.f32.mrb[10].mxu1 }
 0x1bb   : > { %v1343_v35 = vpop.f32.mrb[11].mxu1 }
 0x1c0   : > { %v15127_v39 = vpop.f32.mrb[12].mxu1 }
 0x1c1   : > { %v15129_v50 = vpop.f32.mrb[13].mxu1 }
 0x1c2   : > { %v15131_v52 = vpop.f32.mrb[14].mxu1 }
 0x1c3   : > { %v15133_v54 = vpop.f32.mrb[15].mxu1 }
 0x1c9   : > { %v11954_v10 = vpop.f32.mrb[0].mxu0 }
 0x1ca   : > { %v13066_v11 = vadd.f32 %v11954_v10, %v11784_v56  ;;  %v2313_v12 = vpop.f32.mrb[1].mxu0 }
 0x1cb   : > { %v13067_v13 = vadd.f32 %v2313_v12, %v1308_v57  ;;  %v11955_v29 = vpop.f32.mrb[2].mxu0 }
 0x1cc   : > { %v2480_v30 = vadd.f32 %v13066_v11, %v15138_v59  ;;  %v13068_v33 = vadd.f32 %v11955_v29, %v11785_v3  ;;  %v2316_v36 = vpop.f32.mrb[3].mxu0 }
 0x1cd   : > { %v2478_v48 = vadd.f32 %v13067_v13, %v15138_v59  ;;  %v13069_v49 = vadd.f32 %v2316_v36, %v1311_v4 }
 0x1ce   : > { %v2512_v51 = vmax.f32 %v2480_v30, 0.0  ;;  %v2481_v1 = vadd.f32 %v13068_v33, %v15138_v59 }
 0x1cf   : > { %v2510_v26 = vmax.f32 %v2478_v48, 0.0  ;;  %v2479_v9 = vadd.f32 %v13069_v49, %v15138_v59 }
 0x1d0   : > { %2545 = vst.msk [vmem:[#allocation2 + $0x48] sm:$0xff] %vm280_vm3, %v2512_v51  ;;  %v2513_v15 = vmax.f32 %v2481_v1, 0.0 }
 0x1d1   : > { %2543 = vst.msk [vmem:[#allocation2 + $0x28] sm:$0xff] %vm280_vm3, %v2510_v26  ;;  %v2511_v5 = vmax.f32 %v2479_v9, 0.0  ;;  %v11958_v16 = vpop.f32.mrb[4].mxu0 }
 0x1d2   : > { %2546 = vst.msk [vmem:[#allocation2 + $0x50] sm:$0xff] %vm280_vm3, %v2513_v15  ;;  %v13070_v22 = vadd.f32 %v11958_v16, %v11788_v6  ;;  %v2329_v23 = vpop.f32.mrb[5].mxu0 }
 0x1d3   : > { %2544 = vst.msk [vmem:[#allocation2 + $0x30] sm:$0xff] %vm280_vm3, %v2511_v5  ;;  %v13071_v58 = vadd.f32 %v2329_v23, %v1324_v7  ;;  %v11959_v25 = vpop.f32.mrb[6].mxu0 }
 0x1d4   : > { %v2484_v27 = vadd.f32 %v13070_v22, %v15138_v59  ;;  %v13072_v28 = vadd.f32 %v11959_v25, %v11789_v17  ;;  %v2332_v40 = vpop.f32.mrb[7].mxu0 }
 0x1d5   : > { %v2482_v41 = vadd.f32 %v13071_v58, %v15138_v59  ;;  %v13073_v42 = vadd.f32 %v2332_v40, %v1327_v18 }
 0x1d6   : > { %v2516_v45 = vmax.f32 %v2484_v27, 0.0  ;;  %v2485_v46 = vadd.f32 %v13072_v28, %v15138_v59 }
 0x1d7   : > { %v2514_v47 = vmax.f32 %v2482_v41, 0.0  ;;  %v2483_v61 = vadd.f32 %v13073_v42, %v15138_v59 }
 0x1d8   : > { %2549 = vst.msk [vmem:[#allocation2 + $0x88] sm:$0xff] %vm280_vm3, %v2516_v45  ;;  %v2517_v62 = vmax.f32 %v2485_v46, 0.0 }
 0x1d9   : > { %2547 = vst.msk [vmem:[#allocation2 + $0x68] sm:$0xff] %vm280_vm3, %v2514_v47  ;;  %v2515_v44 = vmax.f32 %v2483_v61, 0.0  ;;  %v11962_v60 = vpop.f32.mrb[8].mxu0 }
 0x1da   : > { %2550 = vst.msk [vmem:[#allocation2 + $0x90] sm:$0xff] %vm280_vm3, %v2517_v62  ;;  %v13074_v63 = vadd.f32 %v11962_v60, %v11792_v19  ;;  %v2345_v0 = vpop.f32.mrb[9].mxu0 }
 0x1db   : > { %2548 = vst.msk [vmem:[#allocation2 + $0x70] sm:$0xff] %vm280_vm3, %v2515_v44  ;;  %v13075_v2 = vadd.f32 %v2345_v0, %v1340_v20  ;;  %v11963_v14 = vpop.f32.mrb[10].mxu0 }
 0x1dc   : > { %v2488_v8 = vadd.f32 %v13074_v63, %v15138_v59  ;;  %v13076_v21 = vadd.f32 %v11963_v14, %v11793_v34  ;;  %v2348_v24 = vpop.f32.mrb[11].mxu0 }
 0x1dd   : > { %v2486_v31 = vadd.f32 %v13075_v2, %v15138_v59  ;;  %v13077_v32 = vadd.f32 %v2348_v24, %v1343_v35 }
 0x1de   : > { %v2520_v37 = vmax.f32 %v2488_v8, 0.0  ;;  %v2489_v38 = vadd.f32 %v13076_v21, %v15138_v59 }
 0x1df   : > { %v2518_v43 = vmax.f32 %v2486_v31, 0.0  ;;  %v2487_v53 = vadd.f32 %v13077_v32, %v15138_v59 }
 0x1e0   : > { %2553 = vst.msk [vmem:[#allocation2 + $0xc8] sm:$0xff] %vm280_vm3, %v2520_v37  ;;  %v2521_v55 = vmax.f32 %v2489_v38, 0.0 }
 0x1e1   : > { %2551 = vst.msk [vmem:[#allocation2 + $0xa8] sm:$0xff] %vm280_vm3, %v2518_v43  ;;  %v2519_v56 = vmax.f32 %v2487_v53, 0.0  ;;  %v11966_v57 = vpop.f32.mrb[12].mxu0 }
 0x1e2   : > { %2554 = vst.msk [vmem:[#allocation2 + $0xd0] sm:$0xff] %vm280_vm3, %v2521_v55  ;;  %v13078_v3 = vadd.f32 %v11966_v57, %v15127_v39  ;;  %v2361_v4 = vpop.f32.mrb[13].mxu0 }
 0x1e3   : > { %2552 = vst.msk [vmem:[#allocation2 + $0xb0] sm:$0xff] %vm280_vm3, %v2519_v56  ;;  %v13079_v6 = vadd.f32 %v2361_v4, %v15129_v50  ;;  %v11967_v7 = vpop.f32.mrb[14].mxu0 }
 0x1e4   : > { %v2492_v17 = vadd.f32 %v13078_v3, %v15138_v59  ;;  %v13080_v18 = vadd.f32 %v11967_v7, %v15131_v52  ;;  %v2364_v19 = vpop.f32.mrb[15].mxu0 }
 0x1e5   : > { %v2490_v20 = vadd.f32 %v13079_v6, %v15138_v59  ;;  %v13081_v34 = vadd.f32 %v2364_v19, %v15133_v54 }
 0x1e6   : > { %v2524_v35 = vmax.f32 %v2492_v17, 0.0  ;;  %v2493_v10 = vadd.f32 %v13080_v18, %v15138_v59 }
 0x1e7   : > { %v2522_v11 = vmax.f32 %v2490_v20, 0.0  ;;  %v2491_v39 = vadd.f32 %v13081_v34, %v15138_v59 }
 0x1e8   : > { %2557 = vst.msk [vmem:[#allocation2 + $0x108] sm:$0xff] %vm280_vm3, %v2524_v35  ;;  %v2525_v12 = vmax.f32 %v2493_v10, 0.0  ;;  %v11834_v50 = vpop.f32.mrb[16].mxu1 }
 0x1e9   : > { %2555 = vst.msk [vmem:[#allocation2 + $0xe8] sm:$0xff] %vm280_vm3, %v2522_v11  ;;  %v2523_v13 = vmax.f32 %v2491_v39, 0.0  ;;  %v11970_v29 = vpop.f32.mrb[16].mxu0  ;;  %v1573_v52 = vpop.f32.mrb[17].mxu1 }
 0x1ea   : > { %2558 = vst.msk [vmem:[#allocation2 + $0x110] sm:$0xff] %vm280_vm3, %v2525_v12  ;;  %v13082_v30 = vadd.f32 %v11970_v29, %v11834_v50  ;;  %v2377_v33 = vpop.f32.mrb[17].mxu0  ;;  %v11835_v54 = vpop.f32.mrb[18].mxu1 }
 0x1eb   : > { %2556 = vst.msk [vmem:[#allocation2 + $0xf0] sm:$0xff] %vm280_vm3, %v2523_v13  ;;  %v13083_v36 = vadd.f32 %v2377_v33, %v1573_v52  ;;  %v11971_v48 = vpop.f32.mrb[18].mxu0  ;;  %v1576_v49 = vpop.f32.mrb[19].mxu1 }
 0x1ec   : > { %v2496_v51 = vadd.f32 %v13082_v30, %v15138_v59  ;;  %v13084_v1 = vadd.f32 %v11971_v48, %v11835_v54  ;;  %v2380_v26 = vpop.f32.mrb[19].mxu0 }
 0x1ed   : > { %v2494_v9 = vadd.f32 %v13083_v36, %v15138_v59  ;;  %v13085_v15 = vadd.f32 %v2380_v26, %v1576_v49 }
 0x1ee   : > { %v2528_v5 = vmax.f32 %v2496_v51, 0.0  ;;  %v2497_v16 = vadd.f32 %v13084_v1, %v15138_v59 }
 0x1ef   : > { %v2526_v22 = vmax.f32 %v2494_v9, 0.0  ;;  %v2495_v23 = vadd.f32 %v13085_v15, %v15138_v59 }
 0x1f0   : > { %2561 = vst.msk [vmem:[#allocation2 + $0x148] sm:$0xff] %vm280_vm3, %v2528_v5  ;;  %v2529_v58 = vmax.f32 %v2497_v16, 0.0  ;;  %v11838_v25 = vpop.f32.mrb[20].mxu1 }
 0x1f1   : > { %2559 = vst.msk [vmem:[#allocation2 + $0x128] sm:$0xff] %vm280_vm3, %v2526_v22  ;;  %v2527_v27 = vmax.f32 %v2495_v23, 0.0  ;;  %v11974_v28 = vpop.f32.mrb[20].mxu0  ;;  %v1589_v40 = vpop.f32.mrb[21].mxu1 }
 0x1f2   : > { %2562 = vst.msk [vmem:[#allocation2 + $0x150] sm:$0xff] %vm280_vm3, %v2529_v58  ;;  %v13086_v41 = vadd.f32 %v11974_v28, %v11838_v25  ;;  %v2393_v42 = vpop.f32.mrb[21].mxu0  ;;  %v11839_v45 = vpop.f32.mrb[22].mxu1 }
 0x1f3   : > { %2560 = vst.msk [vmem:[#allocation2 + $0x130] sm:$0xff] %vm280_vm3, %v2527_v27  ;;  %v13087_v46 = vadd.f32 %v2393_v42, %v1589_v40  ;;  %v11975_v47 = vpop.f32.mrb[22].mxu0  ;;  %v1592_v61 = vpop.f32.mrb[23].mxu1 }
 0x1f4   : > { %v2500_v62 = vadd.f32 %v13086_v41, %v15138_v59  ;;  %v13088_v44 = vadd.f32 %v11975_v47, %v11839_v45  ;;  %v2396_v60 = vpop.f32.mrb[23].mxu0 }
 0x1f5   : > { %v2498_v63 = vadd.f32 %v13087_v46, %v15138_v59  ;;  %v13089_v0 = vadd.f32 %v2396_v60, %v1592_v61 }
 0x1f6   : > { %v2532_v2 = vmax.f32 %v2500_v62, 0.0  ;;  %v2501_v14 = vadd.f32 %v13088_v44, %v15138_v59 }
 0x1f7   : > { %v2530_v8 = vmax.f32 %v2498_v63, 0.0  ;;  %v2499_v21 = vadd.f32 %v13089_v0, %v15138_v59 }
 0x1f8   : > { %2565 = vst.msk [vmem:[#allocation2 + $0x188] sm:$0xff] %vm280_vm3, %v2532_v2  ;;  %v2533_v24 = vmax.f32 %v2501_v14, 0.0  ;;  %v11842_v31 = vpop.f32.mrb[24].mxu1 }
 0x1f9   : > { %2563 = vst.msk [vmem:[#allocation2 + $0x168] sm:$0xff] %vm280_vm3, %v2530_v8  ;;  %v2531_v32 = vmax.f32 %v2499_v21, 0.0  ;;  %v11978_v37 = vpop.f32.mrb[24].mxu0  ;;  %v1605_v38 = vpop.f32.mrb[25].mxu1 }
 0x1fa   : > { %2566 = vst.msk [vmem:[#allocation2 + $0x190] sm:$0xff] %vm280_vm3, %v2533_v24  ;;  %v13090_v43 = vadd.f32 %v11978_v37, %v11842_v31  ;;  %v2409_v53 = vpop.f32.mrb[25].mxu0  ;;  %v11843_v55 = vpop.f32.mrb[26].mxu1 }
 0x1fb   : > { %2564 = vst.msk [vmem:[#allocation2 + $0x170] sm:$0xff] %vm280_vm3, %v2531_v32  ;;  %v13091_v56 = vadd.f32 %v2409_v53, %v1605_v38  ;;  %v11979_v57 = vpop.f32.mrb[26].mxu0  ;;  %v1608_v3 = vpop.f32.mrb[27].mxu1 }
 0x1fc   : > { %v2504_v4 = vadd.f32 %v13090_v43, %v15138_v59  ;;  %v13092_v6 = vadd.f32 %v11979_v57, %v11843_v55  ;;  %v2412_v7 = vpop.f32.mrb[27].mxu0 }
 0x1fd   : > { %v2502_v17 = vadd.f32 %v13091_v56, %v15138_v59  ;;  %v13093_v18 = vadd.f32 %v2412_v7, %v1608_v3 }
 0x1fe   : > { %v2536_v19 = vmax.f32 %v2504_v4, 0.0  ;;  %v2505_v20 = vadd.f32 %v13092_v6, %v15138_v59 }
 0x1ff   : > { %v2534_v34 = vmax.f32 %v2502_v17, 0.0  ;;  %v2503_v35 = vadd.f32 %v13093_v18, %v15138_v59 }
 0x200   : > { %2569 = vst.msk [vmem:[#allocation2 + $0x1c8] sm:$0xff] %vm280_vm3, %v2536_v19  ;;  %v2537_v10 = vmax.f32 %v2505_v20, 0.0  ;;  %v11846_v11 = vpop.f32.mrb[28].mxu1 }
 0x201   : > { %2567 = vst.msk [vmem:[#allocation2 + $0x1a8] sm:$0xff] %vm280_vm3, %v2534_v34  ;;  %v2535_v39 = vmax.f32 %v2503_v35, 0.0  ;;  %v11982_v12 = vpop.f32.mrb[28].mxu0  ;;  %v1621_v50 = vpop.f32.mrb[29].mxu1 }
 0x202   : > { %2570 = vst.msk [vmem:[#allocation2 + $0x1d0] sm:$0xff] %vm280_vm3, %v2537_v10  ;;  %v13094_v13 = vadd.f32 %v11982_v12, %v11846_v11  ;;  %v2425_v29 = vpop.f32.mrb[29].mxu0  ;;  %v11847_v52 = vpop.f32.mrb[30].mxu1 }
 0x203   : > { %2568 = vst.msk [vmem:[#allocation2 + $0x1b0] sm:$0xff] %vm280_vm3, %v2535_v39  ;;  %v13095_v30 = vadd.f32 %v2425_v29, %v1621_v50  ;;  %v11983_v33 = vpop.f32.mrb[30].mxu0  ;;  %v1624_v54 = vpop.f32.mrb[31].mxu1 }
 0x204   : > { %v2508_v36 = vadd.f32 %v13094_v13, %v15138_v59  ;;  %v13096_v48 = vadd.f32 %v11983_v33, %v11847_v52  ;;  %v2428_v49 = vpop.f32.mrb[31].mxu0 }
 0x205   : > { %v2506_v51 = vadd.f32 %v13095_v30, %v15138_v59  ;;  %v13097_v1 = vadd.f32 %v2428_v49, %v1624_v54 }
 0x206   : > { %v2540_v26 = vmax.f32 %v2508_v36, 0.0  ;;  %v2509_v9 = vadd.f32 %v13096_v48, %v15138_v59 }
 0x207   : > { %v2538_v15 = vmax.f32 %v2506_v51, 0.0  ;;  %v2507_v5 = vadd.f32 %v13097_v1, %v15138_v59 }
 0x208   : > { %2573 = vst.msk [vmem:[#allocation2 + $0x208] sm:$0xff] %vm280_vm3, %v2540_v26  ;;  %v2541_v16 = vmax.f32 %v2509_v9, 0.0 }
 0x209   : > { %2571 = vst.msk [vmem:[#allocation2 + $0x1e8] sm:$0xff] %vm280_vm3, %v2538_v15  ;;  %v2539_v22 = vmax.f32 %v2507_v5, 0.0 }
 0x20a   : > { %2574 = vst.msk [vmem:[#allocation2 + $0x210] sm:$0xff] %vm280_vm3, %v2541_v16 }
 0x20b   : > { %2572 = vst.msk [vmem:[#allocation2 + $0x1f0] sm:$0xff] %vm280_vm3, %v2539_v22 }
 0x20c LB: >> { %v2636_v23 = vld [vmem:[#allocation2 + $0x8] sm:$0xff]  ;;  %v2637_v59 = vld [vmem:[#allocation2 + $0x10] sm:$0xff]  ;;  %s10984_s10 = smul.u32 576, %s14239_s9  ;;  %s10167_s14 = sshll.u32 %s14239_s9, 1  ;;  %s14239_s9 = sphi %s15208_s9, %s2580_s9  }
 0x20d   : >> { %v2672_v58 = vpack.c.bf16 %v2637_v59, %v2636_v23  ;;  %v2638_v41 = vld [vmem:[#allocation2 + $0x28] sm:$0xff]  ;;  %v2639_v42 = vld [vmem:[#allocation2 + $0x30] sm:$0xff]  ;;  %s15643_s19 = scalar_lea.vmem %s16866_s4, %s10167_s14  ;;  %s2580_s9 = sadd.s32 1, %s14239_s9  }
 0x20e   : >> { %s15218_s13 = scalar_lea.vmem %s16865_s3, %s10984_s10  ;;  %v2640_v46 = vld [vmem:[#allocation2 + $0x48] sm:$0xff]  ;;  %v2641_v47 = vld [vmem:[#allocation2 + $0x50] sm:$0xff]  ;;  %v15225_v61 = vpack.c.bf16 %v2639_v42, %v2638_v41  ;;  %p2577_p4 = scmp.ge.s32.totalorder %s2580_s9, 9  }
 0x20f   : >> { %11992 = vmatprep.mubr.msk.bf16.mxu0 %vm280_vm3, %v2672_v58  ;;  %v14117_v25 = vld [vmem:[%s15218_s13 + $0x20] sm:$0xff]   ;;  %v14118_v27 = vld [vmem:[%s15218_s13 + $0x28] sm:$0xff]   ;;  %v14119_v28 = vld [vmem:[%s15218_s13 + $0x30] sm:$0xff]   ;;  %v15227_v62 = vpack.c.bf16 %v2641_v47, %v2640_v46 }
 0x210   : >> { %11984 = vmatprep.subr.bf16.mxu0 %v14117_v25  ;;  %v14120_v40 = vld [vmem:[%s15218_s13 + $0x38] sm:$0xff]   ;;  %v14121_v45 = vld [vmem:[%s15218_s13] sm:$0xff]   ;;  %v14122_v44 = vld [vmem:[%s15218_s13 + $0x8] sm:$0xff]  }
 0x211   : >> { %11985 = vmatpush3.bf16.msra.mxu0 %v14117_v25  ;;  %v2642_v60 = vld [vmem:[#allocation2 + $0x68] sm:$0xff]  ;;  %v2643_v63 = vld [vmem:[#allocation2 + $0x70] sm:$0xff]  ;;  %v14124_v24 = vld [vmem:[%s15218_s13 + $0x18] sm:$0xff]  }
 0x212   : >> { %11986 = vmatprep.subr.bf16.mxu0 %v14118_v27  ;;  %v2644_v0 = vld [vmem:[#allocation2 + $0x88] sm:$0xff]  ;;  %v2645_v2 = vld [vmem:[#allocation2 + $0x90] sm:$0xff]  ;;  %v15235_v8 = vpack.c.bf16 %v2643_v63, %v2642_v60  ;;  %v14125_v43 = vld [vmem:[%s15218_s13 + $0x40] sm:$0xff]  }
 0x213   : >> { %v14123_v14 = vld [vmem:[%s15218_s13 + $0x10] sm:$0xff]   ;;  %v15237_v21 = vpack.c.bf16 %v2645_v2, %v2644_v0  ;;  %v2646_v31 = vld [vmem:[#allocation2 + $0xa8] sm:$0xff]  ;;  %v14128_v46 = vld [vmem:[%s15218_s13 + $0x58] sm:$0xff]  }
 0x214   : >> { %v2647_v32 = vld [vmem:[#allocation2 + $0xb0] sm:$0xff]  ;;  %v2648_v37 = vld [vmem:[#allocation2 + $0xc8] sm:$0xff]  ;;  %v14129_v0 = vld [vmem:[%s15218_s13 + $0x60] sm:$0xff]  }
 0x215   : >> { %11987 = vmatpush3.bf16.msra.mxu0 %v14118_v27  ;;  %v2649_v38 = vld [vmem:[#allocation2 + $0xd0] sm:$0xff]  ;;  %v15245_v53 = vpack.c.bf16 %v2647_v32, %v2646_v31  ;;  %v2650_v56 = vld [vmem:[#allocation2 + $0xe8] sm:$0xff] }
 0x216   : >> { %11988 = vmatprep.subr.bf16.mxu0 %v14119_v28  ;;  %v15247_v55 = vpack.c.bf16 %v2649_v38, %v2648_v37  ;;  %v2651_v57 = vld [vmem:[#allocation2 + $0xf0] sm:$0xff]  ;;  %v2652_v3 = vld [vmem:[#allocation2 + $0x108] sm:$0xff] }
 0x217   : >> { %v2653_v4 = vld [vmem:[#allocation2 + $0x110] sm:$0xff]  ;;  %v15253_v6 = vpack.c.bf16 %v2651_v57, %v2650_v56  ;;  %v2654_v17 = vld [vmem:[#allocation2 + $0x128] sm:$0xff] }
 0x218   : >> { %v15255_v7 = vpack.c.bf16 %v2653_v4, %v2652_v3  ;;  %v2655_v18 = vld [vmem:[#allocation2 + $0x130] sm:$0xff]  ;;  %v2656_v19 = vld [vmem:[#allocation2 + $0x148] sm:$0xff] }
 0x219   : >> { %11989 = vmatpush3.bf16.msra.mxu0 %v14119_v28  ;;  %v2657_v20 = vld [vmem:[#allocation2 + $0x150] sm:$0xff]  ;;  %v15261_v34 = vpack.c.bf16 %v2655_v18, %v2654_v17  ;;  %v2658_v10 = vld [vmem:[#allocation2 + $0x168] sm:$0xff] }
 0x21a   : >> { %11990 = vmatprep.subr.bf16.mxu0 %v14120_v40  ;;  %v15263_v35 = vpack.c.bf16 %v2657_v20, %v2656_v19  ;;  %v2659_v11 = vld [vmem:[#allocation2 + $0x170] sm:$0xff]  ;;  %v2660_v39 = vld [vmem:[#allocation2 + $0x188] sm:$0xff] }
 0x21b   : >> { %v2661_v12 = vld [vmem:[#allocation2 + $0x190] sm:$0xff]  ;;  %v15269_v50 = vpack.c.bf16 %v2659_v11, %v2658_v10  ;;  %v2662_v29 = vld [vmem:[#allocation2 + $0x1a8] sm:$0xff] }
 0x21c   : >> { %v15271_v13 = vpack.c.bf16 %v2661_v12, %v2660_v39  ;;  %v2663_v52 = vld [vmem:[#allocation2 + $0x1b0] sm:$0xff]  ;;  %v2664_v30 = vld [vmem:[#allocation2 + $0x1c8] sm:$0xff] }
 0x21d   : >> { %11991 = vmatpush3.bf16.msra.mxu0 %v14120_v40  ;;  %v2665_v33 = vld [vmem:[#allocation2 + $0x1d0] sm:$0xff]  ;;  %v15277_v54 = vpack.c.bf16 %v2663_v52, %v2662_v29  ;;  %v2666_v48 = vld [vmem:[#allocation2 + $0x1e8] sm:$0xff] }
 0x21e   : >> { %12024 = vmatprep.subr.bf16.mxu0 %v14121_v45  ;;  %v15279_v36 = vpack.c.bf16 %v2665_v33, %v2664_v30  ;;  %v2667_v49 = vld [vmem:[#allocation2 + $0x1f0] sm:$0xff]  ;;  %v2582_v51 = vld [vmem:[#allocation2 + $0x7] sm:$0xff] }
 0x21f   : >> { %v2583_v1 = vld [vmem:[#allocation2 + $0xf] sm:$0xff]  ;;  %v15285_v26 = vpack.c.bf16 %v2667_v49, %v2666_v48  ;;  %v2584_v15 = vld [vmem:[#allocation2 + $0x27] sm:$0xff] }
 0x220   : >> { %11993 = vmatmul.mubr.msk.bf16.vlgmr.msra.gmra.mrb[0].mxu0 %vm280_vm3, %v15225_v61  ;;  %v2618_v9 = vpack.c.bf16 %v2583_v1, %v2582_v51  ;;  %v2585_v5 = vld [vmem:[#allocation2 + $0x2f] sm:$0xff]  ;;  %v2586_v16 = vld [vmem:[#allocation2 + $0x47] sm:$0xff] }
 0x221   : >> { %12025 = vmatpush3.bf16.msra.mxu0 %v14121_v45  ;;  %11996 = vmatprep.mubr.msk.bf16.mxu0 %vm280_vm3, %v15227_v62  ;;  %v2587_v22 = vld [vmem:[#allocation2 + $0x4f] sm:$0xff]  ;;  %v15290_v23 = vpack.c.bf16 %v2585_v5, %v2584_v15  ;;  %v2588_v25 = vld [vmem:[#allocation2 + $0x67] sm:$0xff] }
 0x222   : >> { %12026 = vmatprep.subr.bf16.mxu0 %v14122_v44  ;;  %v15292_v59 = vpack.c.bf16 %v2587_v22, %v2586_v16  ;;  %v14126_v58 = vld [vmem:[%s15218_s13 + $0x48] sm:$0xff]   ;;  %v14127_v41 = vld [vmem:[%s15218_s13 + $0x50] sm:$0xff]  }
 0x223   : >> { %v2589_v27 = vld [vmem:[#allocation2 + $0x6f] sm:$0xff]  ;;  %v2590_v28 = vld [vmem:[#allocation2 + $0x87] sm:$0xff] }
 0x224   : >> { %v2591_v40 = vld [vmem:[#allocation2 + $0x8f] sm:$0xff]  ;;  %v15300_v42 = vpack.c.bf16 %v2589_v27, %v2588_v25  ;;  %v2592_v47 = vld [vmem:[#allocation2 + $0xa7] sm:$0xff] }
 0x225   : >> { %12027 = vmatpush3.bf16.msra.mxu0 %v14122_v44  ;;  %v15302_v45 = vpack.c.bf16 %v2591_v40, %v2590_v28  ;;  %v2593_v44 = vld [vmem:[#allocation2 + $0xaf] sm:$0xff]  ;;  %v2594_v60 = vld [vmem:[#allocation2 + $0xc7] sm:$0xff] }
 0x226   : >> { %12028 = vmatprep.subr.bf16.mxu0 %v14123_v14  ;;  %v2595_v63 = vld [vmem:[#allocation2 + $0xcf] sm:$0xff]  ;;  %v15310_v2 = vpack.c.bf16 %v2593_v44, %v2592_v47  ;;  %v2598_v32 = vld [vmem:[#allocation2 + $0x107] sm:$0xff] }
 0x227   : >> { %v2597_v31 = vld [vmem:[#allocation2 + $0xef] sm:$0xff]  ;;  %v2600_v56 = vld [vmem:[#allocation2 + $0x127] sm:$0xff] }
 0x228   : >> { %11997 = vmatmul.mubr.msk.bf16.gmra.mrb[4].mxu0 %vm280_vm3, %v15235_v8  ;;  %v2599_v37 = vld [vmem:[#allocation2 + $0x10f] sm:$0xff]  ;;  %v2602_v3 = vld [vmem:[#allocation2 + $0x147] sm:$0xff] }
 0x229   : >> { %12000 = vmatprep.mubr.msk.bf16.mxu0 %vm280_vm3, %v15237_v21  ;;  %12029 = vmatpush3.bf16.msra.mxu0 %v14123_v14  ;;  %v15312_v14 = vpack.c.bf16 %v2595_v63, %v2594_v60  ;;  %v2601_v57 = vld [vmem:[#allocation2 + $0x12f] sm:$0xff]  ;;  %v2604_v19 = vld [vmem:[#allocation2 + $0x167] sm:$0xff] }
 0x22a   : >> { %12030 = vmatprep.subr.bf16.mxu0 %v14124_v24  ;;  %v2603_v4 = vld [vmem:[#allocation2 + $0x14f] sm:$0xff]  ;;  %v15326_v17 = vpack.c.bf16 %v2601_v57, %v2600_v56  ;;  %v2606_v10 = vld [vmem:[#allocation2 + $0x187] sm:$0xff] }
 0x22b   : >> { %v15328_v18 = vpack.c.bf16 %v2603_v4, %v2602_v3  ;;  %v2605_v20 = vld [vmem:[#allocation2 + $0x16f] sm:$0xff]  ;;  %v2608_v29 = vld [vmem:[#allocation2 + $0x1a7] sm:$0xff] }
 0x22c   : >> { %v2607_v11 = vld [vmem:[#allocation2 + $0x18f] sm:$0xff]  ;;  %v15334_v39 = vpack.c.bf16 %v2605_v20, %v2604_v19  ;;  %v2610_v30 = vld [vmem:[#allocation2 + $0x1c7] sm:$0xff] }
 0x22d   : >> { %12031 = vmatpush3.bf16.msra.mxu0 %v14124_v24  ;;  %v2596_v24 = vld [vmem:[#allocation2 + $0xe7] sm:$0xff]  ;;  %v15336_v12 = vpack.c.bf16 %v2607_v11, %v2606_v10  ;;  %v2609_v52 = vld [vmem:[#allocation2 + $0x1af] sm:$0xff] }
 0x22e   : >> { %12064 = vmatprep.subr.bf16.mxu0 %v14125_v43  ;;  %v15318_v38 = vpack.c.bf16 %v2597_v31, %v2596_v24  ;;  %v2611_v33 = vld [vmem:[#allocation2 + $0x1cf] sm:$0xff]  ;;  %v15342_v48 = vpack.c.bf16 %v2609_v52, %v2608_v29  ;;  %v2612_v51 = vld [vmem:[#allocation2 + $0x1e7] sm:$0xff] }
 0x22f   : >> { %v15344_v49 = vpack.c.bf16 %v2611_v33, %v2610_v30  ;;  %v2613_v1 = vld [vmem:[#allocation2 + $0x1ef] sm:$0xff]  ;;  %v14133_v3 = vld [vmem:[%s15218_s13 + $0x80] sm:$0xff]  }
 0x230   : >> { %12001 = vmatmul.mubr.msk.bf16.gmra.mrb[8].mxu0 %vm280_vm3, %v15245_v53  ;;  %v2691_v15 = vld [vmem:[#allocation2 + $0x11] sm:$0xff]  ;;  %v15350_v5 = vpack.c.bf16 %v2613_v1, %v2612_v51  ;;  %v2692_v22 = vld [vmem:[#allocation2 + $0x29] sm:$0xff] }
 0x231   : >> { %12004 = vmatprep.mubr.msk.bf16.mxu0 %vm280_vm3, %v15247_v55  ;;  %v2694_v25 = vld [vmem:[#allocation2 + $0x49] sm:$0xff]  ;;  %v2695_v27 = vld [vmem:[#allocation2 + $0x51] sm:$0xff] }
 0x232   : >> { %v15357_v40 = vpack.c.bf16 %v2695_v27, %v2694_v25  ;;  %v2697_v47 = vld [vmem:[#allocation2 + $0x71] sm:$0xff]  ;;  %v2698_v44 = vld [vmem:[#allocation2 + $0x89] sm:$0xff] }
 0x233   : >> { %v2699_v60 = vld [vmem:[#allocation2 + $0x91] sm:$0xff]  ;;  %v2702_v56 = vld [vmem:[#allocation2 + $0xc9] sm:$0xff] }
 0x234   : >> { %v14131_v63 = vld [vmem:[%s15218_s13 + $0x70] sm:$0xff]   ;;  %v15367_v31 = vpack.c.bf16 %v2699_v60, %v2698_v44 }
 0x235   : >> { %v2703_v57 = vld [vmem:[#allocation2 + $0xd1] sm:$0xff]  ;;  %v2704_v20 = vld [vmem:[#allocation2 + $0xe9] sm:$0xff] }
 0x236   : >> { %v15377_v19 = vpack.c.bf16 %v2703_v57, %v2702_v56  ;;  %v2705_v10 = vld [vmem:[#allocation2 + $0xf1] sm:$0xff]  ;;  %v2706_v11 = vld [vmem:[#allocation2 + $0x109] sm:$0xff] }
 0x237   : >> { %v2707_v29 = vld [vmem:[#allocation2 + $0x111] sm:$0xff]  ;;  %v15383_v52 = vpack.c.bf16 %v2705_v10, %v2704_v20  ;;  %v2708_v33 = vld [vmem:[#allocation2 + $0x129] sm:$0xff] }
 0x238   : >> { %12005 = vmatmul.mubr.msk.bf16.gmra.mrb[12].mxu0 %vm280_vm3, %v15253_v6  ;;  %v15385_v30 = vpack.c.bf16 %v2707_v29, %v2706_v11  ;;  %v2709_v51 = vld [vmem:[#allocation2 + $0x131] sm:$0xff]  ;;  %v2710_v1 = vld [vmem:[#allocation2 + $0x149] sm:$0xff] }
 0x239   : >> { %12008 = vmatprep.mubr.msk.bf16.mxu0 %vm280_vm3, %v15255_v7  ;;  %v2714_v25 = vld [vmem:[#allocation2 + $0x189] sm:$0xff]  ;;  %v2715_v27 = vld [vmem:[#allocation2 + $0x191] sm:$0xff] }
 0x23a   : >> { %v2717_v44 = vld [vmem:[#allocation2 + $0x1b1] sm:$0xff]  ;;  %v2718_v60 = vld [vmem:[#allocation2 + $0x1c9] sm:$0xff] }
 0x23b   : >> { %v2721_v56 = vld [vmem:[#allocation2 + $0x1f1] sm:$0xff]  ;;  %v14134_v20 = vld [vmem:[%s15218_s13 + $0x88] sm:$0xff]  }
 0x23c   : >> { %v14135_v10 = vld [vmem:[%s15218_s13 + $0x90] sm:$0xff]   ;;  %v14136_v11 = vld [vmem:[%s15218_s13 + $0x98] sm:$0xff]  }
 0x23d   : >> { %v2615_v29 = vld [vmem:[#allocation2 + $0x20f] sm:$0xff] }
 0x240   : >> { %12009 = vmatmul.mubr.msk.bf16.gmra.mrb[16].mxu0 %vm280_vm3, %v15261_v34 }
 0x241   : >> { %12012 = vmatprep.mubr.msk.bf16.mxu0 %vm280_vm3, %v15263_v35 }
 0x248   : >> { %12013 = vmatmul.mubr.msk.bf16.gmra.mrb[20].mxu0 %vm280_vm3, %v15269_v50 }
 0x249   : >> { %12016 = vmatprep.mubr.msk.bf16.mxu0 %vm280_vm3, %v15271_v13 }
 0x250   : >> { %12017 = vmatmul.mubr.msk.bf16.gmra.mrb[24].mxu0 %vm280_vm3, %v15277_v54 }
 0x251   : >> { %12020 = vmatprep.mubr.msk.bf16.mxu0 %vm280_vm3, %v15279_v36 }
 0x258   : >> { %12021 = vmatmul.mubr.msk.bf16.gmra.mrb[28].mxu0 %vm280_vm3, %v15285_v26 }
 0x259   : >> { %12032 = vmatprep.mubr.msk.bf16.mxu0 %vm280_vm3, %v2618_v9  ;;  %v2690_v9 = vld [vmem:[#allocation2 + $0x9] sm:$0xff] }
 0x25a   : >> { %v2726_v16 = vpack.c.bf16 %v2691_v15, %v2690_v9  ;;  %v2711_v9 = vld [vmem:[#allocation2 + $0x151] sm:$0xff]  ;;  %v15391_v15 = vpack.c.bf16 %v2709_v51, %v2708_v33  ;;  %v14138_v51 = vld [vmem:[%s15218_s13 + $0xa8] sm:$0xff]  }
 0x260   : >> { %12033 = vmatmul.mubr.msk.bf16.vlgmr.msra.gmra.mrb[0].mxu0 %vm280_vm3, %v15290_v23 }
 0x261   : >> { %12065 = vmatpush3.bf16.msra.mxu0 %v14125_v43  ;;  %12036 = vmatprep.mubr.msk.bf16.mxu0 %vm280_vm3, %v15292_v59  ;;  %v15320_v43 = vpack.c.bf16 %v2599_v37, %v2598_v32  ;;  %v14132_v32 = vld [vmem:[%s15218_s13 + $0x78] sm:$0xff]  }
 0x262   : >> { %12066 = vmatprep.subr.bf16.mxu0 %v14126_v58  ;;  %v2701_v37 = vld [vmem:[#allocation2 + $0xb1] sm:$0xff] }
 0x265   : >> { %12067 = vmatpush3.bf16.msra.mxu0 %v14126_v58  ;;  %v2693_v58 = vld [vmem:[#allocation2 + $0x31] sm:$0xff] }
 0x266   : >> { %12068 = vmatprep.subr.bf16.mxu0 %v14127_v41  ;;  %v15355_v28 = vpack.c.bf16 %v2693_v58, %v2692_v22  ;;  %v2712_v22 = vld [vmem:[#allocation2 + $0x169] sm:$0xff]  ;;  %v2713_v58 = vld [vmem:[#allocation2 + $0x171] sm:$0xff] }
 0x268   : >> { %12037 = vmatmul.mubr.msk.bf16.gmra.mrb[4].mxu0 %vm280_vm3, %v15300_v42 }
 0x269   : >> { %12040 = vmatprep.mubr.msk.bf16.mxu0 %vm280_vm3, %v15302_v45  ;;  %12069 = vmatpush3.bf16.msra.mxu0 %v14127_v41  ;;  %v14130_v41 = vld [vmem:[%s15218_s13 + $0x68] sm:$0xff]  }
 0x26a   : >> { %12070 = vmatprep.subr.bf16.mxu0 %v14128_v46 }
 0x26d   : >> { %12071 = vmatpush3.bf16.msra.mxu0 %v14128_v46  ;;  %v2696_v46 = vld [vmem:[#allocation2 + $0x69] sm:$0xff] }
 0x26e   : >> { %12104 = vmatprep.subr.bf16.mxu0 %v14129_v0  ;;  %v15365_v24 = vpack.c.bf16 %v2697_v47, %v2696_v46  ;;  %v15401_v46 = vpack.c.bf16 %v2715_v27, %v2714_v25  ;;  %v2716_v47 = vld [vmem:[#allocation2 + $0x1a9] sm:$0xff] }
 0x26f   : >> { %v14142_v27 = vld [vmem:[%s15218_s13 + $0xc8] sm:$0xff]  }
 0x270   : >> { %12041 = vmatmul.mubr.msk.bf16.gmra.mrb[8].mxu0 %vm280_vm3, %v15310_v2 }
 0x271   : >> { %12044 = vmatprep.mubr.msk.bf16.mxu0 %vm280_vm3, %v15312_v14 }
 0x278   : >> { %12045 = vmatmul.mubr.msk.bf16.gmra.mrb[12].mxu0 %vm280_vm3, %v15318_v38 }
 0x279   : >> { %12048 = vmatprep.mubr.msk.bf16.mxu0 %vm280_vm3, %v15320_v43 }
 0x280   : >> { %12049 = vmatmul.mubr.msk.bf16.gmra.mrb[16].mxu0 %vm280_vm3, %v15326_v17 }
 0x281   : >> { %12052 = vmatprep.mubr.msk.bf16.mxu0 %vm280_vm3, %v15328_v18 }
 0x288   : >> { %12053 = vmatmul.mubr.msk.bf16.gmra.mrb[20].mxu0 %vm280_vm3, %v15334_v39 }
 0x289   : >> { %12056 = vmatprep.mubr.msk.bf16.mxu0 %vm280_vm3, %v15336_v12 }
 0x290   : >> { %12057 = vmatmul.mubr.msk.bf16.gmra.mrb[24].mxu0 %vm280_vm3, %v15342_v48 }
 0x291   : >> { %12060 = vmatprep.mubr.msk.bf16.mxu0 %vm280_vm3, %v15344_v49 }
 0x298   : >> { %12061 = vmatmul.mubr.msk.bf16.gmra.mrb[28].mxu0 %vm280_vm3, %v15350_v5 }
 0x299   : >> { %12072 = vmatprep.mubr.msk.bf16.mxu0 %vm280_vm3, %v2726_v16  ;;  %v15393_v16 = vpack.c.bf16 %v2711_v9, %v2710_v1  ;;  %v14139_v1 = vld [vmem:[%s15218_s13 + $0xb0] sm:$0xff]   ;;  %v14140_v9 = vld [vmem:[%s15218_s13 + $0xb8] sm:$0xff]  }
 0x2a0   : >> { %12073 = vmatmul.mubr.msk.bf16.vlgmr.msra.gmra.mrb[0].mxu0 %vm280_vm3, %v15355_v28 }
 0x2a1   : >> { %12105 = vmatpush3.bf16.msra.mxu0 %v14129_v0  ;;  %12076 = vmatprep.mubr.msk.bf16.mxu0 %vm280_vm3, %v15357_v40  ;;  %v2700_v0 = vld [vmem:[#allocation2 + $0xa9] sm:$0xff] }
 0x2a2   : >> { %12106 = vmatprep.subr.bf16.mxu0 %v14130_v41  ;;  %v15375_v4 = vpack.c.bf16 %v2701_v37, %v2700_v0  ;;  %v2720_v37 = vld [vmem:[#allocation2 + $0x1e9] sm:$0xff] }
 0x2a3   : >> { %v15415_v57 = vpack.c.bf16 %v2721_v56, %v2720_v37  ;;  %v14146_v56 = vld [vmem:[%s15218_s13 + $0xe8] sm:$0xff]  }
 0x2a5   : >> { %12107 = vmatpush3.bf16.msra.mxu0 %v14130_v41  ;;  %v15399_v41 = vpack.c.bf16 %v2713_v58, %v2712_v22  ;;  %v2668_v22 = vld [vmem:[#allocation2 + $0x208] sm:$0xff]  ;;  %v2669_v58 = vld [vmem:[#allocation2 + $0x210] sm:$0xff] }
 0x2a6   : >> { %12108 = vmatprep.subr.bf16.mxu0 %v14131_v63  ;;  %v15491_v25 = vpack.c.bf16 %v2669_v58, %v2668_v22  ;;  %v14158_v58 = vld [vmem:[%s15218_s13 + $0x128] sm:$0xff]  }
 0x2a8   : >> { %12077 = vmatmul.mubr.msk.bf16.gmra.mrb[4].mxu0 %vm280_vm3, %v15365_v24 }
 0x2a9   : >> { %12080 = vmatprep.mubr.msk.bf16.mxu0 %vm280_vm3, %v15367_v31  ;;  %12109 = vmatpush3.bf16.msra.mxu0 %v14131_v63  ;;  %v2719_v63 = vld [vmem:[#allocation2 + $0x1d1] sm:$0xff] }
 0x2aa   : >> { %12110 = vmatprep.subr.bf16.mxu0 %v14132_v32  ;;  %v15409_v0 = vpack.c.bf16 %v2719_v63, %v2718_v60  ;;  %v2722_v60 = vld [vmem:[#allocation2 + $0x209] sm:$0xff]  ;;  %v2723_v63 = vld [vmem:[#allocation2 + $0x211] sm:$0xff] }
 0x2ab   : >> { %v15529_v37 = vpack.c.bf16 %v2723_v63, %v2722_v60 }
 0x2ad   : >> { %12111 = vmatpush3.bf16.msra.mxu0 %v14132_v32  ;;  %v15407_v32 = vpack.c.bf16 %v2717_v44, %v2716_v47  ;;  %v14143_v47 = vld [vmem:[%s15218_s13 + $0xd0] sm:$0xff]   ;;  %v14144_v44 = vld [vmem:[%s15218_s13 + $0xd8] sm:$0xff]  }
 0x2ae   : >> { %12144 = vmatprep.subr.bf16.mxu0 %v14133_v3 }
 0x2b0   : >> { %12081 = vmatmul.mubr.msk.bf16.gmra.mrb[8].mxu0 %vm280_vm3, %v15375_v4 }
 0x2b1   : >> { %12084 = vmatprep.mubr.msk.bf16.mxu0 %vm280_vm3, %v15377_v19 }
 0x2b8   : >> { %12085 = vmatmul.mubr.msk.bf16.gmra.mrb[12].mxu0 %vm280_vm3, %v15383_v52 }
 0x2b9   : >> { %12088 = vmatprep.mubr.msk.bf16.mxu0 %vm280_vm3, %v15385_v30 }
 0x2c0   : >> { %12089 = vmatmul.mubr.msk.bf16.gmra.mrb[16].mxu0 %vm280_vm3, %v15391_v15 }
 0x2c1   : >> { %12092 = vmatprep.mubr.msk.bf16.mxu0 %vm280_vm3, %v15393_v16 }
 0x2c8   : >> { %12093 = vmatmul.mubr.msk.bf16.gmra.mrb[20].mxu0 %vm280_vm3, %v15399_v41 }
 0x2c9   : >> { %12096 = vmatprep.mubr.msk.bf16.mxu0 %vm280_vm3, %v15401_v46 }
 0x2d0   : >> { %12097 = vmatmul.mubr.msk.bf16.gmra.mrb[24].mxu0 %vm280_vm3, %v15407_v32 }
 0x2d1   : >> { %12100 = vmatprep.mubr.msk.bf16.mxu0 %vm280_vm3, %v15409_v0 }
 0x2d8   : >> { %12101 = vmatmul.mubr.msk.bf16.gmra.mrb[28].mxu0 %vm280_vm3, %v15415_v57 }
 0x2d9   : >> { %12112 = vmatprep.mubr.msk.bf16.mxu0 %vm280_vm3, %v15290_v23  ;;  %v14137_v23 = vld [vmem:[%s15218_s13 + $0xa0] sm:$0xff]  }
 0x2e0   : >> { %12113 = vmatmul.mubr.msk.bf16.vlgmr.msra.gmra.mrb[0].mxu0 %vm280_vm3, %v15292_v59 }
 0x2e1   : >> { %12145 = vmatpush3.bf16.msra.mxu0 %v14133_v3  ;;  %12116 = vmatprep.mubr.msk.bf16.mxu0 %vm280_vm3, %v15300_v42  ;;  %v2614_v3 = vld [vmem:[#allocation2 + $0x207] sm:$0xff] }
 0x2e2   : >> { %12146 = vmatprep.subr.bf16.mxu0 %v14134_v20  ;;  %v15453_v33 = vpack.c.bf16 %v2615_v29, %v2614_v3 }
 0x2e5   : >> { %12147 = vmatpush3.bf16.msra.mxu0 %v14134_v20  ;;  %v14147_v20 = vld [vmem:[%s15218_s13 + $0xf0] sm:$0xff]  }
 0x2e6   : >> { %12148 = vmatprep.subr.bf16.mxu0 %v14135_v10 }
 0x2e8   : >> { %12117 = vmatmul.mubr.msk.bf16.gmra.mrb[4].mxu0 %vm280_vm3, %v15302_v45 }
 0x2e9   : >> { %12120 = vmatprep.mubr.msk.bf16.mxu0 %vm280_vm3, %v15310_v2  ;;  %12149 = vmatpush3.bf16.msra.mxu0 %v14135_v10  ;;  %v14148_v10 = vld [vmem:[%s15218_s13 + $0xf8] sm:$0xff]  }
 0x2ea   : >> { %12150 = vmatprep.subr.bf16.mxu0 %v14136_v11 }
 0x2ed   : >> { %12151 = vmatpush3.bf16.msra.mxu0 %v14136_v11 }
 0x2ee   : >> { %12184 = vmatprep.subr.bf16.mxu0 %v14137_v23 }
 0x2f0   : >> { %12121 = vmatmul.mubr.msk.bf16.gmra.mrb[8].mxu0 %vm280_vm3, %v15312_v14 }
 0x2f1   : >> { %12124 = vmatprep.mubr.msk.bf16.mxu0 %vm280_vm3, %v15318_v38 }
 0x2f8   : >> { %12125 = vmatmul.mubr.msk.bf16.gmra.mrb[12].mxu0 %vm280_vm3, %v15320_v43 }
 0x2f9   : >> { %12128 = vmatprep.mubr.msk.bf16.mxu0 %vm280_vm3, %v15326_v17 }
 0x300   : >> { %12129 = vmatmul.mubr.msk.bf16.gmra.mrb[16].mxu0 %vm280_vm3, %v15328_v18 }
 0x301   : >> { %12132 = vmatprep.mubr.msk.bf16.mxu0 %vm280_vm3, %v15334_v39 }
 0x308   : >> { %12133 = vmatmul.mubr.msk.bf16.gmra.mrb[20].mxu0 %vm280_vm3, %v15336_v12 }
 0x309   : >> { %12136 = vmatprep.mubr.msk.bf16.mxu0 %vm280_vm3, %v15342_v48 }
 0x310   : >> { %12137 = vmatmul.mubr.msk.bf16.gmra.mrb[24].mxu0 %vm280_vm3, %v15344_v49 }
 0x311   : >> { %12140 = vmatprep.mubr.msk.bf16.mxu0 %vm280_vm3, %v15350_v5 }
 0x318   : >> { %12141 = vmatmul.mubr.msk.bf16.gmra.mrb[28].mxu0 %vm280_vm3, %v15453_v33 }
 0x319   : >> { %12152 = vmatprep.mubr.msk.bf16.mxu0 %vm280_vm3, %v15225_v61  ;;  %v14141_v61 = vld [vmem:[%s15218_s13 + $0xc0] sm:$0xff]  }
 0x320   : >> { %12153 = vmatmul.mubr.msk.bf16.vlgmr.msra.gmra.mrb[0].mxu0 %vm280_vm3, %v15227_v62 }
 0x321   : >> { %12185 = vmatpush3.bf16.msra.mxu0 %v14137_v23  ;;  %12156 = vmatprep.mubr.msk.bf16.mxu0 %vm280_vm3, %v15235_v8 }
 0x322   : >> { %12186 = vmatprep.subr.bf16.mxu0 %v14138_v51 }
 0x325   : >> { %12187 = vmatpush3.bf16.msra.mxu0 %v14138_v51 }
 0x326   : >> { %12188 = vmatprep.subr.bf16.mxu0 %v14139_v1 }
 0x328   : >> { %12157 = vmatmul.mubr.msk.bf16.gmra.mrb[4].mxu0 %vm280_vm3, %v15237_v21 }
 0x329   : >> { %12160 = vmatprep.mubr.msk.bf16.mxu0 %vm280_vm3, %v15245_v53  ;;  %12189 = vmatpush3.bf16.msra.mxu0 %v14139_v1 }
 0x32a   : >> { %12190 = vmatprep.subr.bf16.mxu0 %v14140_v9 }
 0x32d   : >> { %12191 = vmatpush3.bf16.msra.mxu0 %v14140_v9 }
 0x32e   : >> { %12224 = vmatprep.subr.bf16.mxu0 %v14141_v61 }
 0x330   : >> { %12161 = vmatmul.mubr.msk.bf16.gmra.mrb[8].mxu0 %vm280_vm3, %v15247_v55 }
 0x331   : >> { %12164 = vmatprep.mubr.msk.bf16.mxu0 %vm280_vm3, %v15253_v6 }
 0x338   : >> { %12165 = vmatmul.mubr.msk.bf16.gmra.mrb[12].mxu0 %vm280_vm3, %v15255_v7 }
 0x339   : >> { %12168 = vmatprep.mubr.msk.bf16.mxu0 %vm280_vm3, %v15261_v34 }
 0x340   : >> { %12169 = vmatmul.mubr.msk.bf16.gmra.mrb[16].mxu0 %vm280_vm3, %v15263_v35 }
 0x341   : >> { %12172 = vmatprep.mubr.msk.bf16.mxu0 %vm280_vm3, %v15269_v50 }
 0x348   : >> { %12173 = vmatmul.mubr.msk.bf16.gmra.mrb[20].mxu0 %vm280_vm3, %v15271_v13 }
 0x349   : >> { %12176 = vmatprep.mubr.msk.bf16.mxu0 %vm280_vm3, %v15277_v54 }
 0x350   : >> { %12177 = vmatmul.mubr.msk.bf16.gmra.mrb[24].mxu0 %vm280_vm3, %v15279_v36 }
 0x351   : >> { %12180 = vmatprep.mubr.msk.bf16.mxu0 %vm280_vm3, %v15285_v26 }
 0x358   : >> { %12181 = vmatmul.mubr.msk.bf16.gmra.mrb[28].mxu0 %vm280_vm3, %v15491_v25 }
 0x359   : >> { %12192 = vmatprep.mubr.msk.bf16.mxu0 %vm280_vm3, %v15355_v28  ;;  %v14145_v28 = vld [vmem:[%s15218_s13 + $0xe0] sm:$0xff]  }
 0x360   : >> { %12193 = vmatmul.mubr.msk.bf16.vlgmr.msra.gmra.mrb[0].mxu0 %vm280_vm3, %v15357_v40 }
 0x361   : >> { %12225 = vmatpush3.bf16.msra.mxu0 %v14141_v61  ;;  %12196 = vmatprep.mubr.msk.bf16.mxu0 %vm280_vm3, %v15365_v24 }
 0x362   : >> { %12226 = vmatprep.subr.bf16.mxu0 %v14142_v27 }
 0x365   : >> { %12227 = vmatpush3.bf16.msra.mxu0 %v14142_v27 }
 0x366   : >> { %12228 = vmatprep.subr.bf16.mxu0 %v14143_v47 }
 0x368   : >> { %12197 = vmatmul.mubr.msk.bf16.gmra.mrb[4].mxu0 %vm280_vm3, %v15367_v31 }
 0x369   : >> { %12200 = vmatprep.mubr.msk.bf16.mxu0 %vm280_vm3, %v15375_v4  ;;  %12229 = vmatpush3.bf16.msra.mxu0 %v14143_v47 }
 0x36a   : >> { %12230 = vmatprep.subr.bf16.mxu0 %v14144_v44 }
 0x36d   : >> { %12231 = vmatpush3.bf16.msra.mxu0 %v14144_v44 }
 0x36e   : >> { %12264 = vmatprep.subr.bf16.mxu0 %v14145_v28 }
 0x370   : >> { %12201 = vmatmul.mubr.msk.bf16.gmra.mrb[8].mxu0 %vm280_vm3, %v15377_v19 }
 0x371   : >> { %12204 = vmatprep.mubr.msk.bf16.mxu0 %vm280_vm3, %v15383_v52 }
 0x378   : >> { %12205 = vmatmul.mubr.msk.bf16.gmra.mrb[12].mxu0 %vm280_vm3, %v15385_v30 }
 0x379   : >> { %12208 = vmatprep.mubr.msk.bf16.mxu0 %vm280_vm3, %v15391_v15 }
 0x380   : >> { %12209 = vmatmul.mubr.msk.bf16.gmra.mrb[16].mxu0 %vm280_vm3, %v15393_v16 }
 0x381   : >> { %12212 = vmatprep.mubr.msk.bf16.mxu0 %vm280_vm3, %v15399_v41 }
 0x388   : >> { %12213 = vmatmul.mubr.msk.bf16.gmra.mrb[20].mxu0 %vm280_vm3, %v15401_v46 }
 0x389   : >> { %12216 = vmatprep.mubr.msk.bf16.mxu0 %vm280_vm3, %v15407_v32 }
 0x390   : >> { %12217 = vmatmul.mubr.msk.bf16.gmra.mrb[24].mxu0 %vm280_vm3, %v15409_v0 }
 0x391   : >> { %12220 = vmatprep.mubr.msk.bf16.mxu0 %vm280_vm3, %v15415_v57 }
 0x398   : >> { %12221 = vmatmul.mubr.msk.bf16.gmra.mrb[28].mxu0 %vm280_vm3, %v15529_v37 }
 0x399   : >> { %12232 = vmatprep.mubr.msk.bf16.mxu0 %vm280_vm3, %v15292_v59  ;;  %v14149_v59 = vld [vmem:[%s15218_s13 + $0x100] sm:$0xff]  }
 0x3a0   : >> { %12233 = vmatmul.mubr.msk.bf16.vlgmr.msra.gmra.mrb[0].mxu0 %vm280_vm3, %v15300_v42  ;;  %v2616_v42 = vld [vmem:[#allocation2 + $0x227] sm:$0xff] }
 0x3a1   : >> { %12265 = vmatpush3.bf16.msra.mxu0 %v14145_v28  ;;  %12236 = vmatprep.mubr.msk.bf16.mxu0 %vm280_vm3, %v15302_v45  ;;  %v2617_v45 = vld [vmem:[#allocation2 + $0x22f] sm:$0xff] }
 0x3a2   : >> { %12266 = vmatprep.subr.bf16.mxu0 %v14146_v56 }
 0x3a5   : >> { %12267 = vmatpush3.bf16.msra.mxu0 %v14146_v56 }
 0x3a6   : >> { %12268 = vmatprep.subr.bf16.mxu0 %v14147_v20 }
 0x3a8   : >> { %12237 = vmatmul.mubr.msk.bf16.gmra.mrb[4].mxu0 %vm280_vm3, %v15310_v2  ;;  %v2635_v2 = vpack.c.bf16 %v2617_v45, %v2616_v42 }
 0x3a9   : >> { %12240 = vmatprep.mubr.msk.bf16.mxu0 %vm280_vm3, %v15312_v14  ;;  %12269 = vmatpush3.bf16.msra.mxu0 %v14147_v20  ;;  %v14150_v14 = vld [vmem:[%s15218_s13 + $0x108] sm:$0xff]  }
 0x3aa   : >> { %12270 = vmatprep.subr.bf16.mxu0 %v14148_v10 }
 0x3ad   : >> { %12271 = vmatpush3.bf16.msra.mxu0 %v14148_v10  ;;  %v14159_v10 = vld [vmem:[%s15218_s13 + $0x130] sm:$0xff]  }
 0x3ae   : >> { %12304 = vmatprep.subr.bf16.mxu0 %v14149_v59 }
 0x3b0   : >> { %12241 = vmatmul.mubr.msk.bf16.gmra.mrb[8].mxu0 %vm280_vm3, %v15318_v38  ;;  %v14151_v38 = vld [vmem:[%s15218_s13 + $0x110] sm:$0xff]  }
 0x3b1   : >> { %12244 = vmatprep.mubr.msk.bf16.mxu0 %vm280_vm3, %v15320_v43  ;;  %v14152_v43 = vld [vmem:[%s15218_s13 + $0x118] sm:$0xff]  }
 0x3b8   : >> { %12245 = vmatmul.mubr.msk.bf16.gmra.mrb[12].mxu0 %vm280_vm3, %v15326_v17  ;;  %v15646_v17 = vld [vmem:[%s15643_s19] ss:$0 sm:$0xff] }
 0x3b9   : >> { %12248 = vmatprep.mubr.msk.bf16.mxu0 %vm280_vm3, %v15328_v18 }
 0x3c0   : >> { %12249 = vmatmul.mubr.msk.bf16.gmra.mrb[16].mxu0 %vm280_vm3, %v15334_v39 }
 0x3c1   : >> { %12252 = vmatprep.mubr.msk.bf16.mxu0 %vm280_vm3, %v15336_v12 }
 0x3c8   : >> { %12253 = vmatmul.mubr.msk.bf16.gmra.mrb[20].mxu0 %vm280_vm3, %v15342_v48 }
 0x3c9   : >> { %12256 = vmatprep.mubr.msk.bf16.mxu0 %vm280_vm3, %v15344_v49 }
 0x3d0   : >> { %12257 = vmatmul.mubr.msk.bf16.gmra.mrb[24].mxu0 %vm280_vm3, %v15350_v5 }
 0x3d1   : >> { %12260 = vmatprep.mubr.msk.bf16.mxu0 %vm280_vm3, %v15453_v33 }
 0x3d8   : >> { %12261 = vmatmul.mubr.msk.bf16.gmra.mrb[28].mxu0 %vm280_vm3, %v2635_v2 }
 0x3d9   : >> { %12272 = vmatprep.mubr.msk.bf16.mxu0 %vm280_vm3, %v15227_v62  ;;  %v2670_v62 = vld [vmem:[#allocation2 + $0x228] sm:$0xff] }
 0x3e0   : >> { %12273 = vmatmul.mubr.msk.bf16.vlgmr.msra.gmra.mrb[0].mxu0 %vm280_vm3, %v15235_v8  ;;  %v2671_v8 = vld [vmem:[#allocation2 + $0x230] sm:$0xff] }
 0x3e1   : >> { %12305 = vmatpush3.bf16.msra.mxu0 %v14149_v59  ;;  %12276 = vmatprep.mubr.msk.bf16.mxu0 %vm280_vm3, %v15237_v21  ;;  %v2689_v21 = vpack.c.bf16 %v2671_v8, %v2670_v62  ;;  %v14160_v8 = vld [vmem:[%s15218_s13 + $0x138] sm:$0xff]  }
 0x3e2   : >> { %12306 = vmatprep.subr.bf16.mxu0 %v14150_v14 }
 0x3e5   : >> { %12307 = vmatpush3.bf16.msra.mxu0 %v14150_v14 }
 0x3e6   : >> { %12308 = vmatprep.subr.bf16.mxu0 %v14151_v38 }
 0x3e8   : >> { %12277 = vmatmul.mubr.msk.bf16.gmra.mrb[4].mxu0 %vm280_vm3, %v15245_v53  ;;  %v2724_v53 = vld [vmem:[#allocation2 + $0x229] sm:$0xff] }
 0x3e9   : >> { %12280 = vmatprep.mubr.msk.bf16.mxu0 %vm280_vm3, %v15247_v55  ;;  %12309 = vmatpush3.bf16.msra.mxu0 %v14151_v38  ;;  %v2725_v55 = vld [vmem:[#allocation2 + $0x231] sm:$0xff] }
 0x3ea   : >> { %12310 = vmatprep.subr.bf16.mxu0 %v14152_v43 }
 0x3ed   : >> { %12311 = vmatpush3.bf16.msra.mxu0 %v14152_v43 }
 0x3f0   : >> { %12281 = vmatmul.mubr.msk.bf16.gmra.mrb[8].mxu0 %vm280_vm3, %v15253_v6  ;;  %v2743_v6 = vpack.c.bf16 %v2725_v55, %v2724_v53 }
 0x3f1   : >> { %12284 = vmatprep.mubr.msk.bf16.mxu0 %vm280_vm3, %v15255_v7  ;;  %v14153_v7 = vld [vmem:[%s15218_s13 + $0x140] sm:$0xff]  }
 0x3f2   : >> { %12344 = vmatprep.subr.bf16.mxu1 %v14153_v7 }
 0x3f3   : >> { %12345 = vmatpush3.bf16.msra.mxu1 %v14153_v7 }
 0x3f8   : >> { %12285 = vmatmul.mubr.msk.bf16.gmra.mrb[12].mxu0 %vm280_vm3, %v15261_v34  ;;  %v14154_v34 = vld [vmem:[%s15218_s13 + $0x148] sm:$0xff]  }
 0x3f9   : >> { %12288 = vmatprep.mubr.msk.bf16.mxu0 %vm280_vm3, %v15263_v35  ;;  %12346 = vmatprep.subr.bf16.mxu1 %v14154_v34  ;;  %v14155_v35 = vld [vmem:[%s15218_s13 + $0x150] sm:$0xff]  }
 0x3fa   : >> { %12347 = vmatpush3.bf16.msra.mxu1 %v14154_v34 }
 0x3fb   : >> { %12348 = vmatprep.subr.bf16.mxu1 %v14155_v35 }
 0x3fe   : >> { %12349 = vmatpush3.bf16.msra.mxu1 %v14155_v35 }
 0x400   : >> { %12289 = vmatmul.mubr.msk.bf16.gmra.mrb[16].mxu0 %vm280_vm3, %v15269_v50  ;;  %v14156_v50 = vld [vmem:[%s15218_s13 + $0x158] sm:$0xff]  }
 0x401   : >> { %12292 = vmatprep.mubr.msk.bf16.mxu0 %vm280_vm3, %v15271_v13  ;;  %12350 = vmatprep.subr.bf16.mxu1 %v14156_v50  ;;  %v5063_v13 = vld [vmem:[#allocation3 + $0x8] sm:$0xff] }
 0x402   : >> { %12351 = vmatpush3.bf16.msra.mxu1 %v14156_v50 }
 0x408   : >> { %12293 = vmatmul.mubr.msk.bf16.gmra.mrb[20].mxu0 %vm280_vm3, %v15277_v54  ;;  %v5064_v54 = vld [vmem:[#allocation3 + $0x10] sm:$0xff] }
 0x409   : >> { %12296 = vmatprep.mubr.msk.bf16.mxu0 %vm280_vm3, %v15279_v36  ;;  %v5099_v36 = vpack.c.bf16 %v5064_v54, %v5063_v13 }
 0x40b   : >> { %12352 = vmatprep.mubr.msk.bf16.mxu1 %vm280_vm3, %v5099_v36  ;;  %v15696_v36 = vld [vmem:[%s15218_s13 + $0x160] sm:$0xff]  }
 0x410   : >> { %12297 = vmatmul.mubr.msk.bf16.gmra.mrb[24].mxu0 %vm280_vm3, %v15285_v26  ;;  %v14157_v26 = vld [vmem:[%s15218_s13 + $0x120] sm:$0xff]  }
 0x411   : >> { %12300 = vmatprep.mubr.msk.bf16.mxu0 %vm280_vm3, %v15491_v25  ;;  %12384 = vmatprep.subr.bf16.mxu1 %v14157_v26 }
 0x418   : >> { %12301 = vmatmul.mubr.msk.bf16.gmra.mrb[28].mxu0 %vm280_vm3, %v2689_v21 }
 0x419   : >> { %12312 = vmatprep.mubr.msk.bf16.mxu0 %vm280_vm3, %v15357_v40 }
 0x420   : >> { %12313 = vmatmul.mubr.msk.bf16.vlgmr.msra.gmra.mrb[0].mxu0 %vm280_vm3, %v15365_v24 }
 0x421   : >> { %12316 = vmatprep.mubr.msk.bf16.mxu0 %vm280_vm3, %v15367_v31 }
 0x428   : >> { %12317 = vmatmul.mubr.msk.bf16.gmra.mrb[4].mxu0 %vm280_vm3, %v15375_v4 }
 0x429   : >> { %12320 = vmatprep.mubr.msk.bf16.mxu0 %vm280_vm3, %v15377_v19 }
 0x430   : >> { %12321 = vmatmul.mubr.msk.bf16.gmra.mrb[8].mxu0 %vm280_vm3, %v15383_v52 }
 0x431   : >> { %12324 = vmatprep.mubr.msk.bf16.mxu0 %vm280_vm3, %v15385_v30 }
 0x438   : >> { %12325 = vmatmul.mubr.msk.bf16.gmra.mrb[12].mxu0 %vm280_vm3, %v15391_v15 }
 0x439   : >> { %12328 = vmatprep.mubr.msk.bf16.mxu0 %vm280_vm3, %v15393_v16 }
 0x440   : >> { %12329 = vmatmul.mubr.msk.bf16.gmra.mrb[16].mxu0 %vm280_vm3, %v15399_v41 }
 0x441   : >> { %12332 = vmatprep.mubr.msk.bf16.mxu0 %vm280_vm3, %v15401_v46 }
 0x448   : >> { %12333 = vmatmul.mubr.msk.bf16.gmra.mrb[20].mxu0 %vm280_vm3, %v15407_v32 }
 0x449   : >> { %12336 = vmatprep.mubr.msk.bf16.mxu0 %vm280_vm3, %v15409_v0 }
 0x450   : >> { %12337 = vmatmul.mubr.msk.bf16.gmra.mrb[24].mxu0 %vm280_vm3, %v15415_v57 }
 0x451   : >> { %12340 = vmatprep.mubr.msk.bf16.mxu0 %vm280_vm3, %v15529_v37 }
 0x458   : >> { %12341 = vmatmul.mubr.msk.bf16.gmra.mrb[28].mxu0 %vm280_vm3, %v2743_v6 }
 0x4f3   : >> { %v12314_v18 = vpop.f32.mrb[0].mxu0 }
 0x4f4   : >> { %v4913_v39 = vadd.f32 %v12314_v18, %v15646_v17  ;;  %v4746_v12 = vpop.f32.mrb[1].mxu0 }
 0x4f5   : >> { %v4911_v48 = vadd.f32 %v15646_v17, %v4746_v12  ;;  %v12315_v49 = vpop.f32.mrb[2].mxu0 }
 0x4f6   : >> { %v4945_v5 = vmax.f32 %v4913_v39, 0.0  ;;  %v4914_v40 = vadd.f32 %v12315_v49, %v15646_v17  ;;  %v4749_v24 = vpop.f32.mrb[3].mxu0 }
 0x4f7   : >> { %v4943_v31 = vmax.f32 %v4911_v48, 0.0  ;;  %v4912_v4 = vadd.f32 %v15646_v17, %v4749_v24 }
 0x4f8   : >> { %4978 = vst.msk [vmem:[#allocation3 + $0x48] sm:$0xff] %vm280_vm3, %v4945_v5  ;;  %v4946_v19 = vmax.f32 %v4914_v40, 0.0 }
 0x4f9   : >> { %4976 = vst.msk [vmem:[#allocation3 + $0x28] sm:$0xff] %vm280_vm3, %v4943_v31  ;;  %v4944_v52 = vmax.f32 %v4912_v4, 0.0 }
 0x4fa   : >> { %4979 = vst.msk [vmem:[#allocation3 + $0x50] sm:$0xff] %vm280_vm3, %v4946_v19 }
 0x4fb   : >> { %4977 = vst.msk [vmem:[#allocation3 + $0x30] sm:$0xff] %vm280_vm3, %v4944_v52  ;;  %v12318_v30 = vpop.f32.mrb[4].mxu0 }
 0x4fc   : >> { %v4917_v15 = vadd.f32 %v12318_v30, %v15646_v17  ;;  %v4762_v16 = vpop.f32.mrb[5].mxu0 }
 0x4fd   : >> { %v4915_v41 = vadd.f32 %v15646_v17, %v4762_v16  ;;  %v12319_v46 = vpop.f32.mrb[6].mxu0 }
 0x4fe   : >> { %v4949_v32 = vmax.f32 %v4917_v15, 0.0  ;;  %v4918_v0 = vadd.f32 %v12319_v46, %v15646_v17  ;;  %v4765_v57 = vpop.f32.mrb[7].mxu0 }
 0x4ff   : >> { %v4947_v11 = vmax.f32 %v4915_v41, 0.0  ;;  %v4916_v23 = vadd.f32 %v15646_v17, %v4765_v57  ;;  %v5067_v22 = vld [vmem:[#allocation3 + $0x48] sm:$0xff] }
 0x500   : >> { %4982 = vst.msk [vmem:[#allocation3 + $0x88] sm:$0xff] %vm280_vm3, %v4949_v32  ;;  %v4950_v3 = vmax.f32 %v4918_v0, 0.0  ;;  %v5065_v51 = vld [vmem:[#allocation3 + $0x28] sm:$0xff] }
 0x501   : >> { %4980 = vst.msk [vmem:[#allocation3 + $0x68] sm:$0xff] %vm280_vm3, %v4947_v11  ;;  %v4948_v29 = vmax.f32 %v4916_v23, 0.0  ;;  %v5068_v33 = vld [vmem:[#allocation3 + $0x50] sm:$0xff] }
 0x502   : >> { %4983 = vst.msk [vmem:[#allocation3 + $0x90] sm:$0xff] %vm280_vm3, %v4950_v3  ;;  %v5066_v1 = vld [vmem:[#allocation3 + $0x30] sm:$0xff]  ;;  %v15668_v47 = vpack.c.bf16 %v5068_v33, %v5067_v22 }
 0x503   : >> { %4981 = vst.msk [vmem:[#allocation3 + $0x70] sm:$0xff] %vm280_vm3, %v4948_v29  ;;  %v12322_v9 = vpop.f32.mrb[8].mxu0  ;;  %v15664_v61 = vpack.c.bf16 %v5066_v1, %v5065_v51 }
 0x504   : >> { %v4921_v25 = vadd.f32 %v12322_v9, %v15646_v17  ;;  %v4778_v27 = vpop.f32.mrb[9].mxu0 }
 0x505   : >> { %v4919_v44 = vadd.f32 %v15646_v17, %v4778_v27  ;;  %v12323_v28 = vpop.f32.mrb[10].mxu0  ;;  %12353 = vmatmul.mubr.msk.bf16.vlgmr.msra.gmra.mrb[0].mxu1 %vm280_vm3, %v15664_v61 }
 0x506   : >> { %v4953_v60 = vmax.f32 %v4921_v25, 0.0  ;;  %v4922_v63 = vadd.f32 %v12323_v28, %v15646_v17  ;;  %v4781_v37 = vpop.f32.mrb[11].mxu0  ;;  %12356 = vmatprep.mubr.msk.bf16.mxu1 %vm280_vm3, %v15668_v47  ;;  %12385 = vmatpush3.bf16.msra.mxu1 %v14157_v26 }
 0x507   : >> { %v4951_v56 = vmax.f32 %v4919_v44, 0.0  ;;  %v4920_v20 = vadd.f32 %v15646_v17, %v4781_v37  ;;  %12386 = vmatprep.subr.bf16.mxu1 %v14158_v58  ;;  %v5071_v62 = vld [vmem:[#allocation3 + $0x88] sm:$0xff] }
 0x508   : >> { %4986 = vst.msk [vmem:[#allocation3 + $0xc8] sm:$0xff] %vm280_vm3, %v4953_v60  ;;  %v4954_v59 = vmax.f32 %v4922_v63, 0.0  ;;  %v5069_v2 = vld [vmem:[#allocation3 + $0x68] sm:$0xff] }
 0x509   : >> { %4984 = vst.msk [vmem:[#allocation3 + $0xa8] sm:$0xff] %vm280_vm3, %v4951_v56  ;;  %v4952_v42 = vmax.f32 %v4920_v20, 0.0  ;;  %v5072_v45 = vld [vmem:[#allocation3 + $0x90] sm:$0xff] }
 0x50a   : >> { %4987 = vst.msk [vmem:[#allocation3 + $0xd0] sm:$0xff] %vm280_vm3, %v4954_v59  ;;  %v5070_v14 = vld [vmem:[#allocation3 + $0x70] sm:$0xff]  ;;  %12387 = vmatpush3.bf16.msra.mxu1 %v14158_v58  ;;  %v15686_v55 = vpack.c.bf16 %v5072_v45, %v5071_v62 }
 0x50b   : >> { %4985 = vst.msk [vmem:[#allocation3 + $0xb0] sm:$0xff] %vm280_vm3, %v4952_v42  ;;  %v12326_v38 = vpop.f32.mrb[12].mxu0  ;;  %v15682_v43 = vpack.c.bf16 %v5070_v14, %v5069_v2  ;;  %12388 = vmatprep.subr.bf16.mxu1 %v14159_v10 }
 0x50c   : >> { %v4925_v21 = vadd.f32 %v12326_v38, %v15646_v17  ;;  %v4794_v53 = vpop.f32.mrb[13].mxu0 }
 0x50d   : >> { %v4923_v6 = vadd.f32 %v15646_v17, %v4794_v53  ;;  %v12327_v7 = vpop.f32.mrb[14].mxu0  ;;  %12357 = vmatmul.mubr.msk.bf16.gmra.mrb[4].mxu1 %vm280_vm3, %v15682_v43 }
 0x50e   : >> { %v4957_v34 = vmax.f32 %v4925_v21, 0.0  ;;  %v4926_v35 = vadd.f32 %v12327_v7, %v15646_v17  ;;  %v4797_v50 = vpop.f32.mrb[15].mxu0  ;;  %12360 = vmatprep.mubr.msk.bf16.mxu1 %vm280_vm3, %v15686_v55  ;;  %12389 = vmatpush3.bf16.msra.mxu1 %v14159_v10 }
 0x50f   : >> { %v4955_v13 = vmax.f32 %v4923_v6, 0.0  ;;  %v4924_v54 = vadd.f32 %v15646_v17, %v4797_v50  ;;  %12390 = vmatprep.subr.bf16.mxu1 %v14160_v8  ;;  %v5075_v40 = vld [vmem:[#allocation3 + $0xc8] sm:$0xff] }
 0x510   : >> { %4990 = vst.msk [vmem:[#allocation3 + $0x108] sm:$0xff] %vm280_vm3, %v4957_v34  ;;  %v4958_v26 = vmax.f32 %v4926_v35, 0.0  ;;  %v5073_v12 = vld [vmem:[#allocation3 + $0xa8] sm:$0xff] }
 0x511   : >> { %4988 = vst.msk [vmem:[#allocation3 + $0xe8] sm:$0xff] %vm280_vm3, %v4955_v13  ;;  %v4956_v18 = vmax.f32 %v4924_v54, 0.0  ;;  %v5076_v39 = vld [vmem:[#allocation3 + $0xd0] sm:$0xff] }
 0x512   : >> { %4991 = vst.msk [vmem:[#allocation3 + $0x110] sm:$0xff] %vm280_vm3, %v4958_v26  ;;  %v5074_v48 = vld [vmem:[#allocation3 + $0xb0] sm:$0xff]  ;;  %12391 = vmatpush3.bf16.msra.mxu1 %v14160_v8  ;;  %v15706_v4 = vpack.c.bf16 %v5076_v39, %v5075_v40 }
 0x513   : >> { %4989 = vst.msk [vmem:[#allocation3 + $0xf0] sm:$0xff] %vm280_vm3, %v4956_v18  ;;  %v12330_v49 = vpop.f32.mrb[16].mxu0  ;;  %v15702_v5 = vpack.c.bf16 %v5074_v48, %v5073_v12  ;;  %12424 = vmatprep.subr.bf16.mxu1 %v15696_v36 }
 0x514   : >> { %v4929_v24 = vadd.f32 %v12330_v49, %v15646_v17  ;;  %v4810_v31 = vpop.f32.mrb[17].mxu0 }
 0x515   : >> { %v4927_v19 = vadd.f32 %v15646_v17, %v4810_v31  ;;  %v12331_v52 = vpop.f32.mrb[18].mxu0  ;;  %12361 = vmatmul.mubr.msk.bf16.gmra.mrb[8].mxu1 %vm280_vm3, %v15702_v5 }
 0x516   : >> { %v4961_v30 = vmax.f32 %v4929_v24, 0.0  ;;  %v4930_v15 = vadd.f32 %v12331_v52, %v15646_v17  ;;  %v4813_v16 = vpop.f32.mrb[19].mxu0  ;;  %12364 = vmatprep.mubr.msk.bf16.mxu1 %vm280_vm3, %v15706_v4 }
 0x517   : >> { %v4959_v41 = vmax.f32 %v4927_v19, 0.0  ;;  %v4928_v46 = vadd.f32 %v15646_v17, %v4813_v16  ;;  %v5079_v33 = vld [vmem:[#allocation3 + $0x108] sm:$0xff] }
 0x518   : >> { %4994 = vst.msk [vmem:[#allocation3 + $0x148] sm:$0xff] %vm280_vm3, %v4961_v30  ;;  %v4962_v32 = vmax.f32 %v4930_v15, 0.0  ;;  %v5077_v11 = vld [vmem:[#allocation3 + $0xe8] sm:$0xff] }
 0x519   : >> { %4992 = vst.msk [vmem:[#allocation3 + $0x128] sm:$0xff] %vm280_vm3, %v4959_v41  ;;  %v4960_v0 = vmax.f32 %v4928_v46, 0.0  ;;  %v5080_v57 = vld [vmem:[#allocation3 + $0x110] sm:$0xff] }
 0x51a   : >> { %4995 = vst.msk [vmem:[#allocation3 + $0x150] sm:$0xff] %vm280_vm3, %v4962_v32  ;;  %v5078_v23 = vld [vmem:[#allocation3 + $0xf0] sm:$0xff]  ;;  %v15722_v9 = vpack.c.bf16 %v5080_v57, %v5079_v33 }
 0x51b   : >> { %4993 = vst.msk [vmem:[#allocation3 + $0x130] sm:$0xff] %vm280_vm3, %v4960_v0  ;;  %v12334_v3 = vpop.f32.mrb[20].mxu0  ;;  %v15719_v29 = vpack.c.bf16 %v5078_v23, %v5077_v11  ;;  %v5010_v33 = vld [vmem:[#allocation3 + $0xf] sm:$0xff] }
 0x51c   : >> { %v4933_v51 = vadd.f32 %v12334_v3, %v15646_v17  ;;  %v4826_v1 = vpop.f32.mrb[21].mxu0 }
 0x51d   : >> { %v4931_v22 = vadd.f32 %v15646_v17, %v4826_v1  ;;  %v12335_v58 = vpop.f32.mrb[22].mxu0  ;;  %12365 = vmatmul.mubr.msk.bf16.gmra.mrb[12].mxu1 %vm280_vm3, %v15719_v29 }
 0x51e   : >> { %v4965_v25 = vmax.f32 %v4933_v51, 0.0  ;;  %v4934_v27 = vadd.f32 %v12335_v58, %v15646_v17  ;;  %v4829_v44 = vpop.f32.mrb[23].mxu0  ;;  %12368 = vmatprep.mubr.msk.bf16.mxu1 %vm280_vm3, %v15722_v9 }
 0x51f   : >> { %v4963_v28 = vmax.f32 %v4931_v22, 0.0  ;;  %v4932_v60 = vadd.f32 %v15646_v17, %v4829_v44  ;;  %v5083_v45 = vld [vmem:[#allocation3 + $0x148] sm:$0xff] }
 0x520   : >> { %4998 = vst.msk [vmem:[#allocation3 + $0x188] sm:$0xff] %vm280_vm3, %v4965_v25  ;;  %v4966_v63 = vmax.f32 %v4934_v27, 0.0  ;;  %v5081_v20 = vld [vmem:[#allocation3 + $0x128] sm:$0xff] }
 0x521   : >> { %4996 = vst.msk [vmem:[#allocation3 + $0x168] sm:$0xff] %vm280_vm3, %v4963_v28  ;;  %v4964_v37 = vmax.f32 %v4932_v60, 0.0  ;;  %v5084_v56 = vld [vmem:[#allocation3 + $0x150] sm:$0xff]  ;;  %v5011_v44 = vld [vmem:[#allocation3 + $0x27] sm:$0xff] }
 0x522   : >> { %4999 = vst.msk [vmem:[#allocation3 + $0x190] sm:$0xff] %vm280_vm3, %v4966_v63  ;;  %v5082_v10 = vld [vmem:[#allocation3 + $0x130] sm:$0xff]  ;;  %v15738_v38 = vpack.c.bf16 %v5084_v56, %v5083_v45  ;;  %v5013_v60 = vld [vmem:[#allocation3 + $0x47] sm:$0xff] }
 0x523   : >> { %4997 = vst.msk [vmem:[#allocation3 + $0x170] sm:$0xff] %vm280_vm3, %v4964_v37  ;;  %v12338_v59 = vpop.f32.mrb[24].mxu0  ;;  %v15735_v42 = vpack.c.bf16 %v5082_v10, %v5081_v20  ;;  %v5012_v25 = vld [vmem:[#allocation3 + $0x2f] sm:$0xff] }
 0x524   : >> { %v4937_v2 = vadd.f32 %v12338_v59, %v15646_v17  ;;  %v4842_v14 = vpop.f32.mrb[25].mxu0  ;;  %v5014_v27 = vld [vmem:[#allocation3 + $0x4f] sm:$0xff]  ;;  %v15780_v28 = vpack.c.bf16 %v5012_v25, %v5011_v44  ;;  %v5015_v59 = vld [vmem:[#allocation3 + $0x67] sm:$0xff] }
 0x525   : >> { %v4935_v62 = vadd.f32 %v15646_v17, %v4842_v14  ;;  %v12339_v8 = vpop.f32.mrb[26].mxu0  ;;  %12369 = vmatmul.mubr.msk.bf16.gmra.mrb[16].mxu1 %vm280_vm3, %v15735_v42  ;;  %v14162_v63 = vld [vmem:[%s15218_s13 + $0x168] sm:$0xff]   ;;  %v15783_v37 = vpack.c.bf16 %v5014_v27, %v5013_v60  ;;  %v14163_v56 = vld [vmem:[%s15218_s13 + $0x170] sm:$0xff]   ;;  %v14164_v14 = vld [vmem:[%s15218_s13 + $0x178] sm:$0xff]  }
 0x526   : >> { %v4969_v21 = vmax.f32 %v4937_v2, 0.0  ;;  %v4938_v53 = vadd.f32 %v12339_v8, %v15646_v17  ;;  %v4845_v6 = vpop.f32.mrb[27].mxu0  ;;  %12372 = vmatprep.mubr.msk.bf16.mxu1 %vm280_vm3, %v15738_v38  ;;  %v5016_v20 = vld [vmem:[#allocation3 + $0x6f] sm:$0xff]  ;;  %v5017_v2 = vld [vmem:[#allocation3 + $0x87] sm:$0xff] }
 0x527   : >> { %v4967_v7 = vmax.f32 %v4935_v62, 0.0  ;;  %v4936_v34 = vadd.f32 %v15646_v17, %v4845_v6  ;;  %v5087_v12 = vld [vmem:[#allocation3 + $0x188] sm:$0xff]  ;;  %v15791_v45 = vpack.c.bf16 %v5016_v20, %v5015_v59  ;;  %v5122_v20 = vld [vmem:[#allocation3 + $0x51] sm:$0xff] }
 0x528   : >> { %5002 = vst.msk [vmem:[#allocation3 + $0x1c8] sm:$0xff] %vm280_vm3, %v4969_v21  ;;  %v4970_v35 = vmax.f32 %v4938_v53, 0.0  ;;  %v5085_v54 = vld [vmem:[#allocation3 + $0x168] sm:$0xff] }
 0x529   : >> { %5000 = vst.msk [vmem:[#allocation3 + $0x1a8] sm:$0xff] %vm280_vm3, %v4967_v7  ;;  %v4968_v50 = vmax.f32 %v4936_v34, 0.0  ;;  %v5088_v13 = vld [vmem:[#allocation3 + $0x190] sm:$0xff]  ;;  %v5019_v53 = vld [vmem:[#allocation3 + $0xa7] sm:$0xff] }
 0x52a   : >> { %5003 = vst.msk [vmem:[#allocation3 + $0x1d0] sm:$0xff] %vm280_vm3, %v4970_v35  ;;  %v5086_v26 = vld [vmem:[#allocation3 + $0x170] sm:$0xff]  ;;  %v15754_v40 = vpack.c.bf16 %v5088_v13, %v5087_v12  ;;  %v5021_v7 = vld [vmem:[#allocation3 + $0xc7] sm:$0xff] }
 0x52b   : >> { %5001 = vst.msk [vmem:[#allocation3 + $0x1b0] sm:$0xff] %vm280_vm3, %v4968_v50  ;;  %v12342_v18 = vpop.f32.mrb[28].mxu0  ;;  %v15751_v39 = vpack.c.bf16 %v5086_v26, %v5085_v54  ;;  %v5018_v10 = vld [vmem:[#allocation3 + $0x8f] sm:$0xff]  ;;  %v5023_v13 = vld [vmem:[#allocation3 + $0xe7] sm:$0xff] }
 0x52c   : >> { %v4941_v48 = vadd.f32 %v12342_v18, %v15646_v17  ;;  %v4858_v49 = vpop.f32.mrb[29].mxu0  ;;  %v15794_v62 = vpack.c.bf16 %v5018_v10, %v5017_v2  ;;  %v5020_v8 = vld [vmem:[#allocation3 + $0xaf] sm:$0xff]  ;;  %v5025_v26 = vld [vmem:[#allocation3 + $0x107] sm:$0xff] }
 0x52d   : >> { %v4939_v24 = vadd.f32 %v15646_v17, %v4858_v49  ;;  %v12343_v31 = vpop.f32.mrb[30].mxu0  ;;  %12373 = vmatmul.mubr.msk.bf16.gmra.mrb[20].mxu1 %vm280_vm3, %v15751_v39  ;;  %v5022_v21 = vld [vmem:[#allocation3 + $0xcf] sm:$0xff]  ;;  %v15801_v6 = vpack.c.bf16 %v5020_v8, %v5019_v53  ;;  %v5027_v49 = vld [vmem:[#allocation3 + $0x127] sm:$0xff] }
 0x52e   : >> { %v4973_v19 = vmax.f32 %v4941_v48, 0.0  ;;  %v4942_v52 = vadd.f32 %v12343_v31, %v15646_v17  ;;  %v4861_v30 = vpop.f32.mrb[31].mxu0  ;;  %12376 = vmatprep.mubr.msk.bf16.mxu1 %vm280_vm3, %v15754_v40  ;;  %v15803_v34 = vpack.c.bf16 %v5022_v21, %v5021_v7  ;;  %v5024_v35 = vld [vmem:[#allocation3 + $0xef] sm:$0xff]  ;;  %v5029_v31 = vld [vmem:[#allocation3 + $0x147] sm:$0xff] }
 0x52f   : >> { %v4971_v15 = vmax.f32 %v4939_v24, 0.0  ;;  %v4940_v16 = vadd.f32 %v15646_v17, %v4861_v30  ;;  %v5091_v23 = vld [vmem:[#allocation3 + $0x1c8] sm:$0xff]  ;;  %v15809_v54 = vpack.c.bf16 %v5024_v35, %v5023_v13  ;;  %v5124_v21 = vld [vmem:[#allocation3 + $0x71] sm:$0xff] }
 0x530   : >> { %5006 = vst.msk [vmem:[#allocation3 + $0x208] sm:$0xff] %vm280_vm3, %v4973_v19  ;;  %v4974_v41 = vmax.f32 %v4942_v52, 0.0  ;;  %v5089_v0 = vld [vmem:[#allocation3 + $0x1a8] sm:$0xff]  ;;  %v5126_v7 = vld [vmem:[#allocation3 + $0x91] sm:$0xff] }
 0x531   : >> { %5004 = vst.msk [vmem:[#allocation3 + $0x1e8] sm:$0xff] %vm280_vm3, %v4971_v15  ;;  %v4972_v46 = vmax.f32 %v4940_v16, 0.0  ;;  %v5092_v32 = vld [vmem:[#allocation3 + $0x1d0] sm:$0xff]  ;;  %v5009_v17 = vld [vmem:[#allocation3 + $0x7] sm:$0xff] }
 0x532   : >> { %5007 = vst.msk [vmem:[#allocation3 + $0x210] sm:$0xff] %vm280_vm3, %v4974_v41  ;;  %v5090_v57 = vld [vmem:[#allocation3 + $0x1b0] sm:$0xff]  ;;  %v15769_v3 = vpack.c.bf16 %v5092_v32, %v5091_v23  ;;  %v5045_v22 = vpack.c.bf16 %v5010_v33, %v5009_v17  ;;  %v5031_v15 = vld [vmem:[#allocation3 + $0x167] sm:$0xff] }
 0x533   : >> { %5005 = vst.msk [vmem:[#allocation3 + $0x1f0] sm:$0xff] %vm280_vm3, %v4972_v46  ;;  %v15767_v11 = vpack.c.bf16 %v5090_v57, %v5089_v0  ;;  %v5026_v50 = vld [vmem:[#allocation3 + $0x10f] sm:$0xff]  ;;  %v5033_v41 = vld [vmem:[#allocation3 + $0x187] sm:$0xff] }
 0x534   : >> { %v15811_v18 = vpack.c.bf16 %v5026_v50, %v5025_v26  ;;  %v5028_v12 = vld [vmem:[#allocation3 + $0x12f] sm:$0xff]  ;;  %v5035_v57 = vld [vmem:[#allocation3 + $0x1a7] sm:$0xff]  ;;  %v14168_v50 = vld [vmem:[%s15218_s13 + $0x198] sm:$0xff]  }
 0x535   : >> { %12377 = vmatmul.mubr.msk.bf16.gmra.mrb[24].mxu1 %vm280_vm3, %v15767_v11  ;;  %v5030_v48 = vld [vmem:[#allocation3 + $0x14f] sm:$0xff]  ;;  %v15817_v24 = vpack.c.bf16 %v5028_v12, %v5027_v49  ;;  %v5037_v17 = vld [vmem:[#allocation3 + $0x1c7] sm:$0xff] }
 0x536   : >> { %12380 = vmatprep.mubr.msk.bf16.mxu1 %vm280_vm3, %v15769_v3  ;;  %v15819_v19 = vpack.c.bf16 %v5030_v48, %v5029_v31  ;;  %v5032_v52 = vld [vmem:[#allocation3 + $0x16f] sm:$0xff] }
 0x537   : >> { %v5034_v30 = vld [vmem:[#allocation3 + $0x18f] sm:$0xff]  ;;  %v15825_v16 = vpack.c.bf16 %v5032_v52, %v5031_v15 }
 0x538   : >> { %v5093_v51 = vld [vmem:[#allocation3 + $0x1e8] sm:$0xff]  ;;  %v15827_v46 = vpack.c.bf16 %v5034_v30, %v5033_v41  ;;  %v5128_v12 = vld [vmem:[#allocation3 + $0xb1] sm:$0xff] }
 0x539   : >> { %v5036_v32 = vld [vmem:[#allocation3 + $0x1af] sm:$0xff]  ;;  %v5039_v25 = vld [vmem:[#allocation3 + $0x1e7] sm:$0xff] }
 0x53a   : >> { %v5094_v1 = vld [vmem:[#allocation3 + $0x1f0] sm:$0xff]  ;;  %v15833_v23 = vpack.c.bf16 %v5036_v32, %v5035_v57  ;;  %v14166_v59 = vld [vmem:[%s15218_s13 + $0x188] sm:$0xff]  }
 0x53b   : >> { %v15775_v58 = vpack.c.bf16 %v5094_v1, %v5093_v51  ;;  %v5038_v0 = vld [vmem:[#allocation3 + $0x1cf] sm:$0xff] }
 0x53c   : >> { %v15835_v33 = vpack.c.bf16 %v5038_v0, %v5037_v17  ;;  %v5117_v51 = vld [vmem:[#allocation3 + $0x9] sm:$0xff]  ;;  %v5118_v1 = vld [vmem:[#allocation3 + $0x11] sm:$0xff] }
 0x53d   : >> { %12381 = vmatmul.mubr.msk.bf16.gmra.mrb[28].mxu1 %vm280_vm3, %v15775_v58  ;;  %v5153_v27 = vpack.c.bf16 %v5118_v1, %v5117_v51  ;;  %v5119_v60 = vld [vmem:[#allocation3 + $0x29] sm:$0xff]  ;;  %v5130_v49 = vld [vmem:[#allocation3 + $0xd1] sm:$0xff] }
 0x53e   : >> { %12392 = vmatprep.mubr.msk.bf16.mxu1 %vm280_vm3, %v5045_v22  ;;  %v5040_v22 = vld [vmem:[#allocation3 + $0x1ef] sm:$0xff] }
 0x53f   : >> { %v15841_v44 = vpack.c.bf16 %v5040_v22, %v5039_v25  ;;  %v5123_v8 = vld [vmem:[#allocation3 + $0x69] sm:$0xff]  ;;  %v5132_v15 = vld [vmem:[#allocation3 + $0xf1] sm:$0xff] }
 0x540   : >> { %v5125_v53 = vld [vmem:[#allocation3 + $0x89] sm:$0xff]  ;;  %v15856_v35 = vpack.c.bf16 %v5124_v21, %v5123_v8  ;;  %v5134_v32 = vld [vmem:[#allocation3 + $0x111] sm:$0xff] }
 0x541   : >> { %v15859_v13 = vpack.c.bf16 %v5126_v7, %v5125_v53  ;;  %v5127_v26 = vld [vmem:[#allocation3 + $0xa9] sm:$0xff]  ;;  %v5136_v51 = vld [vmem:[#allocation3 + $0x131] sm:$0xff] }
 0x542   : >> { %v5129_v48 = vld [vmem:[#allocation3 + $0xc9] sm:$0xff]  ;;  %v15866_v31 = vpack.c.bf16 %v5128_v12, %v5127_v26  ;;  %v5138_v22 = vld [vmem:[#allocation3 + $0x151] sm:$0xff] }
 0x543   : >> { %v15868_v52 = vpack.c.bf16 %v5130_v49, %v5129_v48  ;;  %v5131_v30 = vld [vmem:[#allocation3 + $0xe9] sm:$0xff]  ;;  %v5144_v21 = vld [vmem:[#allocation3 + $0x1b1] sm:$0xff] }
 0x544   : >> { %v5133_v41 = vld [vmem:[#allocation3 + $0x109] sm:$0xff]  ;;  %v15874_v0 = vpack.c.bf16 %v5132_v15, %v5131_v30  ;;  %v5146_v7 = vld [vmem:[#allocation3 + $0x1d1] sm:$0xff] }
 0x545   : >> { %12393 = vmatmul.mubr.msk.bf16.vlgmr.msra.gmra.mrb[0].mxu1 %vm280_vm3, %v15780_v28  ;;  %v15876_v57 = vpack.c.bf16 %v5134_v32, %v5133_v41  ;;  %v5135_v17 = vld [vmem:[#allocation3 + $0x129] sm:$0xff]  ;;  %v5148_v48 = vld [vmem:[#allocation3 + $0x1f1] sm:$0xff] }
 0x546   : >> { %12396 = vmatprep.mubr.msk.bf16.mxu1 %vm280_vm3, %v15783_v37  ;;  %12425 = vmatpush3.bf16.msra.mxu1 %v15696_v36  ;;  %v14165_v36 = vld [vmem:[%s15218_s13 + $0x180] sm:$0xff]   ;;  %v5137_v1 = vld [vmem:[#allocation3 + $0x149] sm:$0xff]  ;;  %v15882_v25 = vpack.c.bf16 %v5136_v51, %v5135_v17  ;;  %v14172_v41 = vld [vmem:[%s15218_s13 + $0x1b8] sm:$0xff]  }
 0x547   : >> { %12426 = vmatprep.subr.bf16.mxu1 %v14162_v63  ;;  %v5143_v8 = vld [vmem:[#allocation3 + $0x1a9] sm:$0xff] }
 0x548   : >> { %v5145_v53 = vld [vmem:[#allocation3 + $0x1c9] sm:$0xff] }
 0x549   : >> { %v15900_v26 = vpack.c.bf16 %v5146_v7, %v5145_v53  ;;  %v5147_v12 = vld [vmem:[#allocation3 + $0x1e9] sm:$0xff]  ;;  %v5150_v7 = vld [vmem:[#allocation3 + $0x211] sm:$0xff] }
 0x54a   : >> { %12427 = vmatpush3.bf16.msra.mxu1 %v14162_v63  ;;  %v5120_v63 = vld [vmem:[#allocation3 + $0x31] sm:$0xff]  ;;  %v15906_v49 = vpack.c.bf16 %v5148_v48, %v5147_v12  ;;  %v14170_v30 = vld [vmem:[%s15218_s13 + $0x1a8] sm:$0xff]  }
 0x54b   : >> { %12428 = vmatprep.subr.bf16.mxu1 %v14163_v56  ;;  %v15846_v10 = vpack.c.bf16 %v5120_v63, %v5119_v60  ;;  %v5139_v60 = vld [vmem:[#allocation3 + $0x169] sm:$0xff]  ;;  %v5140_v63 = vld [vmem:[#allocation3 + $0x171] sm:$0xff] }
 0x54c   : >> { %v14171_v15 = vld [vmem:[%s15218_s13 + $0x1b0] sm:$0xff]   ;;  %v5041_v32 = vld [vmem:[#allocation3 + $0x207] sm:$0xff] }
 0x54d   : >> { %12397 = vmatmul.mubr.msk.bf16.gmra.mrb[4].mxu1 %vm280_vm3, %v15791_v45  ;;  %v14174_v51 = vld [vmem:[%s15218_s13 + $0x1c8] sm:$0xff]  }
 0x54e   : >> { %12400 = vmatprep.mubr.msk.bf16.mxu1 %vm280_vm3, %v15794_v62  ;;  %12429 = vmatpush3.bf16.msra.mxu1 %v14163_v56  ;;  %v5121_v56 = vld [vmem:[#allocation3 + $0x49] sm:$0xff] }
 0x54f   : >> { %12430 = vmatprep.subr.bf16.mxu1 %v14164_v14  ;;  %v15849_v2 = vpack.c.bf16 %v5122_v20, %v5121_v56  ;;  %v5141_v56 = vld [vmem:[#allocation3 + $0x189] sm:$0xff]  ;;  %v5142_v20 = vld [vmem:[#allocation3 + $0x191] sm:$0xff] }
 0x550   : >> { %v5149_v53 = vld [vmem:[#allocation3 + $0x209] sm:$0xff] }
 0x551   : >> { %v16020_v12 = vpack.c.bf16 %v5150_v7, %v5149_v53  ;;  %v14182_v48 = vld [vmem:[%s15218_s13 + $0x208] sm:$0xff]  }
 0x552   : >> { %12431 = vmatpush3.bf16.msra.mxu1 %v14164_v14  ;;  %v14167_v14 = vld [vmem:[%s15218_s13 + $0x190] sm:$0xff]  }
 0x553   : >> { %12464 = vmatprep.subr.bf16.mxu1 %v14165_v36 }
 0x555   : >> { %12401 = vmatmul.mubr.msk.bf16.gmra.mrb[8].mxu1 %vm280_vm3, %v15801_v6 }
 0x556   : >> { %12404 = vmatprep.mubr.msk.bf16.mxu1 %vm280_vm3, %v15803_v34 }
 0x55d   : >> { %12405 = vmatmul.mubr.msk.bf16.gmra.mrb[12].mxu1 %vm280_vm3, %v15809_v54 }
 0x55e   : >> { %12408 = vmatprep.mubr.msk.bf16.mxu1 %vm280_vm3, %v15811_v18 }
 0x565   : >> { %12409 = vmatmul.mubr.msk.bf16.gmra.mrb[16].mxu1 %vm280_vm3, %v15817_v24 }
 0x566   : >> { %12412 = vmatprep.mubr.msk.bf16.mxu1 %vm280_vm3, %v15819_v19 }
 0x56d   : >> { %12413 = vmatmul.mubr.msk.bf16.gmra.mrb[20].mxu1 %vm280_vm3, %v15825_v16 }
 0x56e   : >> { %12416 = vmatprep.mubr.msk.bf16.mxu1 %vm280_vm3, %v15827_v46 }
 0x575   : >> { %12417 = vmatmul.mubr.msk.bf16.gmra.mrb[24].mxu1 %vm280_vm3, %v15833_v23 }
 0x576   : >> { %12420 = vmatprep.mubr.msk.bf16.mxu1 %vm280_vm3, %v15835_v33 }
 0x57d   : >> { %12421 = vmatmul.mubr.msk.bf16.gmra.mrb[28].mxu1 %vm280_vm3, %v15841_v44 }
 0x57e   : >> { %12432 = vmatprep.mubr.msk.bf16.mxu1 %vm280_vm3, %v5153_v27  ;;  %v15884_v27 = vpack.c.bf16 %v5138_v22, %v5137_v1  ;;  %v14175_v1 = vld [vmem:[%s15218_s13 + $0x1d0] sm:$0xff]   ;;  %v14176_v22 = vld [vmem:[%s15218_s13 + $0x1d8] sm:$0xff]  }
 0x585   : >> { %12433 = vmatmul.mubr.msk.bf16.vlgmr.msra.gmra.mrb[0].mxu1 %vm280_vm3, %v15846_v10 }
 0x586   : >> { %12436 = vmatprep.mubr.msk.bf16.mxu1 %vm280_vm3, %v15849_v2  ;;  %12465 = vmatpush3.bf16.msra.mxu1 %v14165_v36  ;;  %v14169_v36 = vld [vmem:[%s15218_s13 + $0x1a0] sm:$0xff]  }
 0x587   : >> { %12466 = vmatprep.subr.bf16.mxu1 %v14166_v59 }
 0x58a   : >> { %12467 = vmatpush3.bf16.msra.mxu1 %v14166_v59  ;;  %v15890_v59 = vpack.c.bf16 %v5140_v63, %v5139_v60  ;;  %v5096_v60 = vld [vmem:[#allocation3 + $0x210] sm:$0xff]  ;;  %v5095_v63 = vld [vmem:[#allocation3 + $0x208] sm:$0xff] }
 0x58b   : >> { %12468 = vmatprep.subr.bf16.mxu1 %v14167_v14 }
 0x58d   : >> { %12437 = vmatmul.mubr.msk.bf16.gmra.mrb[4].mxu1 %vm280_vm3, %v15856_v35 }
 0x58e   : >> { %12440 = vmatprep.mubr.msk.bf16.mxu1 %vm280_vm3, %v15859_v13  ;;  %12469 = vmatpush3.bf16.msra.mxu1 %v14167_v14  ;;  %v15892_v14 = vpack.c.bf16 %v5142_v20, %v5141_v56  ;;  %v15982_v56 = vpack.c.bf16 %v5096_v60, %v5095_v63  ;;  %v14178_v20 = vld [vmem:[%s15218_s13 + $0x1e8] sm:$0xff]  }
 0x58f   : >> { %12470 = vmatprep.subr.bf16.mxu1 %v14168_v50 }
 0x592   : >> { %12471 = vmatpush3.bf16.msra.mxu1 %v14168_v50  ;;  %v15898_v50 = vpack.c.bf16 %v5144_v21, %v5143_v8  ;;  %v14179_v8 = vld [vmem:[%s15218_s13 + $0x1f0] sm:$0xff]   ;;  %v14180_v21 = vld [vmem:[%s15218_s13 + $0x1f8] sm:$0xff]  }
 0x593   : >> { %12504 = vmatprep.subr.bf16.mxu1 %v14169_v36 }
 0x595   : >> { %12441 = vmatmul.mubr.msk.bf16.gmra.mrb[8].mxu1 %vm280_vm3, %v15866_v31 }
 0x596   : >> { %12444 = vmatprep.mubr.msk.bf16.mxu1 %vm280_vm3, %v15868_v52 }
 0x59d   : >> { %12445 = vmatmul.mubr.msk.bf16.gmra.mrb[12].mxu1 %vm280_vm3, %v15874_v0 }
 0x59e   : >> { %12448 = vmatprep.mubr.msk.bf16.mxu1 %vm280_vm3, %v15876_v57 }
 0x5a5   : >> { %12449 = vmatmul.mubr.msk.bf16.gmra.mrb[16].mxu1 %vm280_vm3, %v15882_v25 }
 0x5a6   : >> { %12452 = vmatprep.mubr.msk.bf16.mxu1 %vm280_vm3, %v15884_v27 }
 0x5ad   : >> { %12453 = vmatmul.mubr.msk.bf16.gmra.mrb[20].mxu1 %vm280_vm3, %v15890_v59 }
 0x5ae   : >> { %12456 = vmatprep.mubr.msk.bf16.mxu1 %vm280_vm3, %v15892_v14 }
 0x5b5   : >> { %12457 = vmatmul.mubr.msk.bf16.gmra.mrb[24].mxu1 %vm280_vm3, %v15898_v50 }
 0x5b6   : >> { %12460 = vmatprep.mubr.msk.bf16.mxu1 %vm280_vm3, %v15900_v26 }
 0x5bd   : >> { %12461 = vmatmul.mubr.msk.bf16.gmra.mrb[28].mxu1 %vm280_vm3, %v15906_v49 }
 0x5be   : >> { %12472 = vmatprep.mubr.msk.bf16.mxu1 %vm280_vm3, %v15780_v28  ;;  %v14173_v28 = vld [vmem:[%s15218_s13 + $0x1c0] sm:$0xff]  }
 0x5c5   : >> { %12473 = vmatmul.mubr.msk.bf16.vlgmr.msra.gmra.mrb[0].mxu1 %vm280_vm3, %v15783_v37 }
 0x5c6   : >> { %12476 = vmatprep.mubr.msk.bf16.mxu1 %vm280_vm3, %v15791_v45  ;;  %12505 = vmatpush3.bf16.msra.mxu1 %v14169_v36  ;;  %v5042_v36 = vld [vmem:[#allocation3 + $0x20f] sm:$0xff] }
 0x5c7   : >> { %12506 = vmatprep.subr.bf16.mxu1 %v14170_v30  ;;  %v15944_v17 = vpack.c.bf16 %v5042_v36, %v5041_v32 }
 0x5ca   : >> { %12507 = vmatpush3.bf16.msra.mxu1 %v14170_v30  ;;  %v14183_v30 = vld [vmem:[%s15218_s13 + $0x210] sm:$0xff]  }
 0x5cb   : >> { %12508 = vmatprep.subr.bf16.mxu1 %v14171_v15 }
 0x5cd   : >> { %12477 = vmatmul.mubr.msk.bf16.gmra.mrb[4].mxu1 %vm280_vm3, %v15794_v62 }
 0x5ce   : >> { %12480 = vmatprep.mubr.msk.bf16.mxu1 %vm280_vm3, %v15801_v6  ;;  %12509 = vmatpush3.bf16.msra.mxu1 %v14171_v15  ;;  %v14184_v15 = vld [vmem:[%s15218_s13 + $0x218] sm:$0xff]  }
 0x5cf   : >> { %12510 = vmatprep.subr.bf16.mxu1 %v14172_v41 }
 0x5d2   : >> { %12511 = vmatpush3.bf16.msra.mxu1 %v14172_v41 }
 0x5d3   : >> { %12544 = vmatprep.subr.bf16.mxu1 %v14173_v28 }
 0x5d5   : >> { %12481 = vmatmul.mubr.msk.bf16.gmra.mrb[8].mxu1 %vm280_vm3, %v15803_v34 }
 0x5d6   : >> { %12484 = vmatprep.mubr.msk.bf16.mxu1 %vm280_vm3, %v15809_v54 }
 0x5dd   : >> { %12485 = vmatmul.mubr.msk.bf16.gmra.mrb[12].mxu1 %vm280_vm3, %v15811_v18 }
 0x5de   : >> { %12488 = vmatprep.mubr.msk.bf16.mxu1 %vm280_vm3, %v15817_v24 }
 0x5e5   : >> { %12489 = vmatmul.mubr.msk.bf16.gmra.mrb[16].mxu1 %vm280_vm3, %v15819_v19 }
 0x5e6   : >> { %12492 = vmatprep.mubr.msk.bf16.mxu1 %vm280_vm3, %v15825_v16 }
 0x5ed   : >> { %12493 = vmatmul.mubr.msk.bf16.gmra.mrb[20].mxu1 %vm280_vm3, %v15827_v46 }
 0x5ee   : >> { %12496 = vmatprep.mubr.msk.bf16.mxu1 %vm280_vm3, %v15833_v23 }
 0x5f5   : >> { %12497 = vmatmul.mubr.msk.bf16.gmra.mrb[24].mxu1 %vm280_vm3, %v15835_v33 }
 0x5f6   : >> { %12500 = vmatprep.mubr.msk.bf16.mxu1 %vm280_vm3, %v15841_v44 }
 0x5fd   : >> { %12501 = vmatmul.mubr.msk.bf16.gmra.mrb[28].mxu1 %vm280_vm3, %v15944_v17 }
 0x5fe   : >> { %12512 = vmatprep.mubr.msk.bf16.mxu1 %vm280_vm3, %v15664_v61  ;;  %v14177_v61 = vld [vmem:[%s15218_s13 + $0x1e0] sm:$0xff]  }
 0x605   : >> { %12513 = vmatmul.mubr.msk.bf16.vlgmr.msra.gmra.mrb[0].mxu1 %vm280_vm3, %v15668_v47 }
 0x606   : >> { %12516 = vmatprep.mubr.msk.bf16.mxu1 %vm280_vm3, %v15682_v43  ;;  %12545 = vmatpush3.bf16.msra.mxu1 %v14173_v28 }
 0x607   : >> { %12546 = vmatprep.subr.bf16.mxu1 %v14174_v51 }
 0x60a   : >> { %12547 = vmatpush3.bf16.msra.mxu1 %v14174_v51 }
 0x60b   : >> { %12548 = vmatprep.subr.bf16.mxu1 %v14175_v1 }
 0x60d   : >> { %12517 = vmatmul.mubr.msk.bf16.gmra.mrb[4].mxu1 %vm280_vm3, %v15686_v55 }
 0x60e   : >> { %12520 = vmatprep.mubr.msk.bf16.mxu1 %vm280_vm3, %v15702_v5  ;;  %12549 = vmatpush3.bf16.msra.mxu1 %v14175_v1 }
 0x60f   : >> { %12550 = vmatprep.subr.bf16.mxu1 %v14176_v22 }
 0x612   : >> { %12551 = vmatpush3.bf16.msra.mxu1 %v14176_v22 }
 0x613   : >> { %12584 = vmatprep.subr.bf16.mxu1 %v14177_v61 }
 0x615   : >> { %12521 = vmatmul.mubr.msk.bf16.gmra.mrb[8].mxu1 %vm280_vm3, %v15706_v4 }
 0x616   : >> { %12524 = vmatprep.mubr.msk.bf16.mxu1 %vm280_vm3, %v15719_v29 }
 0x61d   : >> { %12525 = vmatmul.mubr.msk.bf16.gmra.mrb[12].mxu1 %vm280_vm3, %v15722_v9 }
 0x61e   : >> { %12528 = vmatprep.mubr.msk.bf16.mxu1 %vm280_vm3, %v15735_v42 }
 0x625   : >> { %12529 = vmatmul.mubr.msk.bf16.gmra.mrb[16].mxu1 %vm280_vm3, %v15738_v38 }
 0x626   : >> { %12532 = vmatprep.mubr.msk.bf16.mxu1 %vm280_vm3, %v15751_v39 }
 0x62d   : >> { %12533 = vmatmul.mubr.msk.bf16.gmra.mrb[20].mxu1 %vm280_vm3, %v15754_v40 }
 0x62e   : >> { %12536 = vmatprep.mubr.msk.bf16.mxu1 %vm280_vm3, %v15767_v11 }
 0x635   : >> { %12537 = vmatmul.mubr.msk.bf16.gmra.mrb[24].mxu1 %vm280_vm3, %v15769_v3 }
 0x636   : >> { %12540 = vmatprep.mubr.msk.bf16.mxu1 %vm280_vm3, %v15775_v58 }
 0x63d   : >> { %12541 = vmatmul.mubr.msk.bf16.gmra.mrb[28].mxu1 %vm280_vm3, %v15982_v56 }
 0x63e   : >> { %12552 = vmatprep.mubr.msk.bf16.mxu1 %vm280_vm3, %v15846_v10  ;;  %v14181_v10 = vld [vmem:[%s15218_s13 + $0x200] sm:$0xff]  }
 0x645   : >> { %12553 = vmatmul.mubr.msk.bf16.vlgmr.msra.gmra.mrb[0].mxu1 %vm280_vm3, %v15849_v2 }
 0x646   : >> { %12556 = vmatprep.mubr.msk.bf16.mxu1 %vm280_vm3, %v15856_v35  ;;  %12585 = vmatpush3.bf16.msra.mxu1 %v14177_v61 }
 0x647   : >> { %12586 = vmatprep.subr.bf16.mxu1 %v14178_v20 }
 0x64a   : >> { %12587 = vmatpush3.bf16.msra.mxu1 %v14178_v20 }
 0x64b   : >> { %12588 = vmatprep.subr.bf16.mxu1 %v14179_v8 }
 0x64d   : >> { %12557 = vmatmul.mubr.msk.bf16.gmra.mrb[4].mxu1 %vm280_vm3, %v15859_v13 }
 0x64e   : >> { %12560 = vmatprep.mubr.msk.bf16.mxu1 %vm280_vm3, %v15866_v31  ;;  %12589 = vmatpush3.bf16.msra.mxu1 %v14179_v8 }
 0x64f   : >> { %12590 = vmatprep.subr.bf16.mxu1 %v14180_v21 }
 0x652   : >> { %12591 = vmatpush3.bf16.msra.mxu1 %v14180_v21 }
 0x653   : >> { %12624 = vmatprep.subr.bf16.mxu1 %v14181_v10 }
 0x655   : >> { %12561 = vmatmul.mubr.msk.bf16.gmra.mrb[8].mxu1 %vm280_vm3, %v15868_v52 }
 0x656   : >> { %12564 = vmatprep.mubr.msk.bf16.mxu1 %vm280_vm3, %v15874_v0 }
 0x65d   : >> { %12565 = vmatmul.mubr.msk.bf16.gmra.mrb[12].mxu1 %vm280_vm3, %v15876_v57 }
 0x65e   : >> { %12568 = vmatprep.mubr.msk.bf16.mxu1 %vm280_vm3, %v15882_v25 }
 0x665   : >> { %12569 = vmatmul.mubr.msk.bf16.gmra.mrb[16].mxu1 %vm280_vm3, %v15884_v27 }
 0x666   : >> { %12572 = vmatprep.mubr.msk.bf16.mxu1 %vm280_vm3, %v15890_v59 }
 0x66d   : >> { %12573 = vmatmul.mubr.msk.bf16.gmra.mrb[20].mxu1 %vm280_vm3, %v15892_v14 }
 0x66e   : >> { %12576 = vmatprep.mubr.msk.bf16.mxu1 %vm280_vm3, %v15898_v50 }
 0x675   : >> { %12577 = vmatmul.mubr.msk.bf16.gmra.mrb[24].mxu1 %vm280_vm3, %v15900_v26 }
 0x676   : >> { %12580 = vmatprep.mubr.msk.bf16.mxu1 %vm280_vm3, %v15906_v49 }
 0x67d   : >> { %12581 = vmatmul.mubr.msk.bf16.gmra.mrb[28].mxu1 %vm280_vm3, %v16020_v12 }
 0x67e   : >> { %12592 = vmatprep.mubr.msk.bf16.mxu1 %vm280_vm3, %v15783_v37  ;;  %v14185_v37 = vld [vmem:[%s15218_s13 + $0x220] sm:$0xff]  }
 0x685   : >> { %12593 = vmatmul.mubr.msk.bf16.vlgmr.msra.gmra.mrb[0].mxu1 %vm280_vm3, %v15791_v45  ;;  %v5043_v45 = vld [vmem:[#allocation3 + $0x227] sm:$0xff] }
 0x686   : >> { %12596 = vmatprep.mubr.msk.bf16.mxu1 %vm280_vm3, %v15794_v62  ;;  %12625 = vmatpush3.bf16.msra.mxu1 %v14181_v10  ;;  %v5044_v62 = vld [vmem:[#allocation3 + $0x22f] sm:$0xff] }
 0x687   : >> { %12626 = vmatprep.subr.bf16.mxu1 %v14182_v48 }
 0x68a   : >> { %12627 = vmatpush3.bf16.msra.mxu1 %v14182_v48 }
 0x68b   : >> { %12628 = vmatprep.subr.bf16.mxu1 %v14183_v30 }
 0x68d   : >> { %12597 = vmatmul.mubr.msk.bf16.gmra.mrb[4].mxu1 %vm280_vm3, %v15801_v6  ;;  %v5062_v6 = vpack.c.bf16 %v5044_v62, %v5043_v45 }
 0x68e   : >> { %12600 = vmatprep.mubr.msk.bf16.mxu1 %vm280_vm3, %v15803_v34  ;;  %12629 = vmatpush3.bf16.msra.mxu1 %v14183_v30  ;;  %v14186_v34 = vld [vmem:[%s15218_s13 + $0x228] sm:$0xff]  }
 0x68f   : >> { %12630 = vmatprep.subr.bf16.mxu1 %v14184_v15 }
 0x692   : >> { %12631 = vmatpush3.bf16.msra.mxu1 %v14184_v15 }
 0x693   : >> { %12664 = vmatprep.subr.bf16.mxu1 %v14185_v37 }
 0x695   : >> { %12601 = vmatmul.mubr.msk.bf16.gmra.mrb[8].mxu1 %vm280_vm3, %v15809_v54  ;;  %v14187_v54 = vld [vmem:[%s15218_s13 + $0x230] sm:$0xff]  }
 0x696   : >> { %12604 = vmatprep.mubr.msk.bf16.mxu1 %vm280_vm3, %v15811_v18  ;;  %v14188_v18 = vld [vmem:[%s15218_s13 + $0x238] sm:$0xff]  }
 0x69d   : >> { %12605 = vmatmul.mubr.msk.bf16.gmra.mrb[12].mxu1 %vm280_vm3, %v15817_v24 }
 0x69e   : >> { %12608 = vmatprep.mubr.msk.bf16.mxu1 %vm280_vm3, %v15819_v19 }
 0x6a5   : >> { %12609 = vmatmul.mubr.msk.bf16.gmra.mrb[16].mxu1 %vm280_vm3, %v15825_v16 }
 0x6a6   : >> { %12612 = vmatprep.mubr.msk.bf16.mxu1 %vm280_vm3, %v15827_v46 }
 0x6ad   : >> { %12613 = vmatmul.mubr.msk.bf16.gmra.mrb[20].mxu1 %vm280_vm3, %v15833_v23 }
 0x6ae   : >> { %12616 = vmatprep.mubr.msk.bf16.mxu1 %vm280_vm3, %v15835_v33 }
 0x6b5   : >> { %12617 = vmatmul.mubr.msk.bf16.gmra.mrb[24].mxu1 %vm280_vm3, %v15841_v44 }
 0x6b6   : >> { %12620 = vmatprep.mubr.msk.bf16.mxu1 %vm280_vm3, %v15944_v17 }
 0x6bd   : >> { %12621 = vmatmul.mubr.msk.bf16.gmra.mrb[28].mxu1 %vm280_vm3, %v5062_v6 }
 0x6be   : >> { %12632 = vmatprep.mubr.msk.bf16.mxu1 %vm280_vm3, %v15668_v47  ;;  %v5097_v47 = vld [vmem:[#allocation3 + $0x228] sm:$0xff] }
 0x6c5   : >> { %12633 = vmatmul.mubr.msk.bf16.vlgmr.msra.gmra.mrb[0].mxu1 %vm280_vm3, %v15682_v43  ;;  %v5098_v43 = vld [vmem:[#allocation3 + $0x230] sm:$0xff] }
 0x6c6   : >> { %12636 = vmatprep.mubr.msk.bf16.mxu1 %vm280_vm3, %v15686_v55  ;;  %12665 = vmatpush3.bf16.msra.mxu1 %v14185_v37  ;;  %v5116_v55 = vpack.c.bf16 %v5098_v43, %v5097_v47 }
 0x6c7   : >> { %12666 = vmatprep.subr.bf16.mxu1 %v14186_v34 }
 0x6ca   : >> { %12667 = vmatpush3.bf16.msra.mxu1 %v14186_v34 }
 0x6cb   : >> { %12668 = vmatprep.subr.bf16.mxu1 %v14187_v54 }
 0x6cd   : >> { %12637 = vmatmul.mubr.msk.bf16.gmra.mrb[4].mxu1 %vm280_vm3, %v15702_v5  ;;  %v5151_v5 = vld [vmem:[#allocation3 + $0x229] sm:$0xff] }
 0x6ce   : >> { %12640 = vmatprep.mubr.msk.bf16.mxu1 %vm280_vm3, %v15706_v4  ;;  %12669 = vmatpush3.bf16.msra.mxu1 %v14187_v54  ;;  %v5152_v4 = vld [vmem:[#allocation3 + $0x231] sm:$0xff] }
 0x6cf   : >> { %12670 = vmatprep.subr.bf16.mxu1 %v14188_v18 }
 0x6d2   : >> { %12671 = vmatpush3.bf16.msra.mxu1 %v14188_v18 }
 0x6d5   : >> { %12641 = vmatmul.mubr.msk.bf16.gmra.mrb[8].mxu1 %vm280_vm3, %v15719_v29  ;;  %v5170_v29 = vpack.c.bf16 %v5152_v4, %v5151_v5 }
 0x6d6   : >> { %12644 = vmatprep.mubr.msk.bf16.mxu1 %vm280_vm3, %v15722_v9  ;;  %v16125_v9 = vld [vmem:[%s15643_s19 + $0x1] ss:$0 sm:$0xff] }
 0x6dd   : >> { %12645 = vmatmul.mubr.msk.bf16.gmra.mrb[12].mxu1 %vm280_vm3, %v15735_v42 }
 0x6de   : >> { %12648 = vmatprep.mubr.msk.bf16.mxu1 %vm280_vm3, %v15738_v38 }
 0x6e5   : >> { %12649 = vmatmul.mubr.msk.bf16.gmra.mrb[16].mxu1 %vm280_vm3, %v15751_v39 }
 0x6e6   : >> { %12652 = vmatprep.mubr.msk.bf16.mxu1 %vm280_vm3, %v15754_v40 }
 0x6ed   : >> { %12653 = vmatmul.mubr.msk.bf16.gmra.mrb[20].mxu1 %vm280_vm3, %v15767_v11 }
 0x6ee   : >> { %12656 = vmatprep.mubr.msk.bf16.mxu1 %vm280_vm3, %v15769_v3 }
 0x6f5   : >> { %12657 = vmatmul.mubr.msk.bf16.gmra.mrb[24].mxu1 %vm280_vm3, %v15775_v58 }
 0x6f6   : >> { %12660 = vmatprep.mubr.msk.bf16.mxu1 %vm280_vm3, %v15982_v56 }
 0x6fd   : >> { %12661 = vmatmul.mubr.msk.bf16.gmra.mrb[28].mxu1 %vm280_vm3, %v5116_v55 }
 0x6fe   : >> { %12672 = vmatprep.mubr.msk.bf16.mxu1 %vm280_vm3, %v15849_v2 }
 0x705   : >> { %12673 = vmatmul.mubr.msk.bf16.vlgmr.msra.gmra.mrb[0].mxu1 %vm280_vm3, %v15856_v35 }
 0x706   : >> { %12676 = vmatprep.mubr.msk.bf16.mxu1 %vm280_vm3, %v15859_v13 }
 0x70d   : >> { %12677 = vmatmul.mubr.msk.bf16.gmra.mrb[4].mxu1 %vm280_vm3, %v15866_v31 }
 0x70e   : >> { %12680 = vmatprep.mubr.msk.bf16.mxu1 %vm280_vm3, %v15868_v52 }
 0x715   : >> { %12681 = vmatmul.mubr.msk.bf16.gmra.mrb[8].mxu1 %vm280_vm3, %v15874_v0 }
 0x716   : >> { %12684 = vmatprep.mubr.msk.bf16.mxu1 %vm280_vm3, %v15876_v57 }
 0x71d   : >> { %12685 = vmatmul.mubr.msk.bf16.gmra.mrb[12].mxu1 %vm280_vm3, %v15882_v25 }
 0x71e   : >> { %12688 = vmatprep.mubr.msk.bf16.mxu1 %vm280_vm3, %v15884_v27 }
 0x725   : >> { %12689 = vmatmul.mubr.msk.bf16.gmra.mrb[16].mxu1 %vm280_vm3, %v15890_v59 }
 0x726   : >> { %12692 = vmatprep.mubr.msk.bf16.mxu1 %vm280_vm3, %v15892_v14 }
 0x72d   : >> { %12693 = vmatmul.mubr.msk.bf16.gmra.mrb[20].mxu1 %vm280_vm3, %v15898_v50 }
 0x72e   : >> { %12696 = vmatprep.mubr.msk.bf16.mxu1 %vm280_vm3, %v15900_v26 }
 0x735   : >> { %12697 = vmatmul.mubr.msk.bf16.gmra.mrb[24].mxu1 %vm280_vm3, %v15906_v49 }
 0x736   : >> { %12700 = vmatprep.mubr.msk.bf16.mxu1 %vm280_vm3, %v16020_v12 }
 0x73d   : >> { %12701 = vmatmul.mubr.msk.bf16.gmra.mrb[28].mxu1 %vm280_vm3, %v5170_v29 }
 0x7d8   : >> { %v12674_v42 = vpop.f32.mrb[0].mxu1 }
 0x7d9   : >> { %v7340_v38 = vadd.f32 %v12674_v42, %v16125_v9  ;;  %v7173_v39 = vpop.f32.mrb[1].mxu1 }
 0x7da   : >> { %v7338_v40 = vadd.f32 %v16125_v9, %v7173_v39  ;;  %v12675_v11 = vpop.f32.mrb[2].mxu1 }
 0x7db   : >> { %v7372_v3 = vmax.f32 %v7340_v38, 0.0  ;;  %v7341_v58 = vadd.f32 %v12675_v11, %v16125_v9  ;;  %v7176_v24 = vpop.f32.mrb[3].mxu1 }
 0x7dc   : >> { %v7370_v19 = vmax.f32 %v7338_v40, 0.0  ;;  %v7339_v16 = vadd.f32 %v16125_v9, %v7176_v24 }
 0x7dd   : >> { %7404 = vst.msk [vmem:[#allocation2 + $0x48] sm:$0xff] %vm280_vm3, %v7372_v3  ;;  %v7373_v46 = vmax.f32 %v7341_v58, 0.0 }
 0x7de   : >> { %7402 = vst.msk [vmem:[#allocation2 + $0x28] sm:$0xff] %vm280_vm3, %v7370_v19  ;;  %v7371_v23 = vmax.f32 %v7339_v16, 0.0 }
 0x7df   : >> { %7405 = vst.msk [vmem:[#allocation2 + $0x50] sm:$0xff] %vm280_vm3, %v7373_v46 }
 0x7e0   : >> { %7403 = vst.msk [vmem:[#allocation2 + $0x30] sm:$0xff] %vm280_vm3, %v7371_v23  ;;  %v12678_v33 = vpop.f32.mrb[4].mxu1 }
 0x7e1   : >> { %v7344_v44 = vadd.f32 %v12678_v33, %v16125_v9  ;;  %v7189_v2 = vpop.f32.mrb[5].mxu1 }
 0x7e2   : >> { %v7342_v35 = vadd.f32 %v16125_v9, %v7189_v2  ;;  %v12679_v13 = vpop.f32.mrb[6].mxu1 }
 0x7e3   : >> { %v7376_v31 = vmax.f32 %v7344_v44, 0.0  ;;  %v7345_v52 = vadd.f32 %v12679_v13, %v16125_v9  ;;  %v7192_v0 = vpop.f32.mrb[7].mxu1 }
 0x7e4   : >> { %v7374_v57 = vmax.f32 %v7342_v35, 0.0  ;;  %v7343_v25 = vadd.f32 %v16125_v9, %v7192_v0 }
 0x7e5   : >> { %7408 = vst.msk [vmem:[#allocation2 + $0x88] sm:$0xff] %vm280_vm3, %v7376_v31  ;;  %v7377_v27 = vmax.f32 %v7345_v52, 0.0 }
 0x7e6   : >> { %7406 = vst.msk [vmem:[#allocation2 + $0x68] sm:$0xff] %vm280_vm3, %v7374_v57  ;;  %v7375_v59 = vmax.f32 %v7343_v25, 0.0 }
 0x7e7   : >> { %7409 = vst.msk [vmem:[#allocation2 + $0x90] sm:$0xff] %vm280_vm3, %v7377_v27 }
 0x7e8   : >> { %7407 = vst.msk [vmem:[#allocation2 + $0x70] sm:$0xff] %vm280_vm3, %v7375_v59  ;;  %v12682_v14 = vpop.f32.mrb[8].mxu1 }
 0x7e9   : >> { %v7348_v50 = vadd.f32 %v12682_v14, %v16125_v9  ;;  %v7205_v26 = vpop.f32.mrb[9].mxu1 }
 0x7ea   : >> { %v7346_v49 = vadd.f32 %v16125_v9, %v7205_v26  ;;  %v12683_v41 = vpop.f32.mrb[10].mxu1 }
 0x7eb   : >> { %v7380_v28 = vmax.f32 %v7348_v50, 0.0  ;;  %v7349_v36 = vadd.f32 %v12683_v41, %v16125_v9  ;;  %v7208_v32 = vpop.f32.mrb[11].mxu1 }
 0x7ec   : >> { %v7378_v17 = vmax.f32 %v7346_v49, 0.0  ;;  %v7347_v51 = vadd.f32 %v16125_v9, %v7208_v32 }
 0x7ed   : >> { %7412 = vst.msk [vmem:[#allocation2 + $0xc8] sm:$0xff] %vm280_vm3, %v7380_v28  ;;  %v7381_v1 = vmax.f32 %v7349_v36, 0.0 }
 0x7ee   : >> { %7410 = vst.msk [vmem:[#allocation2 + $0xa8] sm:$0xff] %vm280_vm3, %v7378_v17  ;;  %v7379_v22 = vmax.f32 %v7347_v51, 0.0  ;;  %v16200_v51 = vld [vmem:[%s16867_s5 + $0x80] sm:$0xff] (%p2577_p4)  }
 0x7ef   : >> { %7413 = vst.msk [vmem:[#allocation2 + $0xd0] sm:$0xff] %vm280_vm3, %v7381_v1  ;;  %v14191_v1 = vld [vmem:[%s16867_s5 + $0x28] sm:$0xff] (%p2577_p4)   ;;  %12864 = vmatprep.subr.bf16.mxu0 (%p2577_p4), %v16200_v51 }
 0x7f0   : >> { %7411 = vst.msk [vmem:[#allocation2 + $0xb0] sm:$0xff] %vm280_vm3, %v7379_v22  ;;  %v12686_v61 = vpop.f32.mrb[12].mxu1  ;;  %v16209_v22 = vld [vmem:[%s16867_s5 + $0x88] sm:$0xff] (%p2577_p4)   ;;  %12865 = vmatpush3.bf16.msra.mxu0 (%p2577_p4), %v16200_v51 }
 0x7f1   : >> { %v7352_v60 = vadd.f32 %v12686_v61, %v16125_v9  ;;  %v7221_v63 = vpop.f32.mrb[13].mxu1  ;;  %v14193_v61 = vld [vmem:[%s16867_s5 + $0x30] sm:$0xff] (%p2577_p4)   ;;  %12866 = vmatprep.subr.bf16.mxu0 (%p2577_p4), %v16209_v22 }
 0x7f2   : >> { %v7350_v56 = vadd.f32 %v16125_v9, %v7221_v63  ;;  %v12687_v20 = vpop.f32.mrb[14].mxu1  ;;  %v14195_v63 = vld [vmem:[%s16867_s5 + $0x38] sm:$0xff] (%p2577_p4)  }
 0x7f3   : >> { %v7384_v8 = vmax.f32 %v7352_v60, 0.0  ;;  %v7353_v21 = vadd.f32 %v12687_v20, %v16125_v9  ;;  %v7224_v10 = vpop.f32.mrb[15].mxu1  ;;  %v16219_v60 = vld [vmem:[%s16867_s5 + $0x90] sm:$0xff] (%p2577_p4)   ;;  %v7488_v20 = vld [vmem:[#allocation2 + $0x8] sm:$0xff] (%p2577_p4) }
 0x7f4   : >> { %v7382_v53 = vmax.f32 %v7350_v56, 0.0  ;;  %v7351_v7 = vadd.f32 %v16125_v9, %v7224_v10  ;;  %v16227_v56 = vld [vmem:[%s16867_s5 + $0x98] sm:$0xff] (%p2577_p4)   ;;  %12867 = vmatpush3.bf16.msra.mxu0 (%p2577_p4), %v16209_v22 }
 0x7f5   : >> { %7416 = vst.msk [vmem:[#allocation2 + $0x108] sm:$0xff] %vm280_vm3, %v7384_v8  ;;  %v7385_v12 = vmax.f32 %v7353_v21, 0.0  ;;  %v7489_v8 = vld [vmem:[#allocation2 + $0x10] sm:$0xff] (%p2577_p4)  ;;  %v7490_v21 = vld [vmem:[#allocation2 + $0x28] sm:$0xff] (%p2577_p4)  ;;  %12868 = vmatprep.subr.bf16.mxu0 (%p2577_p4), %v16219_v60 }
 0x7f6   : >> { %7414 = vst.msk [vmem:[#allocation2 + $0xe8] sm:$0xff] %vm280_vm3, %v7382_v53  ;;  %v7383_v48 = vmax.f32 %v7351_v7, 0.0  ;;  %v7524_v10 = vpack.c.bf16 (%p2577_p4), %v7489_v8, %v7488_v20  ;;  %v7491_v53 = vld [vmem:[#allocation2 + $0x30] sm:$0xff] (%p2577_p4) }
 0x7f7   : >> { %7417 = vst.msk [vmem:[#allocation2 + $0x110] sm:$0xff] %vm280_vm3, %v7385_v12  ;;  %v7525_v7 = vpack.c.bf16 (%p2577_p4), %v7491_v53, %v7490_v21  ;;  %v14197_v12 = vld [vmem:[%s16867_s5] sm:$0xff] (%p2577_p4)   ;;  %v7553_v20 = vld [vmem:[#allocation2 + $0xb1] sm:$0xff] (%p2577_p4) }
 0x7f8   : >> { %7415 = vst.msk [vmem:[#allocation2 + $0xf0] sm:$0xff] %vm280_vm3, %v7383_v48  ;;  %v12690_v30 = vpop.f32.mrb[16].mxu1  ;;  %12712 = vmatprep.mubr.msk.bf16.mxu1 (%p2577_p4), %vm280_vm3, %v7524_v10  ;;  %12869 = vmatpush3.bf16.msra.mxu0 (%p2577_p4), %v16219_v60  ;;  %v7492_v48 = vld [vmem:[#allocation2 + $0x48] sm:$0xff] (%p2577_p4)  ;;  %v14208_v8 = vld [vmem:[%s16867_s5 + $0xd0] sm:$0xff] (%p2577_p4)  }
 0x7f9   : >> { %v7356_v15 = vadd.f32 %v12690_v30, %v16125_v9  ;;  %v7237_v37 = vpop.f32.mrb[17].mxu1  ;;  %v7493_v30 = vld [vmem:[#allocation2 + $0x50] sm:$0xff] (%p2577_p4)  ;;  %12870 = vmatprep.subr.bf16.mxu0 (%p2577_p4), %v16227_v56  ;;  %12872 = vmatprep.mubr.msk.bf16.mxu0 (%p2577_p4), %vm280_vm3, %v7525_v7 }
 0x7fa   : >> { %v7354_v45 = vadd.f32 %v16125_v9, %v7237_v37  ;;  %v12691_v62 = vpop.f32.mrb[18].mxu1  ;;  %v7494_v37 = vld [vmem:[#allocation2 + $0x68] sm:$0xff] (%p2577_p4) }
 0x7fb   : >> { %v7388_v6 = vmax.f32 %v7356_v15, 0.0  ;;  %v7357_v34 = vadd.f32 %v12691_v62, %v16125_v9  ;;  %v7240_v54 = vpop.f32.mrb[19].mxu1  ;;  %v14198_v15 = vld [vmem:[%s16867_s5 + $0xa0] sm:$0xff] (%p2577_p4)   ;;  %v16241_v62 = vpack.c.bf16 (%p2577_p4), %v7493_v30, %v7492_v48  ;;  %v14210_v30 = vld [vmem:[%s16867_s5 + $0xd8] sm:$0xff] (%p2577_p4)  }
 0x7fc   : >> { %v7386_v18 = vmax.f32 %v7354_v45, 0.0  ;;  %v7355_v47 = vadd.f32 %v16125_v9, %v7240_v54  ;;  %v7495_v45 = vld [vmem:[#allocation2 + $0x70] sm:$0xff] (%p2577_p4)  ;;  %12871 = vmatpush3.bf16.msra.mxu0 (%p2577_p4), %v16227_v56  ;;  %v14200_v54 = vld [vmem:[%s16867_s5 + $0x8] sm:$0xff] (%p2577_p4)  }
 0x7fd   : >> { %7420 = vst.msk [vmem:[#allocation2 + $0x148] sm:$0xff] %vm280_vm3, %v7388_v6  ;;  %v7389_v43 = vmax.f32 %v7357_v34, 0.0  ;;  %12904 = vmatprep.subr.bf16.mxu0 (%p2577_p4), %v14198_v15  ;;  %v16244_v6 = vpack.c.bf16 (%p2577_p4), %v7495_v45, %v7494_v37  ;;  %v14199_v34 = vld [vmem:[%s16867_s5 + $0xa8] sm:$0xff] (%p2577_p4)   ;;  %v7555_v37 = vld [vmem:[#allocation2 + $0xd1] sm:$0xff] (%p2577_p4) }
 0x7fe   : >> { %7418 = vst.msk [vmem:[#allocation2 + $0x128] sm:$0xff] %vm280_vm3, %v7386_v18  ;;  %v7387_v55 = vmax.f32 %v7355_v47, 0.0  ;;  %v7496_v18 = vld [vmem:[#allocation2 + $0x88] sm:$0xff] (%p2577_p4)  ;;  %v7497_v47 = vld [vmem:[#allocation2 + $0x90] sm:$0xff] (%p2577_p4) }
 0x7ff   : >> { %7421 = vst.msk [vmem:[#allocation2 + $0x150] sm:$0xff] %vm280_vm3, %v7389_v43  ;;  %12873 = vmatmul.mubr.msk.bf16.vlgmr.msra.gmra.mrb[0].mxu0 (%p2577_p4), %vm280_vm3, %v16241_v62  ;;  %v7498_v43 = vld [vmem:[#allocation2 + $0xa8] sm:$0xff] (%p2577_p4) }
 0x800   : >> { %7419 = vst.msk [vmem:[#allocation2 + $0x130] sm:$0xff] %vm280_vm3, %v7387_v55  ;;  %v12694_v5 = vpop.f32.mrb[20].mxu1  ;;  %12905 = vmatpush3.bf16.msra.mxu0 (%p2577_p4), %v14198_v15  ;;  %v7499_v55 = vld [vmem:[#allocation2 + $0xb0] sm:$0xff] (%p2577_p4)  ;;  %12876 = vmatprep.mubr.msk.bf16.mxu0 (%p2577_p4), %vm280_vm3, %v16244_v6 }
 0x801   : >> { %v7360_v4 = vadd.f32 %v12694_v5, %v16125_v9  ;;  %v7253_v29 = vpop.f32.mrb[21].mxu1  ;;  %12906 = vmatprep.subr.bf16.mxu0 (%p2577_p4), %v14199_v34  ;;  %v14201_v5 = vld [vmem:[%s16867_s5 + $0xb0] sm:$0xff] (%p2577_p4)  }
 0x802   : >> { %v7358_v42 = vadd.f32 %v16125_v9, %v7253_v29  ;;  %v12695_v38 = vpop.f32.mrb[22].mxu1  ;;  %v16265_v29 = vpack.c.bf16 (%p2577_p4), %v7497_v47, %v7496_v18  ;;  %v7554_v15 = vld [vmem:[#allocation2 + $0xc9] sm:$0xff] (%p2577_p4)  ;;  %v7557_v18 = vld [vmem:[#allocation2 + $0xf1] sm:$0xff] (%p2577_p4)  ;;  %v16360_v47 = vld [vmem:[%s16867_s5 + $0xe0] sm:$0xff] (%p2577_p4)  }
 0x803   : >> { %v7392_v39 = vmax.f32 %v7360_v4, 0.0  ;;  %v7361_v40 = vadd.f32 %v12695_v38, %v16125_v9  ;;  %v7256_v11 = vpop.f32.mrb[23].mxu1  ;;  %v14203_v4 = vld [vmem:[%s16867_s5 + $0x10] sm:$0xff] (%p2577_p4)   ;;  %v14202_v38 = vld [vmem:[%s16867_s5 + $0xb8] sm:$0xff] (%p2577_p4)  }
 0x804   : >> { %v7390_v3 = vmax.f32 %v7358_v42, 0.0  ;;  %v7359_v58 = vadd.f32 %v16125_v9, %v7256_v11  ;;  %12907 = vmatpush3.bf16.msra.mxu0 (%p2577_p4), %v14199_v34  ;;  %v16267_v42 = vpack.c.bf16 (%p2577_p4), %v7499_v55, %v7498_v43  ;;  %v7502_v11 = vld [vmem:[#allocation2 + $0xe8] sm:$0xff] (%p2577_p4)  ;;  %v16364_v55 = vpack.c.bf16 (%p2577_p4), %v7555_v37, %v7554_v15 }
 0x805   : >> { %7424 = vst.msk [vmem:[#allocation2 + $0x188] sm:$0xff] %vm280_vm3, %v7392_v39  ;;  %v7393_v24 = vmax.f32 %v7361_v40, 0.0  ;;  %12908 = vmatprep.subr.bf16.mxu0 (%p2577_p4), %v14201_v5  ;;  %v7500_v39 = vld [vmem:[#allocation2 + $0xc8] sm:$0xff] (%p2577_p4)  ;;  %v7501_v40 = vld [vmem:[#allocation2 + $0xd0] sm:$0xff] (%p2577_p4) }
 0x806   : >> { %7422 = vst.msk [vmem:[#allocation2 + $0x168] sm:$0xff] %vm280_vm3, %v7390_v3  ;;  %v7391_v19 = vmax.f32 %v7359_v58, 0.0  ;;  %v7503_v3 = vld [vmem:[#allocation2 + $0xf0] sm:$0xff] (%p2577_p4)  ;;  %v14204_v58 = vld [vmem:[%s16867_s5 + $0xc0] sm:$0xff] (%p2577_p4)  }
 0x807   : >> { %7425 = vst.msk [vmem:[#allocation2 + $0x190] sm:$0xff] %vm280_vm3, %v7393_v24  ;;  %12877 = vmatmul.mubr.msk.bf16.gmra.mrb[4].mxu0 (%p2577_p4), %vm280_vm3, %v16265_v29  ;;  %v14205_v24 = vld [vmem:[%s16867_s5 + $0x18] sm:$0xff] (%p2577_p4)  }
 0x808   : >> { %7423 = vst.msk [vmem:[#allocation2 + $0x170] sm:$0xff] %vm280_vm3, %v7391_v19  ;;  %v12698_v16 = vpop.f32.mrb[24].mxu1  ;;  %12880 = vmatprep.mubr.msk.bf16.mxu0 (%p2577_p4), %vm280_vm3, %v16267_v42  ;;  %12909 = vmatpush3.bf16.msra.mxu0 (%p2577_p4), %v14201_v5  ;;  %v16286_v19 = vpack.c.bf16 (%p2577_p4), %v7501_v40, %v7500_v39  ;;  %v7558_v40 = vld [vmem:[#allocation2 + $0x109] sm:$0xff] (%p2577_p4) }
 0x809   : >> { %v7364_v46 = vadd.f32 %v12698_v16, %v16125_v9  ;;  %v7269_v23 = vpop.f32.mrb[25].mxu1  ;;  %12910 = vmatprep.subr.bf16.mxu0 (%p2577_p4), %v14202_v38  ;;  %v16288_v16 = vpack.c.bf16 (%p2577_p4), %v7503_v3, %v7502_v11  ;;  %v7559_v11 = vld [vmem:[#allocation2 + $0x111] sm:$0xff] (%p2577_p4)  ;;  %v7434_v3 = vld [vmem:[#allocation2 + $0x7] sm:$0xff] (%p2577_p4) }
 0x80a   : >> { %v7362_v33 = vadd.f32 %v16125_v9, %v7269_v23  ;;  %v12699_v44 = vpop.f32.mrb[26].mxu1  ;;  %v7505_v23 = vld [vmem:[#allocation2 + $0x110] sm:$0xff] (%p2577_p4) }
 0x80b   : >> { %v7396_v2 = vmax.f32 %v7364_v46, 0.0  ;;  %v7365_v35 = vadd.f32 %v12699_v44, %v16125_v9  ;;  %v7272_v13 = vpop.f32.mrb[27].mxu1  ;;  %v7504_v46 = vld [vmem:[#allocation2 + $0x108] sm:$0xff] (%p2577_p4) }
 0x80c   : >> { %v7394_v31 = vmax.f32 %v7362_v33, 0.0  ;;  %v7363_v52 = vadd.f32 %v16125_v9, %v7272_v13  ;;  %12911 = vmatpush3.bf16.msra.mxu0 (%p2577_p4), %v14202_v38  ;;  %v16301_v33 = vld [vmem:[%s16867_s5 + $0x40] sm:$0xff] (%p2577_p4)   ;;  %v7544_v44 = vld [vmem:[#allocation2 + $0x29] sm:$0xff] (%p2577_p4) }
 0x80d   : >> { %7428 = vst.msk [vmem:[#allocation2 + $0x1c8] sm:$0xff] %vm280_vm3, %v7396_v2  ;;  %v7397_v0 = vmax.f32 %v7365_v35, 0.0  ;;  %12944 = vmatprep.subr.bf16.mxu0 (%p2577_p4), %v14204_v58  ;;  %v7545_v2 = vld [vmem:[#allocation2 + $0x31] sm:$0xff] (%p2577_p4)  ;;  %v16304_v35 = vpack.c.bf16 (%p2577_p4), %v7505_v23, %v7504_v46 }
 0x80e   : >> { %7426 = vst.msk [vmem:[#allocation2 + $0x1a8] sm:$0xff] %vm280_vm3, %v7394_v31  ;;  %v7395_v57 = vmax.f32 %v7363_v52, 0.0  ;;  %v16306_v13 = vpack.c.bf16 (%p2577_p4), %v7545_v2, %v7544_v44  ;;  %v7506_v31 = vld [vmem:[#allocation2 + $0x128] sm:$0xff] (%p2577_p4)  ;;  %v7507_v52 = vld [vmem:[#allocation2 + $0x130] sm:$0xff] (%p2577_p4)  ;;  %v16381_v44 = vpack.c.bf16 (%p2577_p4), %v7559_v11, %v7558_v40 }
 0x80f   : >> { %7429 = vst.msk [vmem:[#allocation2 + $0x1d0] sm:$0xff] %vm280_vm3, %v7397_v0  ;;  %12881 = vmatmul.mubr.msk.bf16.gmra.mrb[8].mxu0 (%p2577_p4), %vm280_vm3, %v16286_v19  ;;  %v7546_v0 = vld [vmem:[#allocation2 + $0x49] sm:$0xff] (%p2577_p4)  ;;  %v7561_v46 = vld [vmem:[#allocation2 + $0x131] sm:$0xff] (%p2577_p4) }
 0x810   : >> { %7427 = vst.msk [vmem:[#allocation2 + $0x1b0] sm:$0xff] %vm280_vm3, %v7395_v57  ;;  %v12702_v25 = vpop.f32.mrb[28].mxu1  ;;  %12884 = vmatprep.mubr.msk.bf16.mxu0 (%p2577_p4), %vm280_vm3, %v16288_v16  ;;  %v7547_v57 = vld [vmem:[#allocation2 + $0x51] sm:$0xff] (%p2577_p4) }
 0x811   : >> { %v7368_v27 = vadd.f32 %v12702_v25, %v16125_v9  ;;  %v7285_v59 = vpop.f32.mrb[29].mxu1  ;;  %v7508_v25 = vld [vmem:[#allocation2 + $0x148] sm:$0xff] (%p2577_p4) }
 0x812   : >> { %v7366_v14 = vadd.f32 %v16125_v9, %v7285_v59  ;;  %v12703_v50 = vpop.f32.mrb[30].mxu1  ;;  %2579 = sbr.rel (!%p2577_p4) target bundleno = 524 (0x20c), region = 124  ;;  %v7548_v59 = vld [vmem:[#allocation2 + $0x69] sm:$0xff] (%p2577_p4) }
 0x813   : >> { %v7400_v26 = vmax.f32 %v7368_v27, 0.0  ;;  %v7369_v49 = vadd.f32 %v12703_v50, %v16125_v9  ;;  %v7288_v41 = vpop.f32.mrb[31].mxu1  ;;  %v7509_v27 = vld [vmem:[#allocation2 + $0x150] sm:$0xff] (%p2577_p4)  ;;  %v16316_v50 = vpack.c.bf16 (%p2577_p4), %v7507_v52, %v7506_v31  ;;  %v7436_v52 = vld [vmem:[#allocation2 + $0x27] sm:$0xff] (%p2577_p4) }
 0x814   : >> { %v7398_v28 = vmax.f32 %v7366_v14, 0.0  ;;  %v7367_v36 = vadd.f32 %v16125_v9, %v7288_v41  ;;  %v14189_v9 = vld [vmem:[%s16867_s5 + $0x20] sm:$0xff] (%p2577_p4)   ;;  %v7549_v14 = vld [vmem:[#allocation2 + $0x71] sm:$0xff] (%p2577_p4)  ;;  %v7516_v45 = vld [vmem:[#allocation2 + $0x1c8] sm:$0xff] (%p2577_p4) }
 0x815   : >> { %7432 = vst.msk [vmem:[#allocation2 + $0x208] sm:$0xff] %vm280_vm3, %v7400_v26  ;;  %v7401_v32 = vmax.f32 %v7369_v49, 0.0  ;;  %12704 = vmatprep.subr.bf16.mxu1 (%p2577_p4), %v14189_v9  ;;  %v16318_v26 = vpack.c.bf16 (%p2577_p4), %v7547_v57, %v7546_v0  ;;  %v16320_v49 = vpack.c.bf16 (%p2577_p4), %v7509_v27, %v7508_v25  ;;  %v16322_v41 = vpack.c.bf16 (%p2577_p4), %v7549_v14, %v7548_v59  ;;  %v7437_v0 = vld [vmem:[#allocation2 + $0x2f] sm:$0xff] (%p2577_p4)  ;;  %v7438_v27 = vld [vmem:[#allocation2 + $0x47] sm:$0xff] (%p2577_p4) }
 0x816   : >> { %7430 = vst.msk [vmem:[#allocation2 + $0x1e8] sm:$0xff] %vm280_vm3, %v7398_v28  ;;  %v7399_v17 = vmax.f32 %v7367_v36, 0.0  ;;  %12705 = vmatpush3.bf16.msra.mxu1 (%p2577_p4), %v14189_v9  ;;  %v7510_v28 = vld [vmem:[#allocation2 + $0x168] sm:$0xff] (%p2577_p4)  ;;  %v7551_v9 = vld [vmem:[#allocation2 + $0x91] sm:$0xff] (%p2577_p4) }
 0x817   : >> { %7433 = vst.msk [vmem:[#allocation2 + $0x210] sm:$0xff] %vm280_vm3, %v7401_v32  ;;  %12706 = vmatprep.subr.bf16.mxu1 (%p2577_p4), %v14191_v1  ;;  %12885 = vmatmul.mubr.msk.bf16.gmra.mrb[12].mxu0 (%p2577_p4), %vm280_vm3, %v16304_v35  ;;  %v14206_v36 = vld [vmem:[%s16867_s5 + $0xc8] sm:$0xff] (%p2577_p4)   ;;  %v7511_v32 = vld [vmem:[#allocation2 + $0x170] sm:$0xff] (%p2577_p4) }
 0x818   : >> { %7431 = vst.msk [vmem:[#allocation2 + $0x1f0] sm:$0xff] %vm280_vm3, %v7399_v17  ;;  %12912 = vmatprep.mubr.msk.bf16.mxu0 (%p2577_p4), %vm280_vm3, %v16306_v13  ;;  %v7550_v17 = vld [vmem:[#allocation2 + $0x89] sm:$0xff] (%p2577_p4)  ;;  %v16338_v21 = vpack.c.bf16 (%p2577_p4), %v7511_v32, %v7510_v28  ;;  %v7563_v25 = vld [vmem:[#allocation2 + $0x151] sm:$0xff] (%p2577_p4) }
 0x819   : > { %v16340_v10 = vpack.c.bf16 %v7551_v9, %v7550_v17  ;;  %v7515_v48 = vld [vmem:[#allocation2 + $0x1b0] sm:$0xff] }
 0x81a   : > { %12707 = vmatpush3.bf16.msra.mxu1 %v14191_v1  ;;  %v7512_v1 = vld [vmem:[#allocation2 + $0x188] sm:$0xff]  ;;  %v7517_v34 = vld [vmem:[#allocation2 + $0x1d0] sm:$0xff] }
 0x81b   : > { %12708 = vmatprep.subr.bf16.mxu1 %v14193_v61  ;;  %v16366_v5 = vpack.c.bf16 %v7517_v34, %v7516_v45  ;;  %v7562_v57 = vld [vmem:[#allocation2 + $0x149] sm:$0xff]  ;;  %v7565_v28 = vld [vmem:[#allocation2 + $0x171] sm:$0xff] }
 0x81c   : > { %v7439_v59 = vld [vmem:[#allocation2 + $0x4f] sm:$0xff]  ;;  %v16394_v32 = vpack.c.bf16 %v7563_v25, %v7562_v57 }
 0x81d   : > { %v7518_v38 = vld [vmem:[#allocation2 + $0x1e8] sm:$0xff]  ;;  %v16396_v17 = vpack.c.bf16 %v7439_v59, %v7438_v27  ;;  %v7569_v37 = vld [vmem:[#allocation2 + $0x1b1] sm:$0xff] }
 0x81e   : > { %12709 = vmatpush3.bf16.msra.mxu1 %v14193_v61  ;;  %v7513_v61 = vld [vmem:[#allocation2 + $0x190] sm:$0xff]  ;;  %v7448_v27 = vld [vmem:[#allocation2 + $0xe7] sm:$0xff] }
 0x81f   : > { %12710 = vmatprep.subr.bf16.mxu1 %v14195_v63  ;;  %12913 = vmatmul.mubr.msk.bf16.vlgmr.msra.gmra.mrb[0].mxu0 %vm280_vm3, %v16318_v26  ;;  %v16342_v53 = vpack.c.bf16 %v7513_v61, %v7512_v1  ;;  %v7519_v39 = vld [vmem:[#allocation2 + $0x1f0] sm:$0xff]  ;;  %v14209_v1 = vld [vmem:[%s16867_s5 + $0x48] sm:$0xff]  }
 0x820   : > { %12945 = vmatpush3.bf16.msra.mxu0 %v14204_v58  ;;  %12916 = vmatprep.mubr.msk.bf16.mxu0 %vm280_vm3, %v16322_v41  ;;  %v7435_v58 = vld [vmem:[#allocation2 + $0xf] sm:$0xff]  ;;  %v16379_v23 = vpack.c.bf16 %v7519_v39, %v7518_v38  ;;  %v7440_v61 = vld [vmem:[#allocation2 + $0x67] sm:$0xff] }
 0x821   : > { %12946 = vmatprep.subr.bf16.mxu0 %v14206_v36  ;;  %v7470_v2 = vpack.c.bf16 %v7435_v58, %v7434_v3  ;;  %v7564_v14 = vld [vmem:[#allocation2 + $0x169] sm:$0xff]  ;;  %v7571_v11 = vld [vmem:[#allocation2 + $0x1d1] sm:$0xff] }
 0x822   : > { %12711 = vmatpush3.bf16.msra.mxu1 %v14195_v63  ;;  %v7552_v63 = vld [vmem:[#allocation2 + $0xa9] sm:$0xff]  ;;  %v16398_v9 = vpack.c.bf16 %v7565_v28, %v7564_v14  ;;  %v7575_v28 = vld [vmem:[#allocation2 + $0x211] sm:$0xff] }
 0x823   : > { %12744 = vmatprep.subr.bf16.mxu1 %v14197_v12  ;;  %v7568_v15 = vld [vmem:[#allocation2 + $0x1a9] sm:$0xff] }
 0x824   : > { %12947 = vmatpush3.bf16.msra.mxu0 %v14206_v36  ;;  %v16392_v36 = vpack.c.bf16 %v7437_v0, %v7436_v52  ;;  %v7444_v38 = vld [vmem:[#allocation2 + $0xa7] sm:$0xff]  ;;  %v7445_v39 = vld [vmem:[#allocation2 + $0xaf] sm:$0xff] }
 0x825   : > { %12713 = vmatmul.mubr.msk.bf16.vlgmr.msra.gmra.mrb[0].mxu1 %vm280_vm3, %v7525_v7  ;;  %v16344_v7 = vpack.c.bf16 %v7553_v20, %v7552_v63  ;;  %12948 = vmatprep.subr.bf16.mxu0 %v14208_v8  ;;  %v7441_v63 = vld [vmem:[#allocation2 + $0x6f] sm:$0xff]  ;;  %v7446_v3 = vld [vmem:[#allocation2 + $0xc7] sm:$0xff]  ;;  %v16439_v52 = vpack.c.bf16 %v7445_v39, %v7444_v38 }
 0x826   : > { %12745 = vmatpush3.bf16.msra.mxu1 %v14197_v12  ;;  %12716 = vmatprep.mubr.msk.bf16.mxu1 %vm280_vm3, %v16241_v62  ;;  %v7514_v12 = vld [vmem:[#allocation2 + $0x1a8] sm:$0xff]  ;;  %v16415_v45 = vpack.c.bf16 %v7441_v63, %v7440_v61 }
 0x827   : > { %12746 = vmatprep.subr.bf16.mxu1 %v14200_v54  ;;  %12917 = vmatmul.mubr.msk.bf16.gmra.mrb[4].mxu0 %vm280_vm3, %v16340_v10  ;;  %v16362_v43 = vpack.c.bf16 %v7515_v48, %v7514_v12  ;;  %v7566_v20 = vld [vmem:[#allocation2 + $0x189] sm:$0xff] }
 0x828   : > { %12920 = vmatprep.mubr.msk.bf16.mxu0 %vm280_vm3, %v16344_v7  ;;  %12949 = vmatpush3.bf16.msra.mxu0 %v14208_v8  ;;  %v7567_v8 = vld [vmem:[#allocation2 + $0x191] sm:$0xff]  ;;  %v7442_v12 = vld [vmem:[#allocation2 + $0x87] sm:$0xff] }
 0x829   : > { %12950 = vmatprep.subr.bf16.mxu0 %v14210_v30  ;;  %v7443_v48 = vld [vmem:[#allocation2 + $0x8f] sm:$0xff]  ;;  %v7456_v39 = vld [vmem:[#allocation2 + $0x167] sm:$0xff] }
 0x82a   : > { %12747 = vmatpush3.bf16.msra.mxu1 %v14200_v54  ;;  %v7556_v54 = vld [vmem:[#allocation2 + $0xe9] sm:$0xff]  ;;  %v16419_v34 = vpack.c.bf16 %v7443_v48, %v7442_v12 }
 0x82b   : > { %12748 = vmatprep.subr.bf16.mxu1 %v14203_v4  ;;  %v7570_v40 = vld [vmem:[#allocation2 + $0x1c9] sm:$0xff] }
 0x82c   : > { %12951 = vmatpush3.bf16.msra.mxu0 %v14210_v30  ;;  %v14211_v30 = vld [vmem:[%s16867_s5 + $0x50] sm:$0xff]   ;;  %v16441_v0 = vpack.c.bf16 %v7571_v11, %v7570_v40  ;;  %v7452_v12 = vld [vmem:[#allocation2 + $0x127] sm:$0xff] }
 0x82d   : > { %12717 = vmatmul.mubr.msk.bf16.gmra.mrb[4].mxu1 %vm280_vm3, %v16244_v6  ;;  %12984 = vmatprep.subr.bf16.mxu0 %v16360_v47  ;;  %v7447_v58 = vld [vmem:[#allocation2 + $0xcf] sm:$0xff]  ;;  %v7458_v11 = vld [vmem:[#allocation2 + $0x187] sm:$0xff] }
 0x82e   : > { %12720 = vmatprep.mubr.msk.bf16.mxu1 %vm280_vm3, %v16265_v29  ;;  %12749 = vmatpush3.bf16.msra.mxu1 %v14203_v4  ;;  %v16368_v4 = vpack.c.bf16 %v7557_v18, %v7556_v54  ;;  %v16421_v54 = vpack.c.bf16 %v7569_v37, %v7568_v15  ;;  %v14213_v18 = vld [vmem:[%s16867_s5 + $0x58] sm:$0xff]   ;;  %v16443_v57 = vpack.c.bf16 %v7447_v58, %v7446_v3  ;;  %v7449_v59 = vld [vmem:[#allocation2 + $0xef] sm:$0xff] }
 0x82f   : > { %12750 = vmatprep.subr.bf16.mxu1 %v14205_v24  ;;  %12921 = vmatmul.mubr.msk.bf16.gmra.mrb[8].mxu0 %vm280_vm3, %v16364_v55  ;;  %v7574_v14 = vld [vmem:[#allocation2 + $0x209] sm:$0xff]  ;;  %v16456_v63 = vpack.c.bf16 %v7449_v59, %v7448_v27 }
 0x830   : > { %12924 = vmatprep.mubr.msk.bf16.mxu0 %vm280_vm3, %v16368_v4  ;;  %v7451_v61 = vld [vmem:[#allocation2 + $0x10f] sm:$0xff]  ;;  %v7460_v27 = vld [vmem:[#allocation2 + $0x1a7] sm:$0xff] }
 0x831   : > { %v7453_v48 = vld [vmem:[#allocation2 + $0x12f] sm:$0xff] }
 0x832   : > { %12751 = vmatpush3.bf16.msra.mxu1 %v14205_v24  ;;  %v7560_v24 = vld [vmem:[#allocation2 + $0x129] sm:$0xff]  ;;  %v16470_v37 = vpack.c.bf16 %v7453_v48, %v7452_v12 }
 0x833   : > { %12784 = vmatprep.subr.bf16.mxu1 %v16301_v33  ;;  %v16383_v31 = vpack.c.bf16 %v7561_v46, %v7560_v24  ;;  %v7572_v24 = vld [vmem:[#allocation2 + $0x1e9] sm:$0xff]  ;;  %v7573_v46 = vld [vmem:[#allocation2 + $0x1f1] sm:$0xff] }
 0x834   : > { %v16445_v25 = vpack.c.bf16 %v7573_v46, %v7572_v24  ;;  %v7455_v15 = vld [vmem:[#allocation2 + $0x14f] sm:$0xff]  ;;  %v7464_v48 = vld [vmem:[#allocation2 + $0x1e7] sm:$0xff] }
 0x835   : > { %12721 = vmatmul.mubr.msk.bf16.gmra.mrb[8].mxu1 %vm280_vm3, %v16267_v42  ;;  %v14214_v38 = vld [vmem:[%s16867_s5 + $0xe8] sm:$0xff]   ;;  %v14216_v58 = vld [vmem:[%s16867_s5 + $0xf0] sm:$0xff]  }
 0x836   : > { %12724 = vmatprep.mubr.msk.bf16.mxu1 %vm280_vm3, %v16286_v19  ;;  %v7457_v40 = vld [vmem:[#allocation2 + $0x16f] sm:$0xff] }
 0x837   : > { %12925 = vmatmul.mubr.msk.bf16.gmra.mrb[12].mxu0 %vm280_vm3, %v16381_v44  ;;  %v7459_v3 = vld [vmem:[#allocation2 + $0x18f] sm:$0xff]  ;;  %v16489_v24 = vpack.c.bf16 %v7457_v40, %v7456_v39 }
 0x838   : > { %12928 = vmatprep.mubr.msk.bf16.mxu0 %vm280_vm3, %v16383_v31  ;;  %v16491_v46 = vpack.c.bf16 %v7459_v3, %v7458_v11  ;;  %v7461_v59 = vld [vmem:[#allocation2 + $0x1af] sm:$0xff] }
 0x839   : > { %v14217_v11 = vld [vmem:[%s16867_s5 + $0x68] sm:$0xff]   ;;  %v14219_v3 = vld [vmem:[%s16867_s5 + $0x70] sm:$0xff]  }
 0x83d   : > { %12725 = vmatmul.mubr.msk.bf16.gmra.mrb[12].mxu1 %vm280_vm3, %v16288_v16 }
 0x83e   : > { %12728 = vmatprep.mubr.msk.bf16.mxu1 %vm280_vm3, %v16304_v35 }
 0x83f   : > { %12929 = vmatmul.mubr.msk.bf16.gmra.mrb[16].mxu0 %vm280_vm3, %v16394_v32 }
 0x840   : > { %12932 = vmatprep.mubr.msk.bf16.mxu0 %vm280_vm3, %v16398_v9 }
 0x845   : > { %12729 = vmatmul.mubr.msk.bf16.gmra.mrb[16].mxu1 %vm280_vm3, %v16316_v50 }
 0x846   : > { %12732 = vmatprep.mubr.msk.bf16.mxu1 %vm280_vm3, %v16320_v49 }
 0x84d   : > { %12733 = vmatmul.mubr.msk.bf16.gmra.mrb[20].mxu1 %vm280_vm3, %v16338_v21 }
 0x84e   : > { %12736 = vmatprep.mubr.msk.bf16.mxu1 %vm280_vm3, %v16342_v53 }
 0x855   : > { %12737 = vmatmul.mubr.msk.bf16.gmra.mrb[24].mxu1 %vm280_vm3, %v16362_v43 }
 0x856   : > { %12740 = vmatprep.mubr.msk.bf16.mxu1 %vm280_vm3, %v16366_v5 }
 0x85d   : > { %12741 = vmatmul.mubr.msk.bf16.gmra.mrb[28].mxu1 %vm280_vm3, %v16379_v23 }
 0x85e   : > { %12752 = vmatprep.mubr.msk.bf16.mxu1 %vm280_vm3, %v7470_v2  ;;  %v16437_v2 = vld [vmem:[%s16867_s5 + $0x60] sm:$0xff]  }
 0x865   : > { %12753 = vmatmul.mubr.msk.bf16.vlgmr.msra.gmra.mrb[0].mxu1 %vm280_vm3, %v16392_v36 }
 0x866   : > { %12785 = vmatpush3.bf16.msra.mxu1 %v16301_v33  ;;  %12756 = vmatprep.mubr.msk.bf16.mxu1 %vm280_vm3, %v16396_v17  ;;  %v16417_v33 = vpack.c.bf16 %v7567_v8, %v7566_v20  ;;  %v16458_v20 = vpack.c.bf16 %v7575_v28, %v7574_v14  ;;  %v7462_v14 = vld [vmem:[#allocation2 + $0x1c7] sm:$0xff]  ;;  %v7463_v28 = vld [vmem:[#allocation2 + $0x1cf] sm:$0xff] }
 0x867   : > { %12786 = vmatprep.subr.bf16.mxu1 %v14209_v1  ;;  %v16509_v12 = vpack.c.bf16 %v7463_v28, %v7462_v14  ;;  %v14222_v28 = vld [vmem:[%s16867_s5 + $0x108] sm:$0xff]  }
 0x868   : > { %12933 = vmatmul.mubr.msk.bf16.gmra.mrb[20].mxu0 %vm280_vm3, %v16417_v33 }
 0x869   : > { %12936 = vmatprep.mubr.msk.bf16.mxu0 %vm280_vm3, %v16421_v54 }
 0x86a   : > { %12787 = vmatpush3.bf16.msra.mxu1 %v14209_v1  ;;  %v7450_v1 = vld [vmem:[#allocation2 + $0x107] sm:$0xff] }
 0x86b   : > { %12788 = vmatprep.subr.bf16.mxu1 %v14211_v30  ;;  %v16460_v8 = vpack.c.bf16 %v7451_v61, %v7450_v1  ;;  %v14220_v1 = vld [vmem:[%s16867_s5 + $0x100] sm:$0xff]   ;;  %v16507_v61 = vpack.c.bf16 %v7461_v59, %v7460_v27  ;;  %v7469_v59 = vld [vmem:[#allocation2 + $0x22f] sm:$0xff] }
 0x86c   : > { %v7468_v27 = vld [vmem:[#allocation2 + $0x227] sm:$0xff] }
 0x86d   : > { %12757 = vmatmul.mubr.msk.bf16.gmra.mrb[4].mxu1 %vm280_vm3, %v16415_v45  ;;  %v7487_v14 = vpack.c.bf16 %v7469_v59, %v7468_v27 }
 0x86e   : > { %12760 = vmatprep.mubr.msk.bf16.mxu1 %vm280_vm3, %v16419_v34  ;;  %12789 = vmatpush3.bf16.msra.mxu1 %v14211_v30  ;;  %v7454_v30 = vld [vmem:[#allocation2 + $0x147] sm:$0xff] }
 0x86f   : > { %12790 = vmatprep.subr.bf16.mxu1 %v14213_v18 }
 0x870   : > { %12937 = vmatmul.mubr.msk.bf16.gmra.mrb[24].mxu0 %vm280_vm3, %v16441_v0 }
 0x871   : > { %12940 = vmatprep.mubr.msk.bf16.mxu0 %vm280_vm3, %v16445_v25 }
 0x872   : > { %12791 = vmatpush3.bf16.msra.mxu1 %v14213_v18  ;;  %v16472_v18 = vpack.c.bf16 %v7455_v15, %v7454_v30  ;;  %v7465_v30 = vld [vmem:[#allocation2 + $0x1ef] sm:$0xff] }
 0x873   : > { %12824 = vmatprep.subr.bf16.mxu1 %v16437_v2  ;;  %v7542_v15 = vld [vmem:[#allocation2 + $0x9] sm:$0xff]  ;;  %v16519_v39 = vpack.c.bf16 %v7465_v30, %v7464_v48  ;;  %v14224_v48 = vld [vmem:[%s16867_s5 + $0x118] sm:$0xff]  }
 0x875   : > { %12761 = vmatmul.mubr.msk.bf16.gmra.mrb[8].mxu1 %vm280_vm3, %v16439_v52 }
 0x876   : > { %12764 = vmatprep.mubr.msk.bf16.mxu1 %vm280_vm3, %v16443_v57 }
 0x878   : > { %12941 = vmatmul.mubr.msk.bf16.gmra.mrb[28].mxu0 %vm280_vm3, %v16458_v20 }
 0x879   : > { %12952 = vmatprep.mubr.msk.bf16.mxu0 %vm280_vm3, %v16396_v17 }
 0x87d   : > { %12765 = vmatmul.mubr.msk.bf16.gmra.mrb[12].mxu1 %vm280_vm3, %v16456_v63 }
 0x87e   : > { %12768 = vmatprep.mubr.msk.bf16.mxu1 %vm280_vm3, %v16460_v8 }
 0x880   : > { %12953 = vmatmul.mubr.msk.bf16.vlgmr.msra.gmra.mrb[0].mxu0 %vm280_vm3, %v16415_v45 }
 0x881   : > { %12985 = vmatpush3.bf16.msra.mxu0 %v16360_v47  ;;  %12956 = vmatprep.mubr.msk.bf16.mxu0 %vm280_vm3, %v16419_v34  ;;  %v14218_v47 = vld [vmem:[%s16867_s5 + $0xf8] sm:$0xff]  }
 0x882   : > { %12986 = vmatprep.subr.bf16.mxu0 %v14214_v38 }
 0x885   : > { %12769 = vmatmul.mubr.msk.bf16.gmra.mrb[16].mxu1 %vm280_vm3, %v16470_v37  ;;  %12987 = vmatpush3.bf16.msra.mxu0 %v14214_v38  ;;  %v7543_v38 = vld [vmem:[#allocation2 + $0x11] sm:$0xff] }
 0x886   : > { %12772 = vmatprep.mubr.msk.bf16.mxu1 %vm280_vm3, %v16472_v18  ;;  %12988 = vmatprep.subr.bf16.mxu0 %v14216_v58  ;;  %v7578_v40 = vpack.c.bf16 %v7543_v38, %v7542_v15  ;;  %v10955_v38 = vld [vmem:[%s14321_s18 + $0x88] sm:$0xff] }
 0x888   : > { %12957 = vmatmul.mubr.msk.bf16.gmra.mrb[4].mxu0 %vm280_vm3, %v16439_v52 }
 0x889   : > { %12960 = vmatprep.mubr.msk.bf16.mxu0 %vm280_vm3, %v16443_v57  ;;  %12989 = vmatpush3.bf16.msra.mxu0 %v14216_v58  ;;  %v7467_v58 = vld [vmem:[#allocation2 + $0x20f] sm:$0xff] }
 0x88a   : > { %12990 = vmatprep.subr.bf16.mxu0 %v14218_v47 }
 0x88d   : > { %12773 = vmatmul.mubr.msk.bf16.gmra.mrb[20].mxu1 %vm280_vm3, %v16489_v24  ;;  %12991 = vmatpush3.bf16.msra.mxu0 %v14218_v47 }
 0x88e   : > { %12776 = vmatprep.mubr.msk.bf16.mxu1 %vm280_vm3, %v16491_v46  ;;  %13024 = vmatprep.subr.bf16.mxu0 %v14220_v1 }
 0x890   : > { %12961 = vmatmul.mubr.msk.bf16.gmra.mrb[8].mxu0 %vm280_vm3, %v16456_v63 }
 0x891   : > { %12964 = vmatprep.mubr.msk.bf16.mxu0 %vm280_vm3, %v16460_v8 }
 0x895   : > { %12777 = vmatmul.mubr.msk.bf16.gmra.mrb[24].mxu1 %vm280_vm3, %v16507_v61 }
 0x896   : > { %12780 = vmatprep.mubr.msk.bf16.mxu1 %vm280_vm3, %v16509_v12 }
 0x898   : > { %12965 = vmatmul.mubr.msk.bf16.gmra.mrb[12].mxu0 %vm280_vm3, %v16470_v37 }
 0x899   : > { %12968 = vmatprep.mubr.msk.bf16.mxu0 %vm280_vm3, %v16472_v18 }
 0x89d   : > { %12781 = vmatmul.mubr.msk.bf16.gmra.mrb[28].mxu1 %vm280_vm3, %v16519_v39 }
 0x89e   : > { %12792 = vmatprep.mubr.msk.bf16.mxu1 %vm280_vm3, %v7578_v40 }
 0x8a0   : > { %12969 = vmatmul.mubr.msk.bf16.gmra.mrb[16].mxu0 %vm280_vm3, %v16489_v24 }
 0x8a1   : > { %12972 = vmatprep.mubr.msk.bf16.mxu0 %vm280_vm3, %v16491_v46 }
 0x8a5   : > { %12793 = vmatmul.mubr.msk.bf16.vlgmr.msra.gmra.mrb[0].mxu1 %vm280_vm3, %v16306_v13  ;;  %v14221_v13 = vld [vmem:[%s16867_s5 + $0x78] sm:$0xff]  }
 0x8a6   : > { %12825 = vmatpush3.bf16.msra.mxu1 %v16437_v2  ;;  %12796 = vmatprep.mubr.msk.bf16.mxu1 %vm280_vm3, %v16318_v26  ;;  %v7466_v2 = vld [vmem:[#allocation2 + $0x207] sm:$0xff] }
 0x8a7   : > { %12826 = vmatprep.subr.bf16.mxu1 %v14217_v11  ;;  %v16554_v47 = vpack.c.bf16 %v7467_v58, %v7466_v2 }
 0x8a8   : > { %12973 = vmatmul.mubr.msk.bf16.gmra.mrb[20].mxu0 %vm280_vm3, %v16507_v61 }
 0x8a9   : > { %12976 = vmatprep.mubr.msk.bf16.mxu0 %vm280_vm3, %v16509_v12 }
 0x8aa   : > { %12827 = vmatpush3.bf16.msra.mxu1 %v14217_v11 }
 0x8ab   : > { %12828 = vmatprep.subr.bf16.mxu1 %v14219_v3 }
 0x8ad   : > { %12797 = vmatmul.mubr.msk.bf16.gmra.mrb[4].mxu1 %vm280_vm3, %v16322_v41 }
 0x8ae   : > { %12800 = vmatprep.mubr.msk.bf16.mxu1 %vm280_vm3, %v16340_v10  ;;  %12829 = vmatpush3.bf16.msra.mxu1 %v14219_v3  ;;  %v10953_v3 = vld [vmem:[%s14321_s18 + $0x68] sm:$0xff] }
 0x8af   : > { %12830 = vmatprep.subr.bf16.mxu1 %v14221_v13 }
 0x8b0   : > { %12977 = vmatmul.mubr.msk.bf16.gmra.mrb[24].mxu0 %vm280_vm3, %v16519_v39 }
 0x8b1   : > { %12980 = vmatprep.mubr.msk.bf16.mxu0 %vm280_vm3, %v16554_v47 }
 0x8b2   : > { %12831 = vmatpush3.bf16.msra.mxu1 %v14221_v13 }
 0x8b3   : > { %13834 = vmatprep.subr.bf16.mxu1 %v16200_v51 }
 0x8b5   : > { %12801 = vmatmul.mubr.msk.bf16.gmra.mrb[8].mxu1 %vm280_vm3, %v16344_v7 }
 0x8b6   : > { %12804 = vmatprep.mubr.msk.bf16.mxu1 %vm280_vm3, %v16364_v55 }
 0x8b8   : > { %12981 = vmatmul.mubr.msk.bf16.gmra.mrb[28].mxu0 %vm280_vm3, %v7487_v14 }
 0x8b9   : > { %12992 = vmatprep.mubr.msk.bf16.mxu0 %vm280_vm3, %v16241_v62  ;;  %v14223_v62 = vld [vmem:[%s16867_s5 + $0x110] sm:$0xff]  }
 0x8bd   : > { %12805 = vmatmul.mubr.msk.bf16.gmra.mrb[12].mxu1 %vm280_vm3, %v16368_v4 }
 0x8be   : > { %12808 = vmatprep.mubr.msk.bf16.mxu1 %vm280_vm3, %v16381_v44 }
 0x8c0   : > { %12993 = vmatmul.mubr.msk.bf16.vlgmr.msra.gmra.mrb[0].mxu0 %vm280_vm3, %v16244_v6  ;;  %v7521_v6 = vld [vmem:[#allocation2 + $0x210] sm:$0xff] }
 0x8c1   : > { %13025 = vmatpush3.bf16.msra.mxu0 %v14220_v1  ;;  %12996 = vmatprep.mubr.msk.bf16.mxu0 %vm280_vm3, %v16265_v29  ;;  %v7522_v29 = vld [vmem:[#allocation2 + $0x228] sm:$0xff] }
 0x8c2   : > { %13026 = vmatprep.subr.bf16.mxu0 %v14222_v28 }
 0x8c5   : > { %12809 = vmatmul.mubr.msk.bf16.gmra.mrb[16].mxu1 %vm280_vm3, %v16383_v31  ;;  %13027 = vmatpush3.bf16.msra.mxu0 %v14222_v28  ;;  %v10954_v28 = vld [vmem:[%s14321_s18 + $0x70] sm:$0xff] }
 0x8c6   : > { %12812 = vmatprep.mubr.msk.bf16.mxu1 %vm280_vm3, %v16394_v32  ;;  %13028 = vmatprep.subr.bf16.mxu0 %v14223_v62 }
 0x8c8   : > { %12997 = vmatmul.mubr.msk.bf16.gmra.mrb[4].mxu0 %vm280_vm3, %v16267_v42 }
 0x8c9   : > { %13000 = vmatprep.mubr.msk.bf16.mxu0 %vm280_vm3, %v16286_v19  ;;  %13029 = vmatpush3.bf16.msra.mxu0 %v14223_v62  ;;  %v7577_v19 = vld [vmem:[#allocation2 + $0x231] sm:$0xff] }
 0x8ca   : > { %13030 = vmatprep.subr.bf16.mxu0 %v14224_v48 }
 0x8cd   : > { %12813 = vmatmul.mubr.msk.bf16.gmra.mrb[20].mxu1 %vm280_vm3, %v16398_v9  ;;  %13031 = vmatpush3.bf16.msra.mxu0 %v14224_v48 }
 0x8ce   : > { %12816 = vmatprep.mubr.msk.bf16.mxu1 %vm280_vm3, %v16417_v33 }
 0x8d0   : > { %13001 = vmatmul.mubr.msk.bf16.gmra.mrb[8].mxu0 %vm280_vm3, %v16288_v16 }
 0x8d1   : > { %13004 = vmatprep.mubr.msk.bf16.mxu0 %vm280_vm3, %v16304_v35 }
 0x8d5   : > { %12817 = vmatmul.mubr.msk.bf16.gmra.mrb[24].mxu1 %vm280_vm3, %v16421_v54 }
 0x8d6   : > { %12820 = vmatprep.mubr.msk.bf16.mxu1 %vm280_vm3, %v16441_v0 }
 0x8d8   : > { %13005 = vmatmul.mubr.msk.bf16.gmra.mrb[12].mxu0 %vm280_vm3, %v16316_v50 }
 0x8d9   : > { %13008 = vmatprep.mubr.msk.bf16.mxu0 %vm280_vm3, %v16320_v49 }
 0x8dd   : > { %12821 = vmatmul.mubr.msk.bf16.gmra.mrb[28].mxu1 %vm280_vm3, %v16445_v25 }
 0x8de   : > { %12832 = vmatprep.mubr.msk.bf16.mxu1 %vm280_vm3, %v16392_v36  ;;  %v16723_v36 = vld [vmem:[%s16868_s6] ss:$0 sm:$0xff] }
 0x8e0   : > { %13009 = vmatmul.mubr.msk.bf16.gmra.mrb[16].mxu0 %vm280_vm3, %v16338_v21 }
 0x8e1   : > { %13012 = vmatprep.mubr.msk.bf16.mxu0 %vm280_vm3, %v16342_v53 }
 0x8e5   : > { %12833 = vmatmul.mubr.msk.bf16.vlgmr.msra.gmra.mrb[0].mxu1 %vm280_vm3, %v16396_v17 }
 0x8e6   : > { %13838 = vmatpush3.bf16.msra.mxu1 %v16200_v51  ;;  %12836 = vmatprep.mubr.msk.bf16.mxu1 %vm280_vm3, %v16415_v45  ;;  %v7520_v51 = vld [vmem:[#allocation2 + $0x208] sm:$0xff] }
 0x8e7   : > { %13835 = vmatprep.subr.bf16.mxu1 %v16209_v22  ;;  %v10951_v45 = vld [vmem:[%s14321_s18 + $0x48] sm:$0xff] }
 0x8e8   : > { %13013 = vmatmul.mubr.msk.bf16.gmra.mrb[20].mxu0 %vm280_vm3, %v16362_v43 }
 0x8e9   : > { %13016 = vmatprep.mubr.msk.bf16.mxu0 %vm280_vm3, %v16366_v5 }
 0x8ea   : > { %13839 = vmatpush3.bf16.msra.mxu1 %v16209_v22  ;;  %v7540_v22 = vpack.c.bf16 %v7521_v6, %v7520_v51 }
 0x8eb   : > { %13836 = vmatprep.subr.bf16.mxu1 %v16219_v60 }
 0x8ed   : > { %12837 = vmatmul.mubr.msk.bf16.gmra.mrb[4].mxu1 %vm280_vm3, %v16419_v34 }
 0x8ee   : > { %12840 = vmatprep.mubr.msk.bf16.mxu1 %vm280_vm3, %v16439_v52  ;;  %13840 = vmatpush3.bf16.msra.mxu1 %v16219_v60  ;;  %v7523_v60 = vld [vmem:[#allocation2 + $0x230] sm:$0xff]  ;;  %v10949_v52 = vld [vmem:[%s14321_s18 + $0x28] sm:$0xff] }
 0x8ef   : > { %13837 = vmatprep.subr.bf16.mxu1 %v16227_v56  ;;  %v7541_v42 = vpack.c.bf16 %v7523_v60, %v7522_v29 }
 0x8f0   : > { %13017 = vmatmul.mubr.msk.bf16.gmra.mrb[24].mxu0 %vm280_vm3, %v16379_v23 }
 0x8f1   : > { %13020 = vmatprep.mubr.msk.bf16.mxu0 %vm280_vm3, %v7540_v22 }
 0x8f2   : > { %13841 = vmatpush3.bf16.msra.mxu1 %v16227_v56  ;;  %v7576_v56 = vld [vmem:[#allocation2 + $0x229] sm:$0xff] }
 0x8f3   : > { %v7595_v16 = vpack.c.bf16 %v7577_v19, %v7576_v56 }
 0x8f5   : > { %12841 = vmatmul.mubr.msk.bf16.gmra.mrb[8].mxu1 %vm280_vm3, %v16443_v57 }
 0x8f6   : > { %12844 = vmatprep.mubr.msk.bf16.mxu1 %vm280_vm3, %v16456_v63  ;;  %v10952_v63 = vld [vmem:[%s14321_s18 + $0x50] sm:$0xff] }
 0x8f8   : > { %13021 = vmatmul.mubr.msk.bf16.gmra.mrb[28].mxu0 %vm280_vm3, %v7541_v42  ;;  %v10959_v42 = vld [vmem:[%s14321_s18 + $0xc8] sm:$0xff] }
 0x8f9   : > { %13032 = vmatprep.mubr.msk.bf16.mxu0 %vm280_vm3, %v16318_v26 }
 0x8fd   : > { %12845 = vmatmul.mubr.msk.bf16.gmra.mrb[12].mxu1 %vm280_vm3, %v16460_v8 }
 0x8fe   : > { %12848 = vmatprep.mubr.msk.bf16.mxu1 %vm280_vm3, %v16470_v37 }
 0x900   : > { %13033 = vmatmul.mubr.msk.bf16.vlgmr.msra.gmra.mrb[0].mxu0 %vm280_vm3, %v16322_v41 }
 0x901   : > { %13036 = vmatprep.mubr.msk.bf16.mxu0 %vm280_vm3, %v16340_v10 }
 0x905   : > { %12849 = vmatmul.mubr.msk.bf16.gmra.mrb[16].mxu1 %vm280_vm3, %v16472_v18  ;;  %v10950_v18 = vld [vmem:[%s14321_s18 + $0x30] sm:$0xff] }
 0x906   : > { %12852 = vmatprep.mubr.msk.bf16.mxu1 %vm280_vm3, %v16489_v24 }
 0x908   : > { %13037 = vmatmul.mubr.msk.bf16.gmra.mrb[4].mxu0 %vm280_vm3, %v16344_v7 }
 0x909   : > { %13040 = vmatprep.mubr.msk.bf16.mxu0 %vm280_vm3, %v16364_v55 }
 0x90d   : > { %12853 = vmatmul.mubr.msk.bf16.gmra.mrb[20].mxu1 %vm280_vm3, %v16491_v46 }
 0x90e   : > { %12856 = vmatprep.mubr.msk.bf16.mxu1 %vm280_vm3, %v16507_v61 }
 0x910   : > { %13041 = vmatmul.mubr.msk.bf16.gmra.mrb[8].mxu0 %vm280_vm3, %v16368_v4 }
 0x911   : > { %13044 = vmatprep.mubr.msk.bf16.mxu0 %vm280_vm3, %v16381_v44 }
 0x915   : > { %12857 = vmatmul.mubr.msk.bf16.gmra.mrb[24].mxu1 %vm280_vm3, %v16509_v12 }
 0x916   : > { %12860 = vmatprep.mubr.msk.bf16.mxu1 %vm280_vm3, %v16519_v39 }
 0x918   : > { %13045 = vmatmul.mubr.msk.bf16.gmra.mrb[12].mxu0 %vm280_vm3, %v16383_v31 }
 0x919   : > { %13048 = vmatprep.mubr.msk.bf16.mxu0 %vm280_vm3, %v16394_v32 }
 0x91d   : > { %12861 = vmatmul.mubr.msk.bf16.gmra.mrb[28].mxu1 %vm280_vm3, %v16554_v47  ;;  %v10956_v47 = vld [vmem:[%s14321_s18 + $0x90] sm:$0xff] }
 0x91e   : > { %12888 = vmatprep.mubr.msk.bf16.mxu1 %vm280_vm3, %v16316_v50 }
 0x920   : > { %13049 = vmatmul.mubr.msk.bf16.gmra.mrb[16].mxu0 %vm280_vm3, %v16398_v9 }
 0x921   : > { %13052 = vmatprep.mubr.msk.bf16.mxu0 %vm280_vm3, %v16417_v33 }
 0x925   : > { %12889 = vmatmul.mubr.msk.bf16.vlgmr.msra.gmra.mrb[16].mxu1 %vm280_vm3, %v16320_v49 }
 0x926   : > { %12892 = vmatprep.mubr.msk.bf16.mxu1 %vm280_vm3, %v16338_v21 }
 0x928   : > { %13053 = vmatmul.mubr.msk.bf16.gmra.mrb[20].mxu0 %vm280_vm3, %v16421_v54 }
 0x929   : > { %13056 = vmatprep.mubr.msk.bf16.mxu0 %vm280_vm3, %v16441_v0 }
 0x92d   : > { %12893 = vmatmul.mubr.msk.bf16.gmra.mrb[20].mxu1 %vm280_vm3, %v16342_v53 }
 0x92e   : > { %12896 = vmatprep.mubr.msk.bf16.mxu1 %vm280_vm3, %v16362_v43 }
 0x930   : > { %13057 = vmatmul.mubr.msk.bf16.gmra.mrb[24].mxu0 %vm280_vm3, %v16445_v25 }
 0x931   : > { %13060 = vmatprep.mubr.msk.bf16.mxu0 %vm280_vm3, %v16458_v20 }
 0x935   : > { %12897 = vmatmul.mubr.msk.bf16.gmra.mrb[24].mxu1 %vm280_vm3, %v16366_v5 }
 0x936   : > { %12900 = vmatprep.mubr.msk.bf16.mxu1 %vm280_vm3, %v16379_v23 }
 0x938   : > { %13061 = vmatmul.mubr.msk.bf16.gmra.mrb[28].mxu0 %vm280_vm3, %v7595_v16 }
 0x93d   : > { %12901 = vmatmul.mubr.msk.bf16.gmra.mrb[28].mxu1 %vm280_vm3, %v7540_v22 }
 0x9b8   : > { %v12834_v35 = vpop.f32.mrb[0].mxu1 }
 0x9b9   : > { %v8424_v50 = vpop.f32.mrb[1].mxu1 }
 0x9ba   : > { %v12835_v26 = vpop.f32.mrb[2].mxu1 }
 0x9bb   : > { %v8427_v49 = vpop.f32.mrb[3].mxu1 }
 0x9c0   : > { %v12838_v41 = vpop.f32.mrb[4].mxu1 }
 0x9c1   : > { %v8440_v21 = vpop.f32.mrb[5].mxu1 }
 0x9c2   : > { %v12839_v10 = vpop.f32.mrb[6].mxu1 }
 0x9c3   : > { %v8443_v53 = vpop.f32.mrb[7].mxu1 }
 0x9c8   : > { %v12842_v7 = vpop.f32.mrb[8].mxu1 }
 0x9c9   : > { %v8456_v43 = vpop.f32.mrb[9].mxu1 }
 0x9ca   : > { %v16708_v55 = vpop.f32.mrb[10].mxu1 }
 0x9cb   : > { %v16710_v5 = vpop.f32.mrb[11].mxu1 }
 0x9d0   : > { %v16712_v4 = vpop.f32.mrb[12].mxu1 }
 0x9d1   : > { %v16714_v23 = vpop.f32.mrb[13].mxu1 }
 0x9d2   : > { %v16716_v44 = vpop.f32.mrb[14].mxu1 }
 0x9d3   : > { %v16718_v31 = vpop.f32.mrb[15].mxu1  ;;  %v13034_v32 = vpop.f32.mrb[0].mxu0 }
 0x9d4   : > { %v13842_v17 = vadd.f32 %v13034_v32, %v12834_v35  ;;  %v9569_v9 = vpop.f32.mrb[1].mxu0  ;;  %v10957_v35 = vld [vmem:[%s14321_s18 + $0xa8] sm:$0xff] }
 0x9d5   : > { %v13843_v33 = vadd.f32 %v9569_v9, %v8424_v50  ;;  %v13035_v34 = vpop.f32.mrb[2].mxu0 }
 0x9d6   : > { %v9736_v54 = vadd.f32 %v13842_v17, %v16723_v36  ;;  %v13844_v0 = vadd.f32 %v13035_v34, %v12835_v26  ;;  %v9572_v57 = vpop.f32.mrb[3].mxu0 }
 0x9d7   : > { %v9734_v25 = vadd.f32 %v13843_v33, %v16723_v36  ;;  %v13845_v20 = vadd.f32 %v9572_v57, %v8427_v49  ;;  %v10963_v33 = vld [vmem:[%s14321_s18 + $0x108] sm:$0xff] }
 0x9d8   : > { %v9801_v8 = vadd.f32 %v10951_v45, %v9736_v54  ;;  %v9737_v37 = vadd.f32 %v13844_v0, %v16723_v36  ;;  %v10961_v0 = vld [vmem:[%s14321_s18 + $0xe8] sm:$0xff] }
 0x9d9   : > { %v9799_v24 = vadd.f32 %v10949_v52, %v9734_v25  ;;  %v9735_v46 = vadd.f32 %v13845_v20, %v16723_v36  ;;  %v10964_v20 = vld [vmem:[%s14321_s18 + $0x110] sm:$0xff] }
 0x9da   : > { %9833 = vst.msk [vmem:[%s14315_s15 + $0x10] sm:$0xff] %vm591_vm2, %v9801_v8  ;;  %v9802_v1 = vadd.f32 %v10952_v63, %v9737_v37 }
 0x9db   : > { %9831 = vst.msk [vmem:[%s14315_s15] sm:$0xff] %vm591_vm2, %v9799_v24  ;;  %v9800_v61 = vadd.f32 %v10950_v18, %v9735_v46  ;;  %v13038_v12 = vpop.f32.mrb[4].mxu0 }
 0x9dc   : > { %9834 = vst.msk [vmem:[%s14315_s15 + $0x18] sm:$0xff] %vm591_vm2, %v9802_v1  ;;  %v13846_v30 = vadd.f32 %v13038_v12, %v12838_v41  ;;  %v9585_v15 = vpop.f32.mrb[5].mxu0  ;;  %v10960_v41 = vld [vmem:[%s14321_s18 + $0xd0] sm:$0xff] }
 0x9dd   : > { %9832 = vst.msk [vmem:[%s14315_s15 + $0x8] sm:$0xff] %vm591_vm2, %v9800_v61  ;;  %v13847_v39 = vadd.f32 %v9585_v15, %v8440_v21  ;;  %v13039_v40 = vpop.f32.mrb[6].mxu0 }
 0x9de   : > { %v9740_v11 = vadd.f32 %v13846_v30, %v16723_v36  ;;  %v13848_v13 = vadd.f32 %v13039_v40, %v12839_v10  ;;  %v9588_v2 = vpop.f32.mrb[7].mxu0 }
 0x9df   : > { %v9738_v58 = vadd.f32 %v13847_v39, %v16723_v36  ;;  %v13849_v27 = vadd.f32 %v9588_v2, %v8443_v53 }
 0x9e0   : > { %v9805_v59 = vadd.f32 %v10955_v38, %v9740_v11  ;;  %v9741_v14 = vadd.f32 %v13848_v13, %v16723_v36  ;;  %v10967_v38 = vld [vmem:[%s14321_s18 + $0x148] sm:$0xff] }
 0x9e1   : > { %v9803_v62 = vadd.f32 %v10953_v3, %v9738_v58  ;;  %v9739_v48 = vadd.f32 %v13849_v27, %v16723_v36  ;;  %v10965_v13 = vld [vmem:[%s14321_s18 + $0x128] sm:$0xff]  ;;  %v10968_v27 = vld [vmem:[%s14321_s18 + $0x150] sm:$0xff] }
 0x9e2   : > { %9837 = vst.msk [vmem:[%s14315_s15 + $0x30] sm:$0xff] %vm591_vm2, %v9805_v59  ;;  %v9806_v51 = vadd.f32 %v10956_v47, %v9741_v14 }
 0x9e3   : > { %9835 = vst.msk [vmem:[%s14315_s15 + $0x20] sm:$0xff] %vm591_vm2, %v9803_v62  ;;  %v9804_v6 = vadd.f32 %v10954_v28, %v9739_v48  ;;  %v13042_v22 = vpop.f32.mrb[8].mxu0  ;;  %v10966_v62 = vld [vmem:[%s14321_s18 + $0x130] sm:$0xff] }
 0x9e4   : > { %9838 = vst.msk [vmem:[%s14315_s15 + $0x38] sm:$0xff] %vm591_vm2, %v9806_v51  ;;  %v13850_v29 = vadd.f32 %v13042_v22, %v12842_v7  ;;  %v9601_v60 = vpop.f32.mrb[9].mxu0  ;;  %v10958_v7 = vld [vmem:[%s14321_s18 + $0xb0] sm:$0xff] }
 0x9e5   : > { %9836 = vst.msk [vmem:[%s14315_s15 + $0x28] sm:$0xff] %vm591_vm2, %v9804_v6  ;;  %v13851_v56 = vadd.f32 %v9601_v60, %v8456_v43  ;;  %v13043_v19 = vpop.f32.mrb[10].mxu0 }
 0x9e6   : > { %v9744_v16 = vadd.f32 %v13850_v29, %v16723_v36  ;;  %v13852_v50 = vadd.f32 %v13043_v19, %v16708_v55  ;;  %v9604_v26 = vpop.f32.mrb[11].mxu0 }
 0x9e7   : > { %v9742_v49 = vadd.f32 %v13851_v56, %v16723_v36  ;;  %v13853_v21 = vadd.f32 %v9604_v26, %v16710_v5 }
 0x9e8   : > { %v9809_v10 = vadd.f32 %v10959_v42, %v9744_v16  ;;  %v9745_v53 = vadd.f32 %v13852_v50, %v16723_v36 }
 0x9e9   : > { %v9807_v43 = vadd.f32 %v10957_v35, %v9742_v49  ;;  %v9743_v32 = vadd.f32 %v13853_v21, %v16723_v36  ;;  %v10971_v35 = vld [vmem:[%s14321_s18 + $0x188] sm:$0xff] }
 0x9ea   : > { %9841 = vst.msk [vmem:[%s14315_s15 + $0x50] sm:$0xff] %vm591_vm2, %v9809_v10  ;;  %v9810_v17 = vadd.f32 %v10960_v41, %v9745_v53  ;;  %v10969_v21 = vld [vmem:[%s14321_s18 + $0x168] sm:$0xff] }
 0x9eb   : > { %9839 = vst.msk [vmem:[%s14315_s15 + $0x40] sm:$0xff] %vm591_vm2, %v9807_v43  ;;  %v9808_v55 = vadd.f32 %v10958_v7, %v9743_v32  ;;  %v13046_v9 = vpop.f32.mrb[12].mxu0  ;;  %v10972_v43 = vld [vmem:[%s14321_s18 + $0x190] sm:$0xff] }
 0x9ec   : > { %9842 = vst.msk [vmem:[%s14315_s15 + $0x58] sm:$0xff] %vm591_vm2, %v9810_v17  ;;  %v13854_v5 = vadd.f32 %v13046_v9, %v16712_v4  ;;  %v9617_v45 = vpop.f32.mrb[13].mxu0  ;;  %v10970_v9 = vld [vmem:[%s14321_s18 + $0x170] sm:$0xff] }
 0x9ed   : > { %9840 = vst.msk [vmem:[%s14315_s15 + $0x48] sm:$0xff] %vm591_vm2, %v9808_v55  ;;  %v13855_v34 = vadd.f32 %v9617_v45, %v16714_v23  ;;  %v13047_v54 = vpop.f32.mrb[14].mxu0  ;;  %v10962_v23 = vld [vmem:[%s14321_s18 + $0xf0] sm:$0xff] }
 0x9ee   : > { %v9748_v52 = vadd.f32 %v13854_v5, %v16723_v36  ;;  %v13856_v57 = vadd.f32 %v13047_v54, %v16716_v44  ;;  %v9620_v25 = vpop.f32.mrb[15].mxu0 }
 0x9ef   : > { %v9746_v63 = vadd.f32 %v13855_v34, %v16723_v36  ;;  %v13857_v4 = vadd.f32 %v9620_v25, %v16718_v31 }
 0x9f0   : > { %v9813_v8 = vadd.f32 %v10963_v33, %v9748_v52  ;;  %v9749_v37 = vadd.f32 %v13856_v57, %v16723_v36 }
 0x9f1   : > { %v9811_v18 = vadd.f32 %v10961_v0, %v9746_v63  ;;  %v9747_v24 = vadd.f32 %v13857_v4, %v16723_v36 }
 0x9f2   : > { %9845 = vst.msk [vmem:[%s14315_s15 + $0x70] sm:$0xff] %vm591_vm2, %v9813_v8  ;;  %v9814_v46 = vadd.f32 %v10964_v20, %v9749_v37  ;;  %v10975_v20 = vld [vmem:[%s14321_s18 + $0x1c8] sm:$0xff] }
 0x9f3   : > { %9843 = vst.msk [vmem:[%s14315_s15 + $0x60] sm:$0xff] %vm591_vm2, %v9811_v18  ;;  %v9812_v1 = vadd.f32 %v10962_v23, %v9747_v24  ;;  %v13050_v61 = vpop.f32.mrb[16].mxu0  ;;  %v10973_v18 = vld [vmem:[%s14321_s18 + $0x1a8] sm:$0xff] }
 0x9f4   : > { %9846 = vst.msk [vmem:[%s14315_s15 + $0x78] sm:$0xff] %vm591_vm2, %v9814_v46  ;;  %v9633_v30 = vpop.f32.mrb[17].mxu0 }
 0x9f5   : > { %9844 = vst.msk [vmem:[%s14315_s15 + $0x68] sm:$0xff] %vm591_vm2, %v9812_v1  ;;  %v13051_v40 = vpop.f32.mrb[18].mxu0  ;;  %v10976_v1 = vld [vmem:[%s14321_s18 + $0x1d0] sm:$0xff] }
 0x9f6   : > { %v9636_v58 = vpop.f32.mrb[19].mxu0 }
 0x9f8   : > { %v12890_v44 = vpop.f32.mrb[16].mxu1 }
 0x9f9   : > { %v8717_v31 = vpop.f32.mrb[17].mxu1  ;;  %v13858_v12 = vadd.f32 %v13050_v61, %v12890_v44 }
 0x9fa   : > { %v12891_v15 = vpop.f32.mrb[18].mxu1  ;;  %v13859_v39 = vadd.f32 %v9633_v30, %v8717_v31  ;;  %v10974_v30 = vld [vmem:[%s14321_s18 + $0x1b0] sm:$0xff] }
 0x9fb   : > { %v8720_v11 = vpop.f32.mrb[19].mxu1  ;;  %v9752_v3 = vadd.f32 %v13858_v12, %v16723_v36  ;;  %v13860_v2 = vadd.f32 %v13051_v40, %v12891_v15  ;;  %v13054_v60 = vpop.f32.mrb[20].mxu0 }
 0x9fc   : > { %v9750_v47 = vadd.f32 %v13859_v39, %v16723_v36  ;;  %v13861_v59 = vadd.f32 %v9636_v58, %v8720_v11  ;;  %v9649_v19 = vpop.f32.mrb[21].mxu0 }
 0x9fd   : > { %v9817_v14 = vadd.f32 %v10967_v38, %v9752_v3  ;;  %v9753_v28 = vadd.f32 %v13860_v2, %v16723_v36  ;;  %v13055_v26 = vpop.f32.mrb[22].mxu0 }
 0x9fe   : > { %v9815_v48 = vadd.f32 %v10965_v13, %v9750_v47  ;;  %v9751_v51 = vadd.f32 %v13861_v59, %v16723_v36  ;;  %v9652_v53 = vpop.f32.mrb[23].mxu0 }
 0x9ff   : > { %9849 = vst.msk [vmem:[%s14315_s15 + $0x90] sm:$0xff] %vm591_vm2, %v9817_v14  ;;  %v9818_v6 = vadd.f32 %v10968_v27, %v9753_v28  ;;  %v10979_v27 = vld [vmem:[%s14321_s18 + $0x208] sm:$0xff] }
 0xa00   : > { %v12894_v22 = vpop.f32.mrb[20].mxu1  ;;  %9847 = vst.msk [vmem:[%s14315_s15 + $0x80] sm:$0xff] %vm591_vm2, %v9815_v48  ;;  %v9816_v29 = vadd.f32 %v10966_v62, %v9751_v51  ;;  %v10977_v48 = vld [vmem:[%s14321_s18 + $0x1e8] sm:$0xff] }
 0xa01   : > { %v8733_v42 = vpop.f32.mrb[21].mxu1  ;;  %9850 = vst.msk [vmem:[%s14315_s15 + $0x98] sm:$0xff] %vm591_vm2, %v9818_v6  ;;  %v13862_v56 = vadd.f32 %v13054_v60, %v12894_v22 }
 0xa02   : > { %v12895_v16 = vpop.f32.mrb[22].mxu1  ;;  %9848 = vst.msk [vmem:[%s14315_s15 + $0x88] sm:$0xff] %vm591_vm2, %v9816_v29  ;;  %v13863_v50 = vadd.f32 %v9649_v19, %v8733_v42  ;;  %v10980_v29 = vld [vmem:[%s14321_s18 + $0x210] sm:$0xff] }
 0xa03   : > { %v8736_v49 = vpop.f32.mrb[23].mxu1  ;;  %v9756_v41 = vadd.f32 %v13862_v56, %v16723_v36  ;;  %v13864_v10 = vadd.f32 %v13055_v26, %v12895_v16  ;;  %v13058_v52 = vpop.f32.mrb[24].mxu0  ;;  %v10978_v19 = vld [vmem:[%s14321_s18 + $0x1f0] sm:$0xff] }
 0xa04   : > { %v9754_v7 = vadd.f32 %v13863_v50, %v16723_v36  ;;  %v13865_v32 = vadd.f32 %v9652_v53, %v8736_v49  ;;  %v9665_v25 = vpop.f32.mrb[25].mxu0 }
 0xa05   : > { %v9821_v17 = vadd.f32 %v10971_v35, %v9756_v41  ;;  %v9757_v55 = vadd.f32 %v13864_v10, %v16723_v36  ;;  %v13059_v8 = vpop.f32.mrb[26].mxu0 }
 0xa06   : > { %v9819_v5 = vadd.f32 %v10969_v21, %v9754_v7  ;;  %v9755_v45 = vadd.f32 %v13865_v32, %v16723_v36  ;;  %v9668_v46 = vpop.f32.mrb[27].mxu0 }
 0xa07   : > { %9853 = vst.msk [vmem:[%s14315_s15 + $0xb0] sm:$0xff] %vm591_vm2, %v9821_v17  ;;  %v9822_v33 = vadd.f32 %v10972_v43, %v9757_v55 }
 0xa08   : > { %v12898_v34 = vpop.f32.mrb[24].mxu1  ;;  %9851 = vst.msk [vmem:[%s14315_s15 + $0xa0] sm:$0xff] %vm591_vm2, %v9819_v5  ;;  %v9820_v54 = vadd.f32 %v10970_v9, %v9755_v45 }
 0xa09   : > { %v8749_v0 = vpop.f32.mrb[25].mxu1  ;;  %9854 = vst.msk [vmem:[%s14315_s15 + $0xb8] sm:$0xff] %vm591_vm2, %v9822_v33  ;;  %v13866_v57 = vadd.f32 %v13058_v52, %v12898_v34 }
 0xa0a   : > { %v12899_v63 = vpop.f32.mrb[26].mxu1  ;;  %9852 = vst.msk [vmem:[%s14315_s15 + $0xa8] sm:$0xff] %vm591_vm2, %v9820_v54  ;;  %v13867_v4 = vadd.f32 %v9665_v25, %v8749_v0 }
 0xa0b   : > { %v8752_v37 = vpop.f32.mrb[27].mxu1  ;;  %v9760_v23 = vadd.f32 %v13866_v57, %v16723_v36  ;;  %v13868_v24 = vadd.f32 %v13059_v8, %v12899_v63  ;;  %v13062_v3 = vpop.f32.mrb[28].mxu0 }
 0xa0c   : > { %v9758_v44 = vadd.f32 %v13867_v4, %v16723_v36  ;;  %v13869_v61 = vadd.f32 %v9668_v46, %v8752_v37  ;;  %v9681_v58 = vpop.f32.mrb[29].mxu0 }
 0xa0d   : > { %v9825_v31 = vadd.f32 %v10975_v20, %v9760_v23  ;;  %v9761_v12 = vadd.f32 %v13868_v24, %v16723_v36  ;;  %v13063_v14 = vpop.f32.mrb[30].mxu0 }
 0xa0e   : > { %v9823_v15 = vadd.f32 %v10973_v18, %v9758_v44  ;;  %v9759_v38 = vadd.f32 %v13869_v61, %v16723_v36  ;;  %v9684_v6 = vpop.f32.mrb[31].mxu0 }
 0xa0f   : > { %9857 = vst.msk [vmem:[%s14315_s15 + $0xd0] sm:$0xff] %vm591_vm2, %v9825_v31  ;;  %v9826_v39 = vadd.f32 %v10976_v1, %v9761_v12 }
 0xa10   : > { %v12902_v40 = vpop.f32.mrb[28].mxu1  ;;  %9855 = vst.msk [vmem:[%s14315_s15 + $0xc0] sm:$0xff] %vm591_vm2, %v9823_v15  ;;  %v9824_v11 = vadd.f32 %v10974_v30, %v9759_v38 }
 0xa11   : > { %v8765_v13 = vpop.f32.mrb[29].mxu1  ;;  %9858 = vst.msk [vmem:[%s14315_s15 + $0xd8] sm:$0xff] %vm591_vm2, %v9826_v39  ;;  %v13870_v2 = vadd.f32 %v13062_v3, %v12902_v40 }
 0xa12   : > { %v12903_v47 = vpop.f32.mrb[30].mxu1  ;;  %9856 = vst.msk [vmem:[%s14315_s15 + $0xc8] sm:$0xff] %vm591_vm2, %v9824_v11  ;;  %v13871_v59 = vadd.f32 %v9681_v58, %v8765_v13 }
 0xa13   : > { %v8768_v28 = vpop.f32.mrb[31].mxu1  ;;  %v9764_v62 = vadd.f32 %v13870_v2, %v16723_v36  ;;  %v13872_v51 = vadd.f32 %v13063_v14, %v12903_v47 }
 0xa14   : > { %v9762_v22 = vadd.f32 %v13871_v59, %v16723_v36  ;;  %v13873_v60 = vadd.f32 %v9684_v6, %v8768_v28 }
 0xa15   : > { %v9829_v42 = vadd.f32 %v10979_v27, %v9764_v62  ;;  %v9765_v56 = vadd.f32 %v13872_v51, %v16723_v36 }
 0xa16   : > { %v9827_v16 = vadd.f32 %v10977_v48, %v9762_v22  ;;  %v9763_v35 = vadd.f32 %v13873_v60, %v16723_v36 }
 0xa17   : > { %9861 = vst.msk [vmem:[%s14315_s15 + $0xf0] sm:$0xff] %vm591_vm2, %v9829_v42  ;;  %v9830_v50 = vadd.f32 %v10980_v29, %v9765_v56 }
 0xa18   : > { %9859 = vst.msk [vmem:[%s14315_s15 + $0xe0] sm:$0xff] %vm591_vm2, %v9827_v16  ;;  %v9828_v26 = vadd.f32 %v10978_v19, %v9763_v35 }
 0xa19   : > { %9862 = vst.msk [vmem:[%s14315_s15 + $0xf8] sm:$0xff] %vm591_vm2, %v9830_v50 }
 0xa1a   : > { %9860 = vst.msk [vmem:[%s14315_s15 + $0xe8] sm:$0xff] %vm591_vm2, %v9828_v26 }
 0xa1b PF: > { %s17_s24 = sadd.s32 1, %s14235_s24  }
 0xa1c   : > { %p14_p5 = scmp.ge.s32.totalorder %s17_s24, 4  }
 0xa1e   :  { %16 = sbr.rel (!%p14_p5) target bundleno = 1 (0x1), region = 135 }

</bundles_post_ra>
